<compile_context>
chip_gen: v6e
topology: v6e:2x2x1
jax: 0.10.0
libtpu: 0.0.40
codegen_flags: <defaults>
</compile_context>

<pallas_src>
import functools

import jax
import jax.numpy as jnp
from jax import lax
from jax.experimental import pallas as pl
from jax.experimental.pallas import tpu as pltpu


def _sigmoid(x):
    # Exact identity sigmoid(x) == 0.5*tanh(0.5*x)+0.5 ; one EUP transcendental.
    return 0.5 * jnp.tanh(0.5 * x) + 0.5


# ----------------------------------------------------------------------------
# Fused kernel: conv1+sigmoid+pool1 -> conv2+sigmoid+pool2 -> fc1 -> fc2 -> fc3
# ----------------------------------------------------------------------------
def _lenet_kernel(p1_ref, w1_ref, b1_ref, w2_ref, b2_ref,
                  w3_ref, b3_ref, w4_ref, b4_ref, w5_ref, b5_ref,
                  o_ref, a1_ref, p2_ref, pf_ref, a2f_ref, *, n_batch):
    f32 = jnp.float32
    bf16 = jnp.bfloat16
    w = n_batch * 196            # pooled conv1 width: cols (n, yo, xo), row stride 14
    span2 = w - 60               # conv2 output width (incl. junk columns)
    wp = span2 - 15              # width of the 2x2-pool 4-tap sums

    # --- conv1 + sigmoid + 2x2 avg pool ------------------------------------
    # p1_ref[p] holds im2col patches of the p-th pool tap; pooling = mean of
    # the four per-tap conv+sigmoid results.  Rows 6,7 of w1/b1 are zero pad.
    w1 = w1_ref[...]                                        # [8, 25] bf16
    b1b = jnp.broadcast_to(b1_ref[...], (8, w))             # hoisted out of the loop
    a1 = jnp.zeros((8, w), f32)
    for p in range(4):
        c1 = jnp.dot(w1, p1_ref[p], preferred_element_type=f32)
        a1 = a1 + _sigmoid(c1 + b1b)
    a1_ref[...] = a1 * 0.25                                 # [8, w] (rows 6,7 junk)

    # --- conv2 as ONE K=200 dot via an in-VMEM im2col -----------------------
    # Each 5x5 tap (di,dj) is a contiguous lane slice of a1 at offset 14*di+dj
    # ("junk column" trick); tap k occupies 8 aligned rows of the scratch, the
    # 2 pad rows are killed by zero weight columns.
    for k in range(25):
        di, dj = divmod(k, 5)
        off = 14 * di + dj
        p2_ref[8 * k:8 * k + 8, :] = a1_ref[:, off:off + span2]
    c2 = _sigmoid(jnp.dot(w2_ref[...], p2_ref[...].astype(bf16),
                          preferred_element_type=f32) + b2_ref[...])   # [16, span2]

    # --- 2x2 avg pool as 4 shifted adds + compaction of the 25 valid windows -
    pf_ref[...] = 0.25 * (c2[:, 0:wp] + c2[:, 1:wp + 1]
                          + c2[:, 14:wp + 14] + c2[:, 15:wp + 15])
    # Flattened features as a [400, N] slab, rows ordered (s = yo*5+xo, channel)
    # to match the wrapper-permuted fc1 weight.
    for s in range(25):
        yo, xo = divmod(s, 5)
        for nn in range(n_batch):
            col = nn * 196 + 28 * yo + 2 * xo
            a2f_ref[16 * s:16 * s + 16, nn:nn + 1] = pf_ref[:, col:col + 1]

    # --- fc1 / fc2 / fc3 (flatten order absorbed into w3's column permutation)
    h = _sigmoid(jnp.dot(w3_ref[...], a2f_ref[...].astype(bf16),
                         preferred_element_type=f32) + b3_ref[...])
    h = _sigmoid(jnp.dot(w4_ref[...], h.astype(bf16),
                         preferred_element_type=f32) + b4_ref[...])
    o_ref[...] = (jnp.dot(w5_ref[...], h.astype(bf16),
                          preferred_element_type=f32)
                  + b5_ref[...]).astype(o_ref.dtype)


# ----------------------------------------------------------------------------
# Wrapper
# ----------------------------------------------------------------------------
def lenet_forward(x_nchw, params):
    n = x_nchw.shape[0]
    bf16 = jnp.bfloat16
    f32 = jnp.float32

    # conv1 im2col (depends only on the input image); columns ordered
    # (pool-tap p=(pr,pc), n, yo, xo) so the kernel pools with 4 adds.
    x_pad = jnp.pad(x_nchw[:, 0], ((0, 0), (2, 2), (2, 2)))             # [N,32,32]
    taps = jnp.stack([x_pad[:, i:i + 28, j:j + 28]
                      for i in range(5) for j in range(5)], axis=0)     # [25,N,28,28]
    taps = taps.reshape(25, n, 14, 2, 14, 2)                            # k,n,yo,pr,xo,pc
    p1 = taps.transpose(3, 5, 0, 1, 2, 4).reshape(4, 25, n * 196).astype(bf16)

    # Weight / bias layouts expected by the kernel (weights bf16, biases f32).
    w1m = jnp.pad(params['w1'].reshape(6, 25), ((0, 2), (0, 0))).astype(bf16)   # [8,25]
    b1 = jnp.pad(params['b1'].reshape(6, 1), ((0, 2), (0, 0))).astype(f32)      # [8,1]
    # conv2 weight columns (k=(di,dj), ci) padded 6->8 per tap -> [16, 200].
    w2p = jnp.pad(jnp.transpose(params['w2'], (0, 2, 3, 1)).reshape(16, 25, 6),
                  ((0, 0), (0, 0), (0, 2))).reshape(16, 200).astype(bf16)
    b2 = params['b2'].reshape(16, 1).astype(f32)
    # fc1 weight columns reordered (s, c) to match the a2 slab assembled in VMEM.
    w3f = params['w3'].reshape(120, 16, 25).transpose(0, 2, 1).reshape(120, 400).astype(bf16)
    b3 = params['b3'].reshape(120, 1).astype(f32)
    w4 = params['w4'].astype(bf16)
    b4 = params['b4'].reshape(84, 1).astype(f32)
    w5 = params['w5'].astype(bf16)
    b5 = params['b5'].reshape(10, 1).astype(f32)

    kernel = functools.partial(_lenet_kernel, n_batch=n)

    def spec(shape):
        return pl.BlockSpec(shape, lambda: (0,) * len(shape))

    span2 = n * 196 - 60
    ins = (p1, w1m, b1, w2p, b2, w3f, b3, w4, b4, w5, b5)
    out = pl.pallas_call(
        kernel,
        out_shape=jax.ShapeDtypeStruct((10, n), jnp.float32),
        in_specs=[spec(a.shape) for a in ins],
        out_specs=spec((10, n)),
        scratch_shapes=[
            pltpu.VMEM((8, n * 196), jnp.float32),       # pooled conv1 activation
            pltpu.VMEM((200, span2), jnp.float32),       # conv2 im2col (25 taps x 8 rows)
            pltpu.VMEM((16, span2 - 15), jnp.float32),   # 2x2 pool 4-tap sums
            pltpu.VMEM((400, n), jnp.float32),           # flattened features (s, c)
        ],
    )(*ins)
    return out.T                                                        # [N, 10]


# ----------------------------------------------------------------------------
# Pure-JAX reference (matches the PyTorch module)
# ----------------------------------------------------------------------------
def lenet_reference(x_nchw, params):
    def conv(x, w, b, pad):
        y = lax.conv_general_dilated(
            x, w, (1, 1), [(pad, pad), (pad, pad)],
            dimension_numbers=('NCHW', 'OIHW', 'NCHW'))
        return jax.nn.sigmoid(y + b[None, :, None, None])

    def pool(x):
        return lax.reduce_window(
            x, 0.0, lax.add, (1, 1, 2, 2), (1, 1, 2, 2), 'VALID') * 0.25

    x = conv(x_nchw, params['w1'], params['b1'], 2)
    x = pool(x)
    x = conv(x, params['w2'], params['b2'], 0)
    x = pool(x)
    x = x.reshape(x.shape[0], -1)
    x = jax.nn.sigmoid(x @ params['w3'].T + params['b3'])
    x = jax.nn.sigmoid(x @ params['w4'].T + params['b4'])
    return x @ params['w5'].T + params['b5']


# ----------------------------------------------------------------------------
# Main
# ----------------------------------------------------------------------------
if __name__ == "__main__":
    # Classic LeNet geometry, small batch.
    x = jax.random.normal(jax.random.PRNGKey(0), (2, 1, 28, 28), dtype=jnp.float32)

    ks = jax.random.split(jax.random.PRNGKey(42), 10)

    def u(k, shape, fan_in):
        bound = 1.0 / (fan_in ** 0.5)
        return jax.random.uniform(k, shape, jnp.float32, -bound, bound)

    params = {
        'w1': u(ks[0], (6, 1, 5, 5), 1 * 5 * 5),  'b1': u(ks[1], (6,), 1 * 5 * 5),
        'w2': u(ks[2], (16, 6, 5, 5), 6 * 5 * 5), 'b2': u(ks[3], (16,), 6 * 5 * 5),
        'w3': u(ks[4], (120, 400), 400),          'b3': u(ks[5], (120,), 400),
        'w4': u(ks[6], (84, 120), 120),           'b4': u(ks[7], (84,), 120),
        'w5': u(ks[8], (10, 84), 84),             'b5': u(ks[9], (10,), 84),
    }

    fwd = jax.jit(lenet_forward)
    ref_fn = jax.jit(lenet_reference)

    out = jax.block_until_ready(fwd(x, params))
    ref = jax.block_until_ready(ref_fn(x, params))

    assert out.shape == (2, 10), out.shape
    assert bool(jnp.all(jnp.isfinite(out)))
    assert bool(jnp.allclose(out, ref, rtol=2e-2, atol=2e-2)), \
        "Pallas LeNet output diverged from JAX reference"
    print("KERNEL_OK")
</pallas_src>

<mosaic_0001>
module attributes {stable_mosaic.version = 11 : i64} {
  func.func @_lenet_kernel(%arg0: memref<4x25x392xbf16, #tpu.memory_space<vmem>>, %arg1: memref<8x25xbf16, #tpu.memory_space<vmem>>, %arg2: memref<8x1xf32, #tpu.memory_space<vmem>>, %arg3: memref<16x200xbf16, #tpu.memory_space<vmem>>, %arg4: memref<16x1xf32, #tpu.memory_space<vmem>>, %arg5: memref<120x400xbf16, #tpu.memory_space<vmem>>, %arg6: memref<120x1xf32, #tpu.memory_space<vmem>>, %arg7: memref<84x120xbf16, #tpu.memory_space<vmem>>, %arg8: memref<84x1xf32, #tpu.memory_space<vmem>>, %arg9: memref<10x84xbf16, #tpu.memory_space<vmem>>, %arg10: memref<10x1xf32, #tpu.memory_space<vmem>>, %arg11: memref<10x2xf32, #tpu.memory_space<vmem>>, %arg12: memref<8x392xf32, #tpu.memory_space<vmem>>, %arg13: memref<200x332xf32, #tpu.memory_space<vmem>>, %arg14: memref<16x317xf32, #tpu.memory_space<vmem>>, %arg15: memref<400x2xf32, #tpu.memory_space<vmem>>) attributes {dimension_semantics = [], scalar_prefetch = 0 : i64, scratch_operands = 4 : i64, tpu.core_type = #tpu.core_type<tc>} {
    %c0 = arith.constant 0 : index
    %c0_0 = arith.constant 0 : index
    %0 = vector.load %arg1[%c0, %c0_0] : memref<8x25xbf16, #tpu.memory_space<vmem>>, vector<8x25xbf16>
    %c0_1 = arith.constant 0 : index
    %c0_2 = arith.constant 0 : index
    %1 = vector.load %arg2[%c0_1, %c0_2] : memref<8x1xf32, #tpu.memory_space<vmem>>, vector<8x1xf32>
    %2 = vector.shape_cast %1 : vector<8x1xf32> to vector<8x1xf32>
    %3 = vector.broadcast %2 : vector<8x1xf32> to vector<8x392xf32>
    %cst = arith.constant 0.000000e+00 : f32
    %4 = vector.broadcast %cst : f32 to vector<8x392xf32>
    %c0_3 = arith.constant 0 : index
    %c0_4 = arith.constant 0 : index
    %c0_5 = arith.constant 0 : index
    %5 = vector.load %arg0[%c0_3, %c0_4, %c0_5] : memref<4x25x392xbf16, #tpu.memory_space<vmem>>, vector<1x25x392xbf16>
    %6 = vector.shape_cast %5 : vector<1x25x392xbf16> to vector<25x392xbf16>
    %cst_6 = arith.constant dense<0.000000e+00> : vector<8x392xf32>
    %7 = tpu.matmul %0, %6, %cst_6 {dimension_numbers = #tpu.dot_dimension_numbers<[1], [0], [0], [1], [0, 0, 1, 1], [], []>} : vector<8x25xbf16>, vector<25x392xbf16>, vector<8x392xf32> -> vector<8x392xf32>
    %8 = arith.addf %7, %3 : vector<8x392xf32>
    %cst_7 = arith.constant 5.000000e-01 : f32
    %9 = vector.broadcast %cst_7 : f32 to vector<8x392xf32>
    %10 = arith.mulf %9, %8 : vector<8x392xf32>
    %11 = math.tanh %10 : vector<8x392xf32>
    %cst_8 = arith.constant 5.000000e-01 : f32
    %12 = vector.broadcast %cst_8 : f32 to vector<8x392xf32>
    %13 = arith.mulf %12, %11 : vector<8x392xf32>
    %cst_9 = arith.constant 5.000000e-01 : f32
    %14 = vector.broadcast %cst_9 : f32 to vector<8x392xf32>
    %15 = arith.addf %13, %14 : vector<8x392xf32>
    %16 = arith.addf %4, %15 : vector<8x392xf32>
    %c1 = arith.constant 1 : index
    %c0_10 = arith.constant 0 : index
    %c0_11 = arith.constant 0 : index
    %17 = vector.load %arg0[%c1, %c0_10, %c0_11] : memref<4x25x392xbf16, #tpu.memory_space<vmem>>, vector<1x25x392xbf16>
    %18 = vector.shape_cast %17 : vector<1x25x392xbf16> to vector<25x392xbf16>
    %cst_12 = arith.constant dense<0.000000e+00> : vector<8x392xf32>
    %19 = tpu.matmul %0, %18, %cst_12 {dimension_numbers = #tpu.dot_dimension_numbers<[1], [0], [0], [1], [0, 0, 1, 1], [], []>} : vector<8x25xbf16>, vector<25x392xbf16>, vector<8x392xf32> -> vector<8x392xf32>
    %20 = arith.addf %19, %3 : vector<8x392xf32>
    %cst_13 = arith.constant 5.000000e-01 : f32
    %21 = vector.broadcast %cst_13 : f32 to vector<8x392xf32>
    %22 = arith.mulf %21, %20 : vector<8x392xf32>
    %23 = math.tanh %22 : vector<8x392xf32>
    %cst_14 = arith.constant 5.000000e-01 : f32
    %24 = vector.broadcast %cst_14 : f32 to vector<8x392xf32>
    %25 = arith.mulf %24, %23 : vector<8x392xf32>
    %cst_15 = arith.constant 5.000000e-01 : f32
    %26 = vector.broadcast %cst_15 : f32 to vector<8x392xf32>
    %27 = arith.addf %25, %26 : vector<8x392xf32>
    %28 = arith.addf %16, %27 : vector<8x392xf32>
    %c2 = arith.constant 2 : index
    %c0_16 = arith.constant 0 : index
    %c0_17 = arith.constant 0 : index
    %29 = vector.load %arg0[%c2, %c0_16, %c0_17] : memref<4x25x392xbf16, #tpu.memory_space<vmem>>, vector<1x25x392xbf16>
    %30 = vector.shape_cast %29 : vector<1x25x392xbf16> to vector<25x392xbf16>
    %cst_18 = arith.constant dense<0.000000e+00> : vector<8x392xf32>
    %31 = tpu.matmul %0, %30, %cst_18 {dimension_numbers = #tpu.dot_dimension_numbers<[1], [0], [0], [1], [0, 0, 1, 1], [], []>} : vector<8x25xbf16>, vector<25x392xbf16>, vector<8x392xf32> -> vector<8x392xf32>
    %32 = arith.addf %31, %3 : vector<8x392xf32>
    %cst_19 = arith.constant 5.000000e-01 : f32
    %33 = vector.broadcast %cst_19 : f32 to vector<8x392xf32>
    %34 = arith.mulf %33, %32 : vector<8x392xf32>
    %35 = math.tanh %34 : vector<8x392xf32>
    %cst_20 = arith.constant 5.000000e-01 : f32
    %36 = vector.broadcast %cst_20 : f32 to vector<8x392xf32>
    %37 = arith.mulf %36, %35 : vector<8x392xf32>
    %cst_21 = arith.constant 5.000000e-01 : f32
    %38 = vector.broadcast %cst_21 : f32 to vector<8x392xf32>
    %39 = arith.addf %37, %38 : vector<8x392xf32>
    %40 = arith.addf %28, %39 : vector<8x392xf32>
    %c3 = arith.constant 3 : index
    %c0_22 = arith.constant 0 : index
    %c0_23 = arith.constant 0 : index
    %41 = vector.load %arg0[%c3, %c0_22, %c0_23] : memref<4x25x392xbf16, #tpu.memory_space<vmem>>, vector<1x25x392xbf16>
    %42 = vector.shape_cast %41 : vector<1x25x392xbf16> to vector<25x392xbf16>
    %cst_24 = arith.constant dense<0.000000e+00> : vector<8x392xf32>
    %43 = tpu.matmul %0, %42, %cst_24 {dimension_numbers = #tpu.dot_dimension_numbers<[1], [0], [0], [1], [0, 0, 1, 1], [], []>} : vector<8x25xbf16>, vector<25x392xbf16>, vector<8x392xf32> -> vector<8x392xf32>
    %44 = arith.addf %43, %3 : vector<8x392xf32>
    %cst_25 = arith.constant 5.000000e-01 : f32
    %45 = vector.broadcast %cst_25 : f32 to vector<8x392xf32>
    %46 = arith.mulf %45, %44 : vector<8x392xf32>
    %47 = math.tanh %46 : vector<8x392xf32>
    %cst_26 = arith.constant 5.000000e-01 : f32
    %48 = vector.broadcast %cst_26 : f32 to vector<8x392xf32>
    %49 = arith.mulf %48, %47 : vector<8x392xf32>
    %cst_27 = arith.constant 5.000000e-01 : f32
    %50 = vector.broadcast %cst_27 : f32 to vector<8x392xf32>
    %51 = arith.addf %49, %50 : vector<8x392xf32>
    %52 = arith.addf %40, %51 : vector<8x392xf32>
    %cst_28 = arith.constant 2.500000e-01 : f32
    %53 = vector.broadcast %cst_28 : f32 to vector<8x392xf32>
    %54 = arith.mulf %52, %53 : vector<8x392xf32>
    %c0_29 = arith.constant 0 : index
    %c0_30 = arith.constant 0 : index
    %55 = vector.load %arg12[%c0_29, %c0_30] : memref<8x392xf32, #tpu.memory_space<vmem>>, vector<8x392xf32>
    tpu.vector_store %arg12[%c0_29, %c0_30], %54 {strides = array<i32>} : memref<8x392xf32, #tpu.memory_space<vmem>>, vector<8x392xf32>,
    %c0_31 = arith.constant 0 : index
    %c0_32 = arith.constant 0 : index
    %56 = vector.load %arg12[%c0_31, %c0_32] : memref<8x392xf32, #tpu.memory_space<vmem>>, vector<8x332xf32>
    %c0_33 = arith.constant 0 : index
    %c0_34 = arith.constant 0 : index
    %57 = vector.load %arg13[%c0_33, %c0_34] : memref<200x332xf32, #tpu.memory_space<vmem>>, vector<8x332xf32>
    tpu.vector_store %arg13[%c0_33, %c0_34], %56 {strides = array<i32>} : memref<200x332xf32, #tpu.memory_space<vmem>>, vector<8x332xf32>,
    %c0_35 = arith.constant 0 : index
    %c1_36 = arith.constant 1 : index
    %58 = vector.load %arg12[%c0_35, %c1_36] : memref<8x392xf32, #tpu.memory_space<vmem>>, vector<8x332xf32>
    %c8 = arith.constant 8 : index
    %c0_37 = arith.constant 0 : index
    %59 = vector.load %arg13[%c8, %c0_37] : memref<200x332xf32, #tpu.memory_space<vmem>>, vector<8x332xf32>
    tpu.vector_store %arg13[%c8, %c0_37], %58 {strides = array<i32>} : memref<200x332xf32, #tpu.memory_space<vmem>>, vector<8x332xf32>,
    %c0_38 = arith.constant 0 : index
    %c2_39 = arith.constant 2 : index
    %60 = vector.load %arg12[%c0_38, %c2_39] : memref<8x392xf32, #tpu.memory_space<vmem>>, vector<8x332xf32>
    %c16 = arith.constant 16 : index
    %c0_40 = arith.constant 0 : index
    %61 = vector.load %arg13[%c16, %c0_40] : memref<200x332xf32, #tpu.memory_space<vmem>>, vector<8x332xf32>
    tpu.vector_store %arg13[%c16, %c0_40], %60 {strides = array<i32>} : memref<200x332xf32, #tpu.memory_space<vmem>>, vector<8x332xf32>,
    %c0_41 = arith.constant 0 : index
    %c3_42 = arith.constant 3 : index
    %62 = vector.load %arg12[%c0_41, %c3_42] : memref<8x392xf32, #tpu.memory_space<vmem>>, vector<8x332xf32>
    %c24 = arith.constant 24 : index
    %c0_43 = arith.constant 0 : index
    %63 = vector.load %arg13[%c24, %c0_43] : memref<200x332xf32, #tpu.memory_space<vmem>>, vector<8x332xf32>
    tpu.vector_store %arg13[%c24, %c0_43], %62 {strides = array<i32>} : memref<200x332xf32, #tpu.memory_space<vmem>>, vector<8x332xf32>,
    %c0_44 = arith.constant 0 : index
    %c4 = arith.constant 4 : index
    %64 = vector.load %arg12[%c0_44, %c4] : memref<8x392xf32, #tpu.memory_space<vmem>>, vector<8x332xf32>
    %c32 = arith.constant 32 : index
    %c0_45 = arith.constant 0 : index
    %65 = vector.load %arg13[%c32, %c0_45] : memref<200x332xf32, #tpu.memory_space<vmem>>, vector<8x332xf32>
    tpu.vector_store %arg13[%c32, %c0_45], %64 {strides = array<i32>} : memref<200x332xf32, #tpu.memory_space<vmem>>, vector<8x332xf32>,
    %c0_46 = arith.constant 0 : index
    %c14 = arith.constant 14 : index
    %66 = vector.load %arg12[%c0_46, %c14] : memref<8x392xf32, #tpu.memory_space<vmem>>, vector<8x332xf32>
    %c40 = arith.constant 40 : index
    %c0_47 = arith.constant 0 : index
    %67 = vector.load %arg13[%c40, %c0_47] : memref<200x332xf32, #tpu.memory_space<vmem>>, vector<8x332xf32>
    tpu.vector_store %arg13[%c40, %c0_47], %66 {strides = array<i32>} : memref<200x332xf32, #tpu.memory_space<vmem>>, vector<8x332xf32>,
    %c0_48 = arith.constant 0 : index
    %c15 = arith.constant 15 : index
    %68 = vector.load %arg12[%c0_48, %c15] : memref<8x392xf32, #tpu.memory_space<vmem>>, vector<8x332xf32>
    %c48 = arith.constant 48 : index
    %c0_49 = arith.constant 0 : index
    %69 = vector.load %arg13[%c48, %c0_49] : memref<200x332xf32, #tpu.memory_space<vmem>>, vector<8x332xf32>
    tpu.vector_store %arg13[%c48, %c0_49], %68 {strides = array<i32>} : memref<200x332xf32, #tpu.memory_space<vmem>>, vector<8x332xf32>,
    %c0_50 = arith.constant 0 : index
    %c16_51 = arith.constant 16 : index
    %70 = vector.load %arg12[%c0_50, %c16_51] : memref<8x392xf32, #tpu.memory_space<vmem>>, vector<8x332xf32>
    %c56 = arith.constant 56 : index
    %c0_52 = arith.constant 0 : index
    %71 = vector.load %arg13[%c56, %c0_52] : memref<200x332xf32, #tpu.memory_space<vmem>>, vector<8x332xf32>
    tpu.vector_store %arg13[%c56, %c0_52], %70 {strides = array<i32>} : memref<200x332xf32, #tpu.memory_space<vmem>>, vector<8x332xf32>,
    %c0_53 = arith.constant 0 : index
    %c17 = arith.constant 17 : index
    %72 = vector.load %arg12[%c0_53, %c17] : memref<8x392xf32, #tpu.memory_space<vmem>>, vector<8x332xf32>
    %c64 = arith.constant 64 : index
    %c0_54 = arith.constant 0 : index
    %73 = vector.load %arg13[%c64, %c0_54] : memref<200x332xf32, #tpu.memory_space<vmem>>, vector<8x332xf32>
    tpu.vector_store %arg13[%c64, %c0_54], %72 {strides = array<i32>} : memref<200x332xf32, #tpu.memory_space<vmem>>, vector<8x332xf32>,
    %c0_55 = arith.constant 0 : index
    %c18 = arith.constant 18 : index
    %74 = vector.load %arg12[%c0_55, %c18] : memref<8x392xf32, #tpu.memory_space<vmem>>, vector<8x332xf32>
    %c72 = arith.constant 72 : index
    %c0_56 = arith.constant 0 : index
    %75 = vector.load %arg13[%c72, %c0_56] : memref<200x332xf32, #tpu.memory_space<vmem>>, vector<8x332xf32>
    tpu.vector_store %arg13[%c72, %c0_56], %74 {strides = array<i32>} : memref<200x332xf32, #tpu.memory_space<vmem>>, vector<8x332xf32>,
    %c0_57 = arith.constant 0 : index
    %c28 = arith.constant 28 : index
    %76 = vector.load %arg12[%c0_57, %c28] : memref<8x392xf32, #tpu.memory_space<vmem>>, vector<8x332xf32>
    %c80 = arith.constant 80 : index
    %c0_58 = arith.constant 0 : index
    %77 = vector.load %arg13[%c80, %c0_58] : memref<200x332xf32, #tpu.memory_space<vmem>>, vector<8x332xf32>
    tpu.vector_store %arg13[%c80, %c0_58], %76 {strides = array<i32>} : memref<200x332xf32, #tpu.memory_space<vmem>>, vector<8x332xf32>,
    %c0_59 = arith.constant 0 : index
    %c29 = arith.constant 29 : index
    %78 = vector.load %arg12[%c0_59, %c29] : memref<8x392xf32, #tpu.memory_space<vmem>>, vector<8x332xf32>
    %c88 = arith.constant 88 : index
    %c0_60 = arith.constant 0 : index
    %79 = vector.load %arg13[%c88, %c0_60] : memref<200x332xf32, #tpu.memory_space<vmem>>, vector<8x332xf32>
    tpu.vector_store %arg13[%c88, %c0_60], %78 {strides = array<i32>} : memref<200x332xf32, #tpu.memory_space<vmem>>, vector<8x332xf32>,
    %c0_61 = arith.constant 0 : index
    %c30 = arith.constant 30 : index
    %80 = vector.load %arg12[%c0_61, %c30] : memref<8x392xf32, #tpu.memory_space<vmem>>, vector<8x332xf32>
    %c96 = arith.constant 96 : index
    %c0_62 = arith.constant 0 : index
    %81 = vector.load %arg13[%c96, %c0_62] : memref<200x332xf32, #tpu.memory_space<vmem>>, vector<8x332xf32>
    tpu.vector_store %arg13[%c96, %c0_62], %80 {strides = array<i32>} : memref<200x332xf32, #tpu.memory_space<vmem>>, vector<8x332xf32>,
    %c0_63 = arith.constant 0 : index
    %c31 = arith.constant 31 : index
    %82 = vector.load %arg12[%c0_63, %c31] : memref<8x392xf32, #tpu.memory_space<vmem>>, vector<8x332xf32>
    %c104 = arith.constant 104 : index
    %c0_64 = arith.constant 0 : index
    %83 = vector.load %arg13[%c104, %c0_64] : memref<200x332xf32, #tpu.memory_space<vmem>>, vector<8x332xf32>
    tpu.vector_store %arg13[%c104, %c0_64], %82 {strides = array<i32>} : memref<200x332xf32, #tpu.memory_space<vmem>>, vector<8x332xf32>,
    %c0_65 = arith.constant 0 : index
    %c32_66 = arith.constant 32 : index
    %84 = vector.load %arg12[%c0_65, %c32_66] : memref<8x392xf32, #tpu.memory_space<vmem>>, vector<8x332xf32>
    %c112 = arith.constant 112 : index
    %c0_67 = arith.constant 0 : index
    %85 = vector.load %arg13[%c112, %c0_67] : memref<200x332xf32, #tpu.memory_space<vmem>>, vector<8x332xf32>
    tpu.vector_store %arg13[%c112, %c0_67], %84 {strides = array<i32>} : memref<200x332xf32, #tpu.memory_space<vmem>>, vector<8x332xf32>,
    %c0_68 = arith.constant 0 : index
    %c42 = arith.constant 42 : index
    %86 = vector.load %arg12[%c0_68, %c42] : memref<8x392xf32, #tpu.memory_space<vmem>>, vector<8x332xf32>
    %c120 = arith.constant 120 : index
    %c0_69 = arith.constant 0 : index
    %87 = vector.load %arg13[%c120, %c0_69] : memref<200x332xf32, #tpu.memory_space<vmem>>, vector<8x332xf32>
    tpu.vector_store %arg13[%c120, %c0_69], %86 {strides = array<i32>} : memref<200x332xf32, #tpu.memory_space<vmem>>, vector<8x332xf32>,
    %c0_70 = arith.constant 0 : index
    %c43 = arith.constant 43 : index
    %88 = vector.load %arg12[%c0_70, %c43] : memref<8x392xf32, #tpu.memory_space<vmem>>, vector<8x332xf32>
    %c128 = arith.constant 128 : index
    %c0_71 = arith.constant 0 : index
    %89 = vector.load %arg13[%c128, %c0_71] : memref<200x332xf32, #tpu.memory_space<vmem>>, vector<8x332xf32>
    tpu.vector_store %arg13[%c128, %c0_71], %88 {strides = array<i32>} : memref<200x332xf32, #tpu.memory_space<vmem>>, vector<8x332xf32>,
    %c0_72 = arith.constant 0 : index
    %c44 = arith.constant 44 : index
    %90 = vector.load %arg12[%c0_72, %c44] : memref<8x392xf32, #tpu.memory_space<vmem>>, vector<8x332xf32>
    %c136 = arith.constant 136 : index
    %c0_73 = arith.constant 0 : index
    %91 = vector.load %arg13[%c136, %c0_73] : memref<200x332xf32, #tpu.memory_space<vmem>>, vector<8x332xf32>
    tpu.vector_store %arg13[%c136, %c0_73], %90 {strides = array<i32>} : memref<200x332xf32, #tpu.memory_space<vmem>>, vector<8x332xf32>,
    %c0_74 = arith.constant 0 : index
    %c45 = arith.constant 45 : index
    %92 = vector.load %arg12[%c0_74, %c45] : memref<8x392xf32, #tpu.memory_space<vmem>>, vector<8x332xf32>
    %c144 = arith.constant 144 : index
    %c0_75 = arith.constant 0 : index
    %93 = vector.load %arg13[%c144, %c0_75] : memref<200x332xf32, #tpu.memory_space<vmem>>, vector<8x332xf32>
    tpu.vector_store %arg13[%c144, %c0_75], %92 {strides = array<i32>} : memref<200x332xf32, #tpu.memory_space<vmem>>, vector<8x332xf32>,
    %c0_76 = arith.constant 0 : index
    %c46 = arith.constant 46 : index
    %94 = vector.load %arg12[%c0_76, %c46] : memref<8x392xf32, #tpu.memory_space<vmem>>, vector<8x332xf32>
    %c152 = arith.constant 152 : index
    %c0_77 = arith.constant 0 : index
    %95 = vector.load %arg13[%c152, %c0_77] : memref<200x332xf32, #tpu.memory_space<vmem>>, vector<8x332xf32>
    tpu.vector_store %arg13[%c152, %c0_77], %94 {strides = array<i32>} : memref<200x332xf32, #tpu.memory_space<vmem>>, vector<8x332xf32>,
    %c0_78 = arith.constant 0 : index
    %c56_79 = arith.constant 56 : index
    %96 = vector.load %arg12[%c0_78, %c56_79] : memref<8x392xf32, #tpu.memory_space<vmem>>, vector<8x332xf32>
    %c160 = arith.constant 160 : index
    %c0_80 = arith.constant 0 : index
    %97 = vector.load %arg13[%c160, %c0_80] : memref<200x332xf32, #tpu.memory_space<vmem>>, vector<8x332xf32>
    tpu.vector_store %arg13[%c160, %c0_80], %96 {strides = array<i32>} : memref<200x332xf32, #tpu.memory_space<vmem>>, vector<8x332xf32>,
    %c0_81 = arith.constant 0 : index
    %c57 = arith.constant 57 : index
    %98 = vector.load %arg12[%c0_81, %c57] : memref<8x392xf32, #tpu.memory_space<vmem>>, vector<8x332xf32>
    %c168 = arith.constant 168 : index
    %c0_82 = arith.constant 0 : index
    %99 = vector.load %arg13[%c168, %c0_82] : memref<200x332xf32, #tpu.memory_space<vmem>>, vector<8x332xf32>
    tpu.vector_store %arg13[%c168, %c0_82], %98 {strides = array<i32>} : memref<200x332xf32, #tpu.memory_space<vmem>>, vector<8x332xf32>,
    %c0_83 = arith.constant 0 : index
    %c58 = arith.constant 58 : index
    %100 = vector.load %arg12[%c0_83, %c58] : memref<8x392xf32, #tpu.memory_space<vmem>>, vector<8x332xf32>
    %c176 = arith.constant 176 : index
    %c0_84 = arith.constant 0 : index
    %101 = vector.load %arg13[%c176, %c0_84] : memref<200x332xf32, #tpu.memory_space<vmem>>, vector<8x332xf32>
    tpu.vector_store %arg13[%c176, %c0_84], %100 {strides = array<i32>} : memref<200x332xf32, #tpu.memory_space<vmem>>, vector<8x332xf32>,
    %c0_85 = arith.constant 0 : index
    %c59 = arith.constant 59 : index
    %102 = vector.load %arg12[%c0_85, %c59] : memref<8x392xf32, #tpu.memory_space<vmem>>, vector<8x332xf32>
    %c184 = arith.constant 184 : index
    %c0_86 = arith.constant 0 : index
    %103 = vector.load %arg13[%c184, %c0_86] : memref<200x332xf32, #tpu.memory_space<vmem>>, vector<8x332xf32>
    tpu.vector_store %arg13[%c184, %c0_86], %102 {strides = array<i32>} : memref<200x332xf32, #tpu.memory_space<vmem>>, vector<8x332xf32>,
    %c0_87 = arith.constant 0 : index
    %c60 = arith.constant 60 : index
    %104 = vector.load %arg12[%c0_87, %c60] : memref<8x392xf32, #tpu.memory_space<vmem>>, vector<8x332xf32>
    %c192 = arith.constant 192 : index
    %c0_88 = arith.constant 0 : index
    %105 = vector.load %arg13[%c192, %c0_88] : memref<200x332xf32, #tpu.memory_space<vmem>>, vector<8x332xf32>
    tpu.vector_store %arg13[%c192, %c0_88], %104 {strides = array<i32>} : memref<200x332xf32, #tpu.memory_space<vmem>>, vector<8x332xf32>,
    %c0_89 = arith.constant 0 : index
    %c0_90 = arith.constant 0 : index
    %106 = vector.load %arg3[%c0_89, %c0_90] : memref<16x200xbf16, #tpu.memory_space<vmem>>, vector<16x200xbf16>
    %c0_91 = arith.constant 0 : index
    %c0_92 = arith.constant 0 : index
    %107 = vector.load %arg13[%c0_91, %c0_92] : memref<200x332xf32, #tpu.memory_space<vmem>>, vector<200x332xf32>
    %108 = arith.truncf %107 : vector<200x332xf32> to vector<200x332xbf16>
    %cst_93 = arith.constant dense<0.000000e+00> : vector<16x332xf32>
    %109 = tpu.matmul %106, %108, %cst_93 {dimension_numbers = #tpu.dot_dimension_numbers<[1], [0], [0], [1], [0, 0, 1, 1], [], []>} : vector<16x200xbf16>, vector<200x332xbf16>, vector<16x332xf32> -> vector<16x332xf32>
    %c0_94 = arith.constant 0 : index
    %c0_95 = arith.constant 0 : index
    %110 = vector.load %arg4[%c0_94, %c0_95] : memref<16x1xf32, #tpu.memory_space<vmem>>, vector<16x1xf32>
    %111 = vector.broadcast %110 : vector<16x1xf32> to vector<16x332xf32>
    %112 = arith.addf %109, %111 : vector<16x332xf32>
    %cst_96 = arith.constant 5.000000e-01 : f32
    %113 = vector.broadcast %cst_96 : f32 to vector<16x332xf32>
    %114 = arith.mulf %113, %112 : vector<16x332xf32>
    %115 = math.tanh %114 : vector<16x332xf32>
    %cst_97 = arith.constant 5.000000e-01 : f32
    %116 = vector.broadcast %cst_97 : f32 to vector<16x332xf32>
    %117 = arith.mulf %116, %115 : vector<16x332xf32>
    %cst_98 = arith.constant 5.000000e-01 : f32
    %118 = vector.broadcast %cst_98 : f32 to vector<16x332xf32>
    %119 = arith.addf %117, %118 : vector<16x332xf32>
    %120 = vector.extract_strided_slice %119 {offsets = [0, 0], sizes = [16, 317], strides = [1, 1]} : vector<16x332xf32> to vector<16x317xf32>
    %121 = vector.extract_strided_slice %119 {offsets = [0, 1], sizes = [16, 317], strides = [1, 1]} : vector<16x332xf32> to vector<16x317xf32>
    %122 = arith.addf %120, %121 : vector<16x317xf32>
    %123 = vector.extract_strided_slice %119 {offsets = [0, 14], sizes = [16, 317], strides = [1, 1]} : vector<16x332xf32> to vector<16x317xf32>
    %124 = arith.addf %122, %123 : vector<16x317xf32>
    %125 = vector.extract_strided_slice %119 {offsets = [0, 15], sizes = [16, 317], strides = [1, 1]} : vector<16x332xf32> to vector<16x317xf32>
    %126 = arith.addf %124, %125 : vector<16x317xf32>
    %cst_99 = arith.constant 2.500000e-01 : f32
    %127 = vector.broadcast %cst_99 : f32 to vector<16x317xf32>
    %128 = arith.mulf %127, %126 : vector<16x317xf32>
    %c0_100 = arith.constant 0 : index
    %c0_101 = arith.constant 0 : index
    %129 = vector.load %arg14[%c0_100, %c0_101] : memref<16x317xf32, #tpu.memory_space<vmem>>, vector<16x317xf32>
    tpu.vector_store %arg14[%c0_100, %c0_101], %128 {strides = array<i32>} : memref<16x317xf32, #tpu.memory_space<vmem>>, vector<16x317xf32>,
    %c0_102 = arith.constant 0 : index
    %c0_103 = arith.constant 0 : index
    %130 = vector.load %arg14[%c0_102, %c0_103] : memref<16x317xf32, #tpu.memory_space<vmem>>, vector<16x1xf32>
    %c0_104 = arith.constant 0 : index
    %c0_105 = arith.constant 0 : index
    %131 = vector.load %arg15[%c0_104, %c0_105] : memref<400x2xf32, #tpu.memory_space<vmem>>, vector<16x1xf32>
    tpu.vector_store %arg15[%c0_104, %c0_105], %130 {strides = array<i32>} : memref<400x2xf32, #tpu.memory_space<vmem>>, vector<16x1xf32>,
    %c0_106 = arith.constant 0 : index
    %c196 = arith.constant 196 : index
    %132 = vector.load %arg14[%c0_106, %c196] : memref<16x317xf32, #tpu.memory_space<vmem>>, vector<16x1xf32>
    %c0_107 = arith.constant 0 : index
    %c1_108 = arith.constant 1 : index
    %133 = vector.load %arg15[%c0_107, %c1_108] : memref<400x2xf32, #tpu.memory_space<vmem>>, vector<16x1xf32>
    tpu.vector_store %arg15[%c0_107, %c1_108], %132 {strides = array<i32>} : memref<400x2xf32, #tpu.memory_space<vmem>>, vector<16x1xf32>,
    %c0_109 = arith.constant 0 : index
    %c2_110 = arith.constant 2 : index
    %134 = vector.load %arg14[%c0_109, %c2_110] : memref<16x317xf32, #tpu.memory_space<vmem>>, vector<16x1xf32>
    %c16_111 = arith.constant 16 : index
    %c0_112 = arith.constant 0 : index
    %135 = vector.load %arg15[%c16_111, %c0_112] : memref<400x2xf32, #tpu.memory_space<vmem>>, vector<16x1xf32>
    tpu.vector_store %arg15[%c16_111, %c0_112], %134 {strides = array<i32>} : memref<400x2xf32, #tpu.memory_space<vmem>>, vector<16x1xf32>,
    %c0_113 = arith.constant 0 : index
    %c198 = arith.constant 198 : index
    %136 = vector.load %arg14[%c0_113, %c198] : memref<16x317xf32, #tpu.memory_space<vmem>>, vector<16x1xf32>
    %c16_114 = arith.constant 16 : index
    %c1_115 = arith.constant 1 : index
    %137 = vector.load %arg15[%c16_114, %c1_115] : memref<400x2xf32, #tpu.memory_space<vmem>>, vector<16x1xf32>
    tpu.vector_store %arg15[%c16_114, %c1_115], %136 {strides = array<i32>} : memref<400x2xf32, #tpu.memory_space<vmem>>, vector<16x1xf32>,
    %c0_116 = arith.constant 0 : index
    %c4_117 = arith.constant 4 : index
    %138 = vector.load %arg14[%c0_116, %c4_117] : memref<16x317xf32, #tpu.memory_space<vmem>>, vector<16x1xf32>
    %c32_118 = arith.constant 32 : index
    %c0_119 = arith.constant 0 : index
    %139 = vector.load %arg15[%c32_118, %c0_119] : memref<400x2xf32, #tpu.memory_space<vmem>>, vector<16x1xf32>
    tpu.vector_store %arg15[%c32_118, %c0_119], %138 {strides = array<i32>} : memref<400x2xf32, #tpu.memory_space<vmem>>, vector<16x1xf32>,
    %c0_120 = arith.constant 0 : index
    %c200 = arith.constant 200 : index
    %140 = vector.load %arg14[%c0_120, %c200] : memref<16x317xf32, #tpu.memory_space<vmem>>, vector<16x1xf32>
    %c32_121 = arith.constant 32 : index
    %c1_122 = arith.constant 1 : index
    %141 = vector.load %arg15[%c32_121, %c1_122] : memref<400x2xf32, #tpu.memory_space<vmem>>, vector<16x1xf32>
    tpu.vector_store %arg15[%c32_121, %c1_122], %140 {strides = array<i32>} : memref<400x2xf32, #tpu.memory_space<vmem>>, vector<16x1xf32>,
    %c0_123 = arith.constant 0 : index
    %c6 = arith.constant 6 : index
    %142 = vector.load %arg14[%c0_123, %c6] : memref<16x317xf32, #tpu.memory_space<vmem>>, vector<16x1xf32>
    %c48_124 = arith.constant 48 : index
    %c0_125 = arith.constant 0 : index
    %143 = vector.load %arg15[%c48_124, %c0_125] : memref<400x2xf32, #tpu.memory_space<vmem>>, vector<16x1xf32>
    tpu.vector_store %arg15[%c48_124, %c0_125], %142 {strides = array<i32>} : memref<400x2xf32, #tpu.memory_space<vmem>>, vector<16x1xf32>,
    %c0_126 = arith.constant 0 : index
    %c202 = arith.constant 202 : index
    %144 = vector.load %arg14[%c0_126, %c202] : memref<16x317xf32, #tpu.memory_space<vmem>>, vector<16x1xf32>
    %c48_127 = arith.constant 48 : index
    %c1_128 = arith.constant 1 : index
    %145 = vector.load %arg15[%c48_127, %c1_128] : memref<400x2xf32, #tpu.memory_space<vmem>>, vector<16x1xf32>
    tpu.vector_store %arg15[%c48_127, %c1_128], %144 {strides = array<i32>} : memref<400x2xf32, #tpu.memory_space<vmem>>, vector<16x1xf32>,
    %c0_129 = arith.constant 0 : index
    %c8_130 = arith.constant 8 : index
    %146 = vector.load %arg14[%c0_129, %c8_130] : memref<16x317xf32, #tpu.memory_space<vmem>>, vector<16x1xf32>
    %c64_131 = arith.constant 64 : index
    %c0_132 = arith.constant 0 : index
    %147 = vector.load %arg15[%c64_131, %c0_132] : memref<400x2xf32, #tpu.memory_space<vmem>>, vector<16x1xf32>
    tpu.vector_store %arg15[%c64_131, %c0_132], %146 {strides = array<i32>} : memref<400x2xf32, #tpu.memory_space<vmem>>, vector<16x1xf32>,
    %c0_133 = arith.constant 0 : index
    %c204 = arith.constant 204 : index
    %148 = vector.load %arg14[%c0_133, %c204] : memref<16x317xf32, #tpu.memory_space<vmem>>, vector<16x1xf32>
    %c64_134 = arith.constant 64 : index
    %c1_135 = arith.constant 1 : index
    %149 = vector.load %arg15[%c64_134, %c1_135] : memref<400x2xf32, #tpu.memory_space<vmem>>, vector<16x1xf32>
    tpu.vector_store %arg15[%c64_134, %c1_135], %148 {strides = array<i32>} : memref<400x2xf32, #tpu.memory_space<vmem>>, vector<16x1xf32>,
    %c0_136 = arith.constant 0 : index
    %c28_137 = arith.constant 28 : index
    %150 = vector.load %arg14[%c0_136, %c28_137] : memref<16x317xf32, #tpu.memory_space<vmem>>, vector<16x1xf32>
    %c80_138 = arith.constant 80 : index
    %c0_139 = arith.constant 0 : index
    %151 = vector.load %arg15[%c80_138, %c0_139] : memref<400x2xf32, #tpu.memory_space<vmem>>, vector<16x1xf32>
    tpu.vector_store %arg15[%c80_138, %c0_139], %150 {strides = array<i32>} : memref<400x2xf32, #tpu.memory_space<vmem>>, vector<16x1xf32>,
    %c0_140 = arith.constant 0 : index
    %c224 = arith.constant 224 : index
    %152 = vector.load %arg14[%c0_140, %c224] : memref<16x317xf32, #tpu.memory_space<vmem>>, vector<16x1xf32>
    %c80_141 = arith.constant 80 : index
    %c1_142 = arith.constant 1 : index
    %153 = vector.load %arg15[%c80_141, %c1_142] : memref<400x2xf32, #tpu.memory_space<vmem>>, vector<16x1xf32>
    tpu.vector_store %arg15[%c80_141, %c1_142], %152 {strides = array<i32>} : memref<400x2xf32, #tpu.memory_space<vmem>>, vector<16x1xf32>,
    %c0_143 = arith.constant 0 : index
    %c30_144 = arith.constant 30 : index
    %154 = vector.load %arg14[%c0_143, %c30_144] : memref<16x317xf32, #tpu.memory_space<vmem>>, vector<16x1xf32>
    %c96_145 = arith.constant 96 : index
    %c0_146 = arith.constant 0 : index
    %155 = vector.load %arg15[%c96_145, %c0_146] : memref<400x2xf32, #tpu.memory_space<vmem>>, vector<16x1xf32>
    tpu.vector_store %arg15[%c96_145, %c0_146], %154 {strides = array<i32>} : memref<400x2xf32, #tpu.memory_space<vmem>>, vector<16x1xf32>,
    %c0_147 = arith.constant 0 : index
    %c226 = arith.constant 226 : index
    %156 = vector.load %arg14[%c0_147, %c226] : memref<16x317xf32, #tpu.memory_space<vmem>>, vector<16x1xf32>
    %c96_148 = arith.constant 96 : index
    %c1_149 = arith.constant 1 : index
    %157 = vector.load %arg15[%c96_148, %c1_149] : memref<400x2xf32, #tpu.memory_space<vmem>>, vector<16x1xf32>
    tpu.vector_store %arg15[%c96_148, %c1_149], %156 {strides = array<i32>} : memref<400x2xf32, #tpu.memory_space<vmem>>, vector<16x1xf32>,
    %c0_150 = arith.constant 0 : index
    %c32_151 = arith.constant 32 : index
    %158 = vector.load %arg14[%c0_150, %c32_151] : memref<16x317xf32, #tpu.memory_space<vmem>>, vector<16x1xf32>
    %c112_152 = arith.constant 112 : index
    %c0_153 = arith.constant 0 : index
    %159 = vector.load %arg15[%c112_152, %c0_153] : memref<400x2xf32, #tpu.memory_space<vmem>>, vector<16x1xf32>
    tpu.vector_store %arg15[%c112_152, %c0_153], %158 {strides = array<i32>} : memref<400x2xf32, #tpu.memory_space<vmem>>, vector<16x1xf32>,
    %c0_154 = arith.constant 0 : index
    %c228 = arith.constant 228 : index
    %160 = vector.load %arg14[%c0_154, %c228] : memref<16x317xf32, #tpu.memory_space<vmem>>, vector<16x1xf32>
    %c112_155 = arith.constant 112 : index
    %c1_156 = arith.constant 1 : index
    %161 = vector.load %arg15[%c112_155, %c1_156] : memref<400x2xf32, #tpu.memory_space<vmem>>, vector<16x1xf32>
    tpu.vector_store %arg15[%c112_155, %c1_156], %160 {strides = array<i32>} : memref<400x2xf32, #tpu.memory_space<vmem>>, vector<16x1xf32>,
    %c0_157 = arith.constant 0 : index
    %c34 = arith.constant 34 : index
    %162 = vector.load %arg14[%c0_157, %c34] : memref<16x317xf32, #tpu.memory_space<vmem>>, vector<16x1xf32>
    %c128_158 = arith.constant 128 : index
    %c0_159 = arith.constant 0 : index
    %163 = vector.load %arg15[%c128_158, %c0_159] : memref<400x2xf32, #tpu.memory_space<vmem>>, vector<16x1xf32>
    tpu.vector_store %arg15[%c128_158, %c0_159], %162 {strides = array<i32>} : memref<400x2xf32, #tpu.memory_space<vmem>>, vector<16x1xf32>,
    %c0_160 = arith.constant 0 : index
    %c230 = arith.constant 230 : index
    %164 = vector.load %arg14[%c0_160, %c230] : memref<16x317xf32, #tpu.memory_space<vmem>>, vector<16x1xf32>
    %c128_161 = arith.constant 128 : index
    %c1_162 = arith.constant 1 : index
    %165 = vector.load %arg15[%c128_161, %c1_162] : memref<400x2xf32, #tpu.memory_space<vmem>>, vector<16x1xf32>
    tpu.vector_store %arg15[%c128_161, %c1_162], %164 {strides = array<i32>} : memref<400x2xf32, #tpu.memory_space<vmem>>, vector<16x1xf32>,
    %c0_163 = arith.constant 0 : index
    %c36 = arith.constant 36 : index
    %166 = vector.load %arg14[%c0_163, %c36] : memref<16x317xf32, #tpu.memory_space<vmem>>, vector<16x1xf32>
    %c144_164 = arith.constant 144 : index
    %c0_165 = arith.constant 0 : index
    %167 = vector.load %arg15[%c144_164, %c0_165] : memref<400x2xf32, #tpu.memory_space<vmem>>, vector<16x1xf32>
    tpu.vector_store %arg15[%c144_164, %c0_165], %166 {strides = array<i32>} : memref<400x2xf32, #tpu.memory_space<vmem>>, vector<16x1xf32>,
    %c0_166 = arith.constant 0 : index
    %c232 = arith.constant 232 : index
    %168 = vector.load %arg14[%c0_166, %c232] : memref<16x317xf32, #tpu.memory_space<vmem>>, vector<16x1xf32>
    %c144_167 = arith.constant 144 : index
    %c1_168 = arith.constant 1 : index
    %169 = vector.load %arg15[%c144_167, %c1_168] : memref<400x2xf32, #tpu.memory_space<vmem>>, vector<16x1xf32>
    tpu.vector_store %arg15[%c144_167, %c1_168], %168 {strides = array<i32>} : memref<400x2xf32, #tpu.memory_space<vmem>>, vector<16x1xf32>,
    %c0_169 = arith.constant 0 : index
    %c56_170 = arith.constant 56 : index
    %170 = vector.load %arg14[%c0_169, %c56_170] : memref<16x317xf32, #tpu.memory_space<vmem>>, vector<16x1xf32>
    %c160_171 = arith.constant 160 : index
    %c0_172 = arith.constant 0 : index
    %171 = vector.load %arg15[%c160_171, %c0_172] : memref<400x2xf32, #tpu.memory_space<vmem>>, vector<16x1xf32>
    tpu.vector_store %arg15[%c160_171, %c0_172], %170 {strides = array<i32>} : memref<400x2xf32, #tpu.memory_space<vmem>>, vector<16x1xf32>,
    %c0_173 = arith.constant 0 : index
    %c252 = arith.constant 252 : index
    %172 = vector.load %arg14[%c0_173, %c252] : memref<16x317xf32, #tpu.memory_space<vmem>>, vector<16x1xf32>
    %c160_174 = arith.constant 160 : index
    %c1_175 = arith.constant 1 : index
    %173 = vector.load %arg15[%c160_174, %c1_175] : memref<400x2xf32, #tpu.memory_space<vmem>>, vector<16x1xf32>
    tpu.vector_store %arg15[%c160_174, %c1_175], %172 {strides = array<i32>} : memref<400x2xf32, #tpu.memory_space<vmem>>, vector<16x1xf32>,
    %c0_176 = arith.constant 0 : index
    %c58_177 = arith.constant 58 : index
    %174 = vector.load %arg14[%c0_176, %c58_177] : memref<16x317xf32, #tpu.memory_space<vmem>>, vector<16x1xf32>
    %c176_178 = arith.constant 176 : index
    %c0_179 = arith.constant 0 : index
    %175 = vector.load %arg15[%c176_178, %c0_179] : memref<400x2xf32, #tpu.memory_space<vmem>>, vector<16x1xf32>
    tpu.vector_store %arg15[%c176_178, %c0_179], %174 {strides = array<i32>} : memref<400x2xf32, #tpu.memory_space<vmem>>, vector<16x1xf32>,
    %c0_180 = arith.constant 0 : index
    %c254 = arith.constant 254 : index
    %176 = vector.load %arg14[%c0_180, %c254] : memref<16x317xf32, #tpu.memory_space<vmem>>, vector<16x1xf32>
    %c176_181 = arith.constant 176 : index
    %c1_182 = arith.constant 1 : index
    %177 = vector.load %arg15[%c176_181, %c1_182] : memref<400x2xf32, #tpu.memory_space<vmem>>, vector<16x1xf32>
    tpu.vector_store %arg15[%c176_181, %c1_182], %176 {strides = array<i32>} : memref<400x2xf32, #tpu.memory_space<vmem>>, vector<16x1xf32>,
    %c0_183 = arith.constant 0 : index
    %c60_184 = arith.constant 60 : index
    %178 = vector.load %arg14[%c0_183, %c60_184] : memref<16x317xf32, #tpu.memory_space<vmem>>, vector<16x1xf32>
    %c192_185 = arith.constant 192 : index
    %c0_186 = arith.constant 0 : index
    %179 = vector.load %arg15[%c192_185, %c0_186] : memref<400x2xf32, #tpu.memory_space<vmem>>, vector<16x1xf32>
    tpu.vector_store %arg15[%c192_185, %c0_186], %178 {strides = array<i32>} : memref<400x2xf32, #tpu.memory_space<vmem>>, vector<16x1xf32>,
    %c0_187 = arith.constant 0 : index
    %c256 = arith.constant 256 : index
    %180 = vector.load %arg14[%c0_187, %c256] : memref<16x317xf32, #tpu.memory_space<vmem>>, vector<16x1xf32>
    %c192_188 = arith.constant 192 : index
    %c1_189 = arith.constant 1 : index
    %181 = vector.load %arg15[%c192_188, %c1_189] : memref<400x2xf32, #tpu.memory_space<vmem>>, vector<16x1xf32>
    tpu.vector_store %arg15[%c192_188, %c1_189], %180 {strides = array<i32>} : memref<400x2xf32, #tpu.memory_space<vmem>>, vector<16x1xf32>,
    %c0_190 = arith.constant 0 : index
    %c62 = arith.constant 62 : index
    %182 = vector.load %arg14[%c0_190, %c62] : memref<16x317xf32, #tpu.memory_space<vmem>>, vector<16x1xf32>
    %c208 = arith.constant 208 : index
    %c0_191 = arith.constant 0 : index
    %183 = vector.load %arg15[%c208, %c0_191] : memref<400x2xf32, #tpu.memory_space<vmem>>, vector<16x1xf32>
    tpu.vector_store %arg15[%c208, %c0_191], %182 {strides = array<i32>} : memref<400x2xf32, #tpu.memory_space<vmem>>, vector<16x1xf32>,
    %c0_192 = arith.constant 0 : index
    %c258 = arith.constant 258 : index
    %184 = vector.load %arg14[%c0_192, %c258] : memref<16x317xf32, #tpu.memory_space<vmem>>, vector<16x1xf32>
    %c208_193 = arith.constant 208 : index
    %c1_194 = arith.constant 1 : index
    %185 = vector.load %arg15[%c208_193, %c1_194] : memref<400x2xf32, #tpu.memory_space<vmem>>, vector<16x1xf32>
    tpu.vector_store %arg15[%c208_193, %c1_194], %184 {strides = array<i32>} : memref<400x2xf32, #tpu.memory_space<vmem>>, vector<16x1xf32>,
    %c0_195 = arith.constant 0 : index
    %c64_196 = arith.constant 64 : index
    %186 = vector.load %arg14[%c0_195, %c64_196] : memref<16x317xf32, #tpu.memory_space<vmem>>, vector<16x1xf32>
    %c224_197 = arith.constant 224 : index
    %c0_198 = arith.constant 0 : index
    %187 = vector.load %arg15[%c224_197, %c0_198] : memref<400x2xf32, #tpu.memory_space<vmem>>, vector<16x1xf32>
    tpu.vector_store %arg15[%c224_197, %c0_198], %186 {strides = array<i32>} : memref<400x2xf32, #tpu.memory_space<vmem>>, vector<16x1xf32>,
    %c0_199 = arith.constant 0 : index
    %c260 = arith.constant 260 : index
    %188 = vector.load %arg14[%c0_199, %c260] : memref<16x317xf32, #tpu.memory_space<vmem>>, vector<16x1xf32>
    %c224_200 = arith.constant 224 : index
    %c1_201 = arith.constant 1 : index
    %189 = vector.load %arg15[%c224_200, %c1_201] : memref<400x2xf32, #tpu.memory_space<vmem>>, vector<16x1xf32>
    tpu.vector_store %arg15[%c224_200, %c1_201], %188 {strides = array<i32>} : memref<400x2xf32, #tpu.memory_space<vmem>>, vector<16x1xf32>,
    %c0_202 = arith.constant 0 : index
    %c84 = arith.constant 84 : index
    %190 = vector.load %arg14[%c0_202, %c84] : memref<16x317xf32, #tpu.memory_space<vmem>>, vector<16x1xf32>
    %c240 = arith.constant 240 : index
    %c0_203 = arith.constant 0 : index
    %191 = vector.load %arg15[%c240, %c0_203] : memref<400x2xf32, #tpu.memory_space<vmem>>, vector<16x1xf32>
    tpu.vector_store %arg15[%c240, %c0_203], %190 {strides = array<i32>} : memref<400x2xf32, #tpu.memory_space<vmem>>, vector<16x1xf32>,
    %c0_204 = arith.constant 0 : index
    %c280 = arith.constant 280 : index
    %192 = vector.load %arg14[%c0_204, %c280] : memref<16x317xf32, #tpu.memory_space<vmem>>, vector<16x1xf32>
    %c240_205 = arith.constant 240 : index
    %c1_206 = arith.constant 1 : index
    %193 = vector.load %arg15[%c240_205, %c1_206] : memref<400x2xf32, #tpu.memory_space<vmem>>, vector<16x1xf32>
    tpu.vector_store %arg15[%c240_205, %c1_206], %192 {strides = array<i32>} : memref<400x2xf32, #tpu.memory_space<vmem>>, vector<16x1xf32>,
    %c0_207 = arith.constant 0 : index
    %c86 = arith.constant 86 : index
    %194 = vector.load %arg14[%c0_207, %c86] : memref<16x317xf32, #tpu.memory_space<vmem>>, vector<16x1xf32>
    %c256_208 = arith.constant 256 : index
    %c0_209 = arith.constant 0 : index
    %195 = vector.load %arg15[%c256_208, %c0_209] : memref<400x2xf32, #tpu.memory_space<vmem>>, vector<16x1xf32>
    tpu.vector_store %arg15[%c256_208, %c0_209], %194 {strides = array<i32>} : memref<400x2xf32, #tpu.memory_space<vmem>>, vector<16x1xf32>,
    %c0_210 = arith.constant 0 : index
    %c282 = arith.constant 282 : index
    %196 = vector.load %arg14[%c0_210, %c282] : memref<16x317xf32, #tpu.memory_space<vmem>>, vector<16x1xf32>
    %c256_211 = arith.constant 256 : index
    %c1_212 = arith.constant 1 : index
    %197 = vector.load %arg15[%c256_211, %c1_212] : memref<400x2xf32, #tpu.memory_space<vmem>>, vector<16x1xf32>
    tpu.vector_store %arg15[%c256_211, %c1_212], %196 {strides = array<i32>} : memref<400x2xf32, #tpu.memory_space<vmem>>, vector<16x1xf32>,
    %c0_213 = arith.constant 0 : index
    %c88_214 = arith.constant 88 : index
    %198 = vector.load %arg14[%c0_213, %c88_214] : memref<16x317xf32, #tpu.memory_space<vmem>>, vector<16x1xf32>
    %c272 = arith.constant 272 : index
    %c0_215 = arith.constant 0 : index
    %199 = vector.load %arg15[%c272, %c0_215] : memref<400x2xf32, #tpu.memory_space<vmem>>, vector<16x1xf32>
    tpu.vector_store %arg15[%c272, %c0_215], %198 {strides = array<i32>} : memref<400x2xf32, #tpu.memory_space<vmem>>, vector<16x1xf32>,
    %c0_216 = arith.constant 0 : index
    %c284 = arith.constant 284 : index
    %200 = vector.load %arg14[%c0_216, %c284] : memref<16x317xf32, #tpu.memory_space<vmem>>, vector<16x1xf32>
    %c272_217 = arith.constant 272 : index
    %c1_218 = arith.constant 1 : index
    %201 = vector.load %arg15[%c272_217, %c1_218] : memref<400x2xf32, #tpu.memory_space<vmem>>, vector<16x1xf32>
    tpu.vector_store %arg15[%c272_217, %c1_218], %200 {strides = array<i32>} : memref<400x2xf32, #tpu.memory_space<vmem>>, vector<16x1xf32>,
    %c0_219 = arith.constant 0 : index
    %c90 = arith.constant 90 : index
    %202 = vector.load %arg14[%c0_219, %c90] : memref<16x317xf32, #tpu.memory_space<vmem>>, vector<16x1xf32>
    %c288 = arith.constant 288 : index
    %c0_220 = arith.constant 0 : index
    %203 = vector.load %arg15[%c288, %c0_220] : memref<400x2xf32, #tpu.memory_space<vmem>>, vector<16x1xf32>
    tpu.vector_store %arg15[%c288, %c0_220], %202 {strides = array<i32>} : memref<400x2xf32, #tpu.memory_space<vmem>>, vector<16x1xf32>,
    %c0_221 = arith.constant 0 : index
    %c286 = arith.constant 286 : index
    %204 = vector.load %arg14[%c0_221, %c286] : memref<16x317xf32, #tpu.memory_space<vmem>>, vector<16x1xf32>
    %c288_222 = arith.constant 288 : index
    %c1_223 = arith.constant 1 : index
    %205 = vector.load %arg15[%c288_222, %c1_223] : memref<400x2xf32, #tpu.memory_space<vmem>>, vector<16x1xf32>
    tpu.vector_store %arg15[%c288_222, %c1_223], %204 {strides = array<i32>} : memref<400x2xf32, #tpu.memory_space<vmem>>, vector<16x1xf32>,
    %c0_224 = arith.constant 0 : index
    %c92 = arith.constant 92 : index
    %206 = vector.load %arg14[%c0_224, %c92] : memref<16x317xf32, #tpu.memory_space<vmem>>, vector<16x1xf32>
    %c304 = arith.constant 304 : index
    %c0_225 = arith.constant 0 : index
    %207 = vector.load %arg15[%c304, %c0_225] : memref<400x2xf32, #tpu.memory_space<vmem>>, vector<16x1xf32>
    tpu.vector_store %arg15[%c304, %c0_225], %206 {strides = array<i32>} : memref<400x2xf32, #tpu.memory_space<vmem>>, vector<16x1xf32>,
    %c0_226 = arith.constant 0 : index
    %c288_227 = arith.constant 288 : index
    %208 = vector.load %arg14[%c0_226, %c288_227] : memref<16x317xf32, #tpu.memory_space<vmem>>, vector<16x1xf32>
    %c304_228 = arith.constant 304 : index
    %c1_229 = arith.constant 1 : index
    %209 = vector.load %arg15[%c304_228, %c1_229] : memref<400x2xf32, #tpu.memory_space<vmem>>, vector<16x1xf32>
    tpu.vector_store %arg15[%c304_228, %c1_229], %208 {strides = array<i32>} : memref<400x2xf32, #tpu.memory_space<vmem>>, vector<16x1xf32>,
    %c0_230 = arith.constant 0 : index
    %c112_231 = arith.constant 112 : index
    %210 = vector.load %arg14[%c0_230, %c112_231] : memref<16x317xf32, #tpu.memory_space<vmem>>, vector<16x1xf32>
    %c320 = arith.constant 320 : index
    %c0_232 = arith.constant 0 : index
    %211 = vector.load %arg15[%c320, %c0_232] : memref<400x2xf32, #tpu.memory_space<vmem>>, vector<16x1xf32>
    tpu.vector_store %arg15[%c320, %c0_232], %210 {strides = array<i32>} : memref<400x2xf32, #tpu.memory_space<vmem>>, vector<16x1xf32>,
    %c0_233 = arith.constant 0 : index
    %c308 = arith.constant 308 : index
    %212 = vector.load %arg14[%c0_233, %c308] : memref<16x317xf32, #tpu.memory_space<vmem>>, vector<16x1xf32>
    %c320_234 = arith.constant 320 : index
    %c1_235 = arith.constant 1 : index
    %213 = vector.load %arg15[%c320_234, %c1_235] : memref<400x2xf32, #tpu.memory_space<vmem>>, vector<16x1xf32>
    tpu.vector_store %arg15[%c320_234, %c1_235], %212 {strides = array<i32>} : memref<400x2xf32, #tpu.memory_space<vmem>>, vector<16x1xf32>,
    %c0_236 = arith.constant 0 : index
    %c114 = arith.constant 114 : index
    %214 = vector.load %arg14[%c0_236, %c114] : memref<16x317xf32, #tpu.memory_space<vmem>>, vector<16x1xf32>
    %c336 = arith.constant 336 : index
    %c0_237 = arith.constant 0 : index
    %215 = vector.load %arg15[%c336, %c0_237] : memref<400x2xf32, #tpu.memory_space<vmem>>, vector<16x1xf32>
    tpu.vector_store %arg15[%c336, %c0_237], %214 {strides = array<i32>} : memref<400x2xf32, #tpu.memory_space<vmem>>, vector<16x1xf32>,
    %c0_238 = arith.constant 0 : index
    %c310 = arith.constant 310 : index
    %216 = vector.load %arg14[%c0_238, %c310] : memref<16x317xf32, #tpu.memory_space<vmem>>, vector<16x1xf32>
    %c336_239 = arith.constant 336 : index
    %c1_240 = arith.constant 1 : index
    %217 = vector.load %arg15[%c336_239, %c1_240] : memref<400x2xf32, #tpu.memory_space<vmem>>, vector<16x1xf32>
    tpu.vector_store %arg15[%c336_239, %c1_240], %216 {strides = array<i32>} : memref<400x2xf32, #tpu.memory_space<vmem>>, vector<16x1xf32>,
    %c0_241 = arith.constant 0 : index
    %c116 = arith.constant 116 : index
    %218 = vector.load %arg14[%c0_241, %c116] : memref<16x317xf32, #tpu.memory_space<vmem>>, vector<16x1xf32>
    %c352 = arith.constant 352 : index
    %c0_242 = arith.constant 0 : index
    %219 = vector.load %arg15[%c352, %c0_242] : memref<400x2xf32, #tpu.memory_space<vmem>>, vector<16x1xf32>
    tpu.vector_store %arg15[%c352, %c0_242], %218 {strides = array<i32>} : memref<400x2xf32, #tpu.memory_space<vmem>>, vector<16x1xf32>,
    %c0_243 = arith.constant 0 : index
    %c312 = arith.constant 312 : index
    %220 = vector.load %arg14[%c0_243, %c312] : memref<16x317xf32, #tpu.memory_space<vmem>>, vector<16x1xf32>
    %c352_244 = arith.constant 352 : index
    %c1_245 = arith.constant 1 : index
    %221 = vector.load %arg15[%c352_244, %c1_245] : memref<400x2xf32, #tpu.memory_space<vmem>>, vector<16x1xf32>
    tpu.vector_store %arg15[%c352_244, %c1_245], %220 {strides = array<i32>} : memref<400x2xf32, #tpu.memory_space<vmem>>, vector<16x1xf32>,
    %c0_246 = arith.constant 0 : index
    %c118 = arith.constant 118 : index
    %222 = vector.load %arg14[%c0_246, %c118] : memref<16x317xf32, #tpu.memory_space<vmem>>, vector<16x1xf32>
    %c368 = arith.constant 368 : index
    %c0_247 = arith.constant 0 : index
    %223 = vector.load %arg15[%c368, %c0_247] : memref<400x2xf32, #tpu.memory_space<vmem>>, vector<16x1xf32>
    tpu.vector_store %arg15[%c368, %c0_247], %222 {strides = array<i32>} : memref<400x2xf32, #tpu.memory_space<vmem>>, vector<16x1xf32>,
    %c0_248 = arith.constant 0 : index
    %c314 = arith.constant 314 : index
    %224 = vector.load %arg14[%c0_248, %c314] : memref<16x317xf32, #tpu.memory_space<vmem>>, vector<16x1xf32>
    %c368_249 = arith.constant 368 : index
    %c1_250 = arith.constant 1 : index
    %225 = vector.load %arg15[%c368_249, %c1_250] : memref<400x2xf32, #tpu.memory_space<vmem>>, vector<16x1xf32>
    tpu.vector_store %arg15[%c368_249, %c1_250], %224 {strides = array<i32>} : memref<400x2xf32, #tpu.memory_space<vmem>>, vector<16x1xf32>,
    %c0_251 = arith.constant 0 : index
    %c120_252 = arith.constant 120 : index
    %226 = vector.load %arg14[%c0_251, %c120_252] : memref<16x317xf32, #tpu.memory_space<vmem>>, vector<16x1xf32>
    %c384 = arith.constant 384 : index
    %c0_253 = arith.constant 0 : index
    %227 = vector.load %arg15[%c384, %c0_253] : memref<400x2xf32, #tpu.memory_space<vmem>>, vector<16x1xf32>
    tpu.vector_store %arg15[%c384, %c0_253], %226 {strides = array<i32>} : memref<400x2xf32, #tpu.memory_space<vmem>>, vector<16x1xf32>,
    %c0_254 = arith.constant 0 : index
    %c316 = arith.constant 316 : index
    %228 = vector.load %arg14[%c0_254, %c316] : memref<16x317xf32, #tpu.memory_space<vmem>>, vector<16x1xf32>
    %c384_255 = arith.constant 384 : index
    %c1_256 = arith.constant 1 : index
    %229 = vector.load %arg15[%c384_255, %c1_256] : memref<400x2xf32, #tpu.memory_space<vmem>>, vector<16x1xf32>
    tpu.vector_store %arg15[%c384_255, %c1_256], %228 {strides = array<i32>} : memref<400x2xf32, #tpu.memory_space<vmem>>, vector<16x1xf32>,
    %c0_257 = arith.constant 0 : index
    %c0_258 = arith.constant 0 : index
    %230 = vector.load %arg5[%c0_257, %c0_258] : memref<120x400xbf16, #tpu.memory_space<vmem>>, vector<120x400xbf16>
    %c0_259 = arith.constant 0 : index
    %c0_260 = arith.constant 0 : index
    %231 = vector.load %arg15[%c0_259, %c0_260] : memref<400x2xf32, #tpu.memory_space<vmem>>, vector<400x2xf32>
    %232 = arith.truncf %231 : vector<400x2xf32> to vector<400x2xbf16>
    %cst_261 = arith.constant dense<0.000000e+00> : vector<120x2xf32>
    %233 = tpu.matmul %230, %232, %cst_261 {dimension_numbers = #tpu.dot_dimension_numbers<[1], [0], [0], [1], [0, 0, 1, 1], [], []>} : vector<120x400xbf16>, vector<400x2xbf16>, vector<120x2xf32> -> vector<120x2xf32>
    %c0_262 = arith.constant 0 : index
    %c0_263 = arith.constant 0 : index
    %234 = vector.load %arg6[%c0_262, %c0_263] : memref<120x1xf32, #tpu.memory_space<vmem>>, vector<120x1xf32>
    %235 = vector.broadcast %234 : vector<120x1xf32> to vector<120x2xf32>
    %236 = arith.addf %233, %235 : vector<120x2xf32>
    %cst_264 = arith.constant 5.000000e-01 : f32
    %237 = vector.broadcast %cst_264 : f32 to vector<120x2xf32>
    %238 = arith.mulf %237, %236 : vector<120x2xf32>
    %239 = math.tanh %238 : vector<120x2xf32>
    %cst_265 = arith.constant 5.000000e-01 : f32
    %240 = vector.broadcast %cst_265 : f32 to vector<120x2xf32>
    %241 = arith.mulf %240, %239 : vector<120x2xf32>
    %cst_266 = arith.constant 5.000000e-01 : f32
    %242 = vector.broadcast %cst_266 : f32 to vector<120x2xf32>
    %243 = arith.addf %241, %242 : vector<120x2xf32>
    %c0_267 = arith.constant 0 : index
    %c0_268 = arith.constant 0 : index
    %244 = vector.load %arg7[%c0_267, %c0_268] : memref<84x120xbf16, #tpu.memory_space<vmem>>, vector<84x120xbf16>
    %245 = arith.truncf %243 : vector<120x2xf32> to vector<120x2xbf16>
    %cst_269 = arith.constant dense<0.000000e+00> : vector<84x2xf32>
    %246 = tpu.matmul %244, %245, %cst_269 {dimension_numbers = #tpu.dot_dimension_numbers<[1], [0], [0], [1], [0, 0, 1, 1], [], []>} : vector<84x120xbf16>, vector<120x2xbf16>, vector<84x2xf32> -> vector<84x2xf32>
    %c0_270 = arith.constant 0 : index
    %c0_271 = arith.constant 0 : index
    %247 = vector.load %arg8[%c0_270, %c0_271] : memref<84x1xf32, #tpu.memory_space<vmem>>, vector<84x1xf32>
    %248 = vector.broadcast %247 : vector<84x1xf32> to vector<84x2xf32>
    %249 = arith.addf %246, %248 : vector<84x2xf32>
    %cst_272 = arith.constant 5.000000e-01 : f32
    %250 = vector.broadcast %cst_272 : f32 to vector<84x2xf32>
    %251 = arith.mulf %250, %249 : vector<84x2xf32>
    %252 = math.tanh %251 : vector<84x2xf32>
    %cst_273 = arith.constant 5.000000e-01 : f32
    %253 = vector.broadcast %cst_273 : f32 to vector<84x2xf32>
    %254 = arith.mulf %253, %252 : vector<84x2xf32>
    %cst_274 = arith.constant 5.000000e-01 : f32
    %255 = vector.broadcast %cst_274 : f32 to vector<84x2xf32>
    %256 = arith.addf %254, %255 : vector<84x2xf32>
    %c0_275 = arith.constant 0 : index
    %c0_276 = arith.constant 0 : index
    %257 = vector.load %arg9[%c0_275, %c0_276] : memref<10x84xbf16, #tpu.memory_space<vmem>>, vector<10x84xbf16>
    %258 = arith.truncf %256 : vector<84x2xf32> to vector<84x2xbf16>
    %cst_277 = arith.constant dense<0.000000e+00> : vector<10x2xf32>
    %259 = tpu.matmul %257, %258, %cst_277 {dimension_numbers = #tpu.dot_dimension_numbers<[1], [0], [0], [1], [0, 0, 1, 1], [], []>} : vector<10x84xbf16>, vector<84x2xbf16>, vector<10x2xf32> -> vector<10x2xf32>
    %c0_278 = arith.constant 0 : index
    %c0_279 = arith.constant 0 : index
    %260 = vector.load %arg10[%c0_278, %c0_279] : memref<10x1xf32, #tpu.memory_space<vmem>>, vector<10x1xf32>
    %261 = vector.broadcast %260 : vector<10x1xf32> to vector<10x2xf32>
    %262 = arith.addf %259, %261 : vector<10x2xf32>
    %c0_280 = arith.constant 0 : index
    %c0_281 = arith.constant 0 : index
    %263 = vector.load %arg11[%c0_280, %c0_281] : memref<10x2xf32, #tpu.memory_space<vmem>>, vector<10x2xf32>
    tpu.vector_store %arg11[%c0_280, %c0_281], %262 {strides = array<i32>} : memref<10x2xf32, #tpu.memory_space<vmem>>, vector<10x2xf32>,
    return
  }
}

</mosaic_0001>

<bundles_post_ra>
// kernel: lenet_forward.1
= control target key start
LH: loop header
LB: loop body
LE: loop exit
PB: predicated region body
PF: predicated region fallthrough
CT: control target
= control target key end

     0   :  { %vm5061_vm0 = vcmask 1043456   ;;  %vm95_vm1 = vcmask 1044480   ;;  %v3664_v1 = vmov 0   ;;  %v3665_v2 = vmov 65535   ;;  %s3667_s25 = smov 96   ;;  %s3668_s26 = smov 97   ;;  %s5049_s0 = inlined_call_operand.vmem [shape: bf16[4,25,392], index: 0, kind: input, shape index: {}]   ;;  %s5050_s1 = inlined_call_operand.vmem [shape: bf16[8,25], index: 1, kind: input, shape index: {}]   ;;  %s5051_s2 = inlined_call_operand.vmem [shape: f32[8,1], index: 2, kind: input, shape index: {}]   ;;  %s5052_s3 = inlined_call_operand.vmem [shape: bf16[16,200], index: 3, kind: input, shape index: {}]   ;;  %s5053_s4 = inlined_call_operand.vmem [shape: f32[16,1], index: 4, kind: input, shape index: {}]   ;;  %s5054_s6 = inlined_call_operand.vmem [shape: f32[120,1], index: 6, kind: input, shape index: {}]   ;;  %s5055_s5 = inlined_call_operand.vmem [shape: bf16[120,400], index: 5, kind: input, shape index: {}]   ;;  %s5056_s8 = inlined_call_operand.vmem [shape: f32[84,1], index: 8, kind: input, shape index: {}]   ;;  %s5057_s10 = inlined_call_operand.vmem [shape: f32[10,1], index: 10, kind: input, shape index: {}]   ;;  %s5058_s7 = inlined_call_operand.vmem [shape: bf16[84,120], index: 7, kind: input, shape index: {}]   ;;  %s5059_s9 = inlined_call_operand.vmem [shape: bf16[10,84], index: 9, kind: input, shape index: {}]   ;;  %s5060_s11 = inlined_call_operand.vmem [shape: f32[10,2], index: 11, kind: output, shape index: {}]  }
   0x1   :  { %v3464_v0 = vld [vmem:[%s5049_s0 + $0x24] ss:$16 sps:$4 sm:$0x1f]   ;;  %142 = vmatprep.mubr.bf16.mxu1 %v3664_v1  ;;  %301 = vmatprep.mubr.bf16.mxu0 %v3664_v1  ;;  %v96_v3 = vsel %vm5061_vm0, 4294967295, %v3665_v2  ;;  %v3474_v14 = vld [vmem:[%s5049_s0] ss:$16 sps:$4 sm:$0xff]  }
   0x2   :  { %3462 = vset.pattern.permute.xlu0 %v3664_v1  ;;  %3463 = vset.pattern.permute.xlu1 %v3664_v1  ;;  %v3795_v4 = vsel %vm95_vm1, %v96_v3, 0  ;;  %v3466_v5 = vld [vmem:[%s5049_s0 + $0x64] ss:$16 sps:$4 sm:$0x1f]   ;;  %v3475_v15 = vld [vmem:[%s5049_s0 + $0x40] ss:$16 sps:$4 sm:$0xff]  }
   0x3   :  { %v102_v6 = vand.u32 %v3464_v0, %v3795_v4  ;;  %v3468_v7 = vld [vmem:[%s5049_s0 + $0x20] ss:$16 sps:$4 sm:$0x1f]   ;;  %v261_v9 = vand.u32 %v3466_v5, %v3795_v4  ;;  %v3470_v10 = vld [vmem:[%s5049_s0 + $0x4] ss:$16 sps:$4 sm:$0xff]   ;;  %vm90_vm2 = vcmask 203776  }
   0x4   :  { %v3469_v8 = vld [vmem:[%s5049_s0 + $0x60] ss:$16 sps:$4 sm:$0x1f]   ;;  %v3472_v11 = vld [vmem:[%s5049_s0 + $0x44] ss:$16 sps:$4 sm:$0xff]   ;;  %v99_v12 = vand.u32 %v3468_v7, %v3795_v4  ;;  %s3669_s27 = smov 98  }
   0x5   :  { %122 = vmatprep.subr.bf16.mxu1 %v102_v6  ;;  %v258_v13 = vand.u32 %v3469_v8, %v3795_v4  ;;  %281 = vmatprep.subr.bf16.mxu0 %v261_v9  ;;  %v3476_v16 = vld [vmem:[%s5049_s0 + $0x28] ss:$16 sps:$4 sm:$0x1f]   ;;  %v3478_v17 = vld [vmem:[%s5049_s0 + $0x2c] ss:$16 sps:$4 sm:$0x1f]  }
   0x6   :  { %123 = vmatpush1.bf16.msra.mxu1 %v99_v12  ;;  %v3479_v18 = vld [vmem:[%s5049_s0 + $0xa0] ss:$16 sps:$4 sm:$0x1f]   ;;  %v3481_v19 = vld [vmem:[%s5049_s0 + $0xa4] ss:$16 sps:$4 sm:$0x1f]   ;;  %v108_v20 = vand.u32 %v3478_v17, %v3795_v4  ;;  %v105_v23 = vand.u32 %v3476_v16, %v3795_v4 }
   0x7   :  { %282 = vmatpush1.bf16.msra.mxu0 %v258_v13  ;;  %124 = vmatprep.subr.bf16.mxu1 %v3470_v10  ;;  %v420_v21 = vand.u32 %v3481_v19, %v3795_v4  ;;  %v3839_v22 = vld [vmem:[%s5050_s1] sm:$0xf]  ;;  %v417_v24 = vand.u32 %v3479_v18, %v3795_v4  ;;  %v3484_v25 = vld [vmem:[%s5049_s0 + $0xc] ss:$16 sps:$4 sm:$0xff]   ;;  %v3487_v26 = vld [vmem:[%s5049_s0 + $0x84] ss:$16 sps:$4 sm:$0xff]  }
   0x8   :  { %283 = vmatprep.subr.bf16.mxu0 %v3472_v11  ;;  %v3482_v27 = vld [vmem:[%s5049_s0 + $0x8] ss:$16 sps:$4 sm:$0xff]   ;;  %v3490_v28 = vld [vmem:[%s5049_s0 + $0x6c] ss:$16 sps:$4 sm:$0x1f]   ;;  %v40_v43 = vld [vmem:[%s5051_s2] sm:$0xff] }
   0x9   :  { %v3488_v29 = vld [vmem:[%s5049_s0 + $0x68] ss:$16 sps:$4 sm:$0x1f]   ;;  %v3493_v30 = vld [vmem:[%s5049_s0 + $0xe4] ss:$16 sps:$4 sm:$0x1f]   ;;  %v267_v33 = vand.u32 %v3490_v28, %v3795_v4  ;;  %43 = vperm.xlu0 %3462, %v40_v43  }
   0xa   :  { %125 = vmatpush1.bf16.msra.mxu1 %v3474_v14  ;;  %v3485_v31 = vld [vmem:[%s5049_s0 + $0x80] ss:$16 sps:$4 sm:$0xff]   ;;  %v579_v34 = vand.u32 %v3493_v30, %v3795_v4  ;;  %v3496_v35 = vld [vmem:[%s5049_s0 + $0x4c] ss:$16 sps:$4 sm:$0xff]   ;;  %v264_v36 = vand.u32 %v3488_v29, %v3795_v4  ;;  %v3499_v38 = vld [vmem:[%s5049_s0 + $0xc4] ss:$16 sps:$4 sm:$0xff]  }
   0xb   :  { %284 = vmatpush1.bf16.msra.mxu0 %v3475_v15  ;;  %163 = vmatprep.subr.bf16.mxu1 %v108_v20  ;;  %v3491_v32 = vld [vmem:[%s5049_s0 + $0xe0] ss:$16 sps:$4 sm:$0x1f]   ;;  %v3502_v39 = vld [vmem:[%s5049_s0 + $0xac] ss:$16 sps:$4 sm:$0x1f]  }
   0xc   :  { %440 = vmatprep.subr.bf16.mxu0 %v420_v21  ;;  %v576_v37 = vand.u32 %v3491_v32, %v3795_v4  ;;  %v3494_v40 = vld [vmem:[%s5049_s0 + $0x48] ss:$16 sps:$4 sm:$0xff]   ;;  %v3497_v41 = vld [vmem:[%s5049_s0 + $0xc0] ss:$16 sps:$4 sm:$0xff]   ;;  %v426_v44 = vand.u32 %v3502_v39, %v3795_v4  ;;  %v3505_v46 = vld [vmem:[%s5049_s0 + $0x8c] ss:$16 sps:$4 sm:$0xff]  }
   0xd   :  { %3154 = vmatmul.mubr.msk.bf16.vlgmr.msra.gmra.mxu1 %vm90_vm2, %v3839_v22  ;;  %v3500_v42 = vld [vmem:[%s5049_s0 + $0xa8] ss:$16 sps:$4 sm:$0x1f]   ;;  %v3508_v47 = vld [vmem:[%s5049_s0 + $0xec] ss:$16 sps:$4 sm:$0x1f]  }
   0xe   :  { %3172 = vmatmul.mubr.msk.bf16.vlgmr.msra.gmra.mxu0 %vm90_vm2, %v3839_v22  ;;  %164 = vmatpush1.bf16.msra.mxu1 %v105_v23  ;;  %v423_v45 = vand.u32 %v3500_v42, %v3795_v4  ;;  %v3503_v48 = vld [vmem:[%s5049_s0 + $0x88] ss:$16 sps:$4 sm:$0xff]   ;;  %v585_v50 = vand.u32 %v3508_v47, %v3795_v4  ;;  %v3511_v52 = vld [vmem:[%s5049_s0 + $0xcc] ss:$16 sps:$4 sm:$0xff]   ;;  %s3670_s28 = smov 99   ;;  %s3671_s29 = smov 100  }
   0xf   :  { %441 = vmatpush1.bf16.msra.mxu0 %v417_v24  ;;  %165 = vmatprep.subr.bf16.mxu1 %v3484_v25  ;;  %v3506_v49 = vld [vmem:[%s5049_s0 + $0xe8] ss:$16 sps:$4 sm:$0x1f]   ;;  %s3672_s1 = smov 110   ;;  %s3673_s30 = smov 111   ;;  %vm703_vm3 = vcmask 621568  }
  0x10   :  { %442 = vmatprep.subr.bf16.mxu0 %v3487_v26  ;;  %183 = vmatprep.mubr.bf16.mxu1 %v3664_v1  ;;  %v582_v51 = vand.u32 %v3506_v49, %v3795_v4  ;;  %v3509_v53 = vld [vmem:[%s5049_s0 + $0xc8] ss:$16 sps:$4 sm:$0xff]   ;;  %s3666_s0 = smov 86   ;;  %vm696_vm4 = vcmask 64512   ;;  %s3674_s12 = smov 112   ;;  %vm1011_vm5 = vcmask 703488  }
  0x11   :  { %460 = vmatprep.mubr.bf16.mxu0 %v3664_v1  ;;  %s3675_s13 = smov 113   ;;  %s3676_s14 = smov 114   ;;  %vm1120_vm6 = vcmask 588800   ;;  %vm990_vm7 = vcmask 785408   ;;  %vm948_vm8 = vcmask 801792   ;;  %vm969_vm9 = vcmask 793600  }
  0x12   :  { %166 = vmatpush1.bf16.msra.mxu1 %v3482_v27  ;;  %s3677_s15 = smov 124   ;;  %s3678_s16 = smov 125   ;;  %vm906_vm10 = vcmask 818176   ;;  %vm927_vm11 = vcmask 809984   ;;  %vm864_vm12 = vcmask 908288   ;;  %vm885_vm13 = vcmask 900096  }
  0x13   :  { %443 = vmatpush1.bf16.msra.mxu0 %v3485_v31  ;;  %322 = vmatprep.subr.bf16.mxu1 %v267_v33  ;;  %s3679_s2 = smov 126   ;;  %s3680_s17 = smov 68   ;;  %vm1074_vm14 = vcmask 678912   ;;  %vm822_vm15 = vcmask 924672   ;;  %vm843_vm1 = vcmask 916480   ;;  %vm738_vm0 = vcmask 1031168  }
  0x14   :  { %599 = vmatprep.subr.bf16.mxu0 %v579_v34  ;;  %s3681_s18 = smov 127   ;;  %s3682_s19 = smov 70  }
  0x15   :  { %3155 = vmatmul.mubr.msk.bf16.vlgmr.msra.gmra.mxu1 %vm90_vm2, %v3839_v22  ;;  %s3683_s20 = smov 72   ;;  %s3684_s21 = smov 71  }
  0x16   :  { %3190 = vmatmul.mubr.msk.bf16.vlgmr.msra.gmra.mxu0 %vm90_vm2, %v3839_v22  ;;  %323 = vmatpush1.bf16.msra.mxu1 %v264_v36  ;;  %s3685_s22 = smov 83   ;;  %s3686_s23 = smov 82  }
  0x17   :  { %600 = vmatpush1.bf16.msra.mxu0 %v576_v37  ;;  %324 = vmatprep.subr.bf16.mxu1 %v3496_v35  ;;  %s3687_s24 = smov 85  }
  0x18   :  { %601 = vmatprep.subr.bf16.mxu0 %v3499_v38  ;;  %342 = vmatprep.mubr.bf16.mxu1 %v3664_v1 }
  0x19   :  { %619 = vmatprep.mubr.bf16.mxu0 %v3664_v1 }
  0x1a   :  { %325 = vmatpush1.bf16.msra.mxu1 %v3494_v40 }
  0x1b   :  { %602 = vmatpush1.bf16.msra.mxu0 %v3497_v41  ;;  %481 = vmatprep.subr.bf16.mxu1 %v426_v44 }
  0x1d   :  { %3173 = vmatmul.mubr.msk.bf16.vlgmr.msra.gmra.mxu1 %vm90_vm2, %v3839_v22 }
  0x1e   :  { %3208 = vmatmul.mubr.msk.bf16.vlgmr.msra.gmra.mxu0 %vm90_vm2, %v3839_v22  ;;  %482 = vmatpush1.bf16.msra.mxu1 %v423_v45 }
  0x1f   :  { %501 = vmatprep.mubr.bf16.mxu1 %v3664_v1  ;;  %483 = vmatprep.subr.bf16.mxu1 %v3505_v46 }
  0x22   :  { %484 = vmatpush1.bf16.msra.mxu1 %v3503_v48 }
  0x23   :  { %640 = vmatprep.subr.bf16.mxu1 %v585_v50 }
  0x25   :  { %3191 = vmatmul.mubr.msk.bf16.vlgmr.msra.gmra.mxu1 %vm90_vm2, %v3839_v22 }
  0x26   :  { %641 = vmatpush1.bf16.msra.mxu1 %v582_v51  ;;  %660 = vmatprep.mubr.bf16.mxu1 %v3664_v1 }
  0x27   :  { %642 = vmatprep.subr.bf16.mxu1 %v3511_v52 }
  0x2a   :  { %643 = vmatpush1.bf16.msra.mxu1 %v3509_v53 }
  0x2b   :  { %1426 = vmatprep.subr.bf16.mxu1 %v3664_v1 }
  0x2d   :  { %3209 = vmatmul.mubr.msk.bf16.vlgmr.msra.gmra.mxu1 %vm90_vm2, %v3839_v22  ;;  %vm780_vm2 = vcmask 1014784  }
  0x84   :  { %v3937_v54 = vpop.permute.xlu0 %43 }
  0xcd   :  { %v144_v55 = vpop.f32.mrf.mxu1 }
  0xce   :  { %v303_v56 = vpop.f32.mrf.mxu0  ;;  %v145_v57 = vadd.f32 %v144_v55, %v3937_v54 }
  0xcf   :  { %v146_v58 = vpop.f32.mrf.mxu1  ;;  %v304_v60 = vadd.f32 %v303_v56, %v3937_v54 }
  0xd0   :  { %v305_v59 = vpop.f32.mrf.mxu0  ;;  %v147_v61 = vadd.f32 %v146_v58, %v3937_v54  ;;  %v192_v2 = vmul.f32 0.5, %v145_v57 }
  0xd1   :  { %v148_v62 = vpop.f32.mrf.mxu1  ;;  %v306_v0 = vadd.f32 %v305_v59, %v3937_v54  ;;  %v351_v5 = vmul.f32 0.5, %v304_v60 }
  0xd2   :  { %v307_v63 = vpop.f32.mrf.mxu0  ;;  %v193_v6 = vmul.f32 0.5, %v147_v61  ;;  %3568 = vtanh.f32 %v192_v2 }
  0xd3   :  { %v149_v3 = vpop.f32.mrf.mxu1  ;;  %v352_v9 = vmul.f32 0.5, %v306_v0  ;;  %3570 = vtanh.f32 %v351_v5 }
  0xd4   :  { %v308_v4 = vpop.f32.mrf.mxu0  ;;  %3572 = vtanh.f32 %v193_v6 }
  0xd5   :  { %v185_v7 = vpop.f32.mrf.mxu1  ;;  %3574 = vtanh.f32 %v352_v9 }
  0xd6   :  { %v462_v8 = vpop.f32.mrf.mxu0  ;;  %v186_v23 = vadd.f32 %v185_v7, %v3937_v54 }
  0xd7   :  { %v463_v10 = vadd.f32 %v462_v8, %v3937_v54  ;;  %v187_v11 = vpop.f32.mrf.mxu1 }
  0xd8   :  { %v464_v12 = vpop.f32.mrf.mxu0  ;;  %v194_v32 = vmul.f32 0.5, %v186_v23  ;;  %v188_v33 = vadd.f32 %v187_v11, %v3937_v54 }
  0xd9   :  { %v510_v13 = vmul.f32 0.5, %v463_v10  ;;  %v465_v14 = vadd.f32 %v464_v12, %v3937_v54  ;;  %v189_v15 = vpop.f32.mrf.mxu1 }
  0xda   :  { %v466_v16 = vpop.f32.mrf.mxu0  ;;  %v195_v45 = vmul.f32 0.5, %v188_v33 }
  0xdb   :  { %v511_v17 = vmul.f32 0.5, %v465_v14  ;;  %3576 = vtanh.f32 %v510_v13  ;;  %v190_v18 = vpop.f32.mrf.mxu1 }
  0xdc   :  { %v467_v19 = vpop.f32.mrf.mxu0 }
  0xdd   :  { %3578 = vtanh.f32 %v511_v17  ;;  %v344_v20 = vpop.f32.mrf.mxu1 }
  0xde   :  { %v621_v21 = vpop.f32.mrf.mxu0  ;;  %v345_v26 = vadd.f32 %v344_v20, %v3937_v54 }
  0xdf   :  { %v622_v22 = vadd.f32 %v621_v21, %v3937_v54  ;;  %v346_v24 = vpop.f32.mrf.mxu1  ;;  %v3569_v37 = vpop.eup %3568 }
  0xe0   :  { %v623_v25 = vpop.f32.mrf.mxu0  ;;  %v347_v28 = vadd.f32 %v346_v24, %v3937_v54  ;;  %v353_v38 = vmul.f32 0.5, %v345_v26  ;;  %v3571_v39 = vpop.eup %3570  ;;  %v200_v50 = vmul.f32 0.5, %v3569_v37 }
  0xe1   :  { %v669_v27 = vmul.f32 0.5, %v622_v22  ;;  %v624_v29 = vadd.f32 %v623_v25, %v3937_v54  ;;  %v348_v30 = vpop.f32.mrf.mxu1  ;;  %v3573_v42 = vpop.eup %3572  ;;  %v359_v51 = vmul.f32 0.5, %v3571_v39 }
  0xe2   :  { %v625_v31 = vpop.f32.mrf.mxu0  ;;  %v354_v40 = vmul.f32 0.5, %v347_v28  ;;  %v3575_v44 = vpop.eup %3574  ;;  %v201_v56 = vmul.f32 0.5, %v3573_v42  ;;  %v204_v60 = vadd.f32 0.5, %v200_v50 }
  0xe3   :  { %3580 = vtanh.f32 %v669_v27  ;;  %v670_v34 = vmul.f32 0.5, %v624_v29  ;;  %v349_v35 = vpop.f32.mrf.mxu1  ;;  %v360_v57 = vmul.f32 0.5, %v3575_v44  ;;  %v363_v61 = vadd.f32 0.5, %v359_v51 }
  0xe4   :  { %v626_v36 = vpop.f32.mrf.mxu0  ;;  %v205_v2 = vadd.f32 0.5, %v201_v56 }
  0xe5   :  { %3582 = vtanh.f32 %v670_v34  ;;  %v503_v41 = vpop.f32.mrf.mxu1  ;;  %v364_v3 = vadd.f32 0.5, %v360_v57  ;;  %v367_v9 = vadd.f32 %v363_v61, %v204_v60 }
  0xe6   :  { %v504_v43 = vadd.f32 %v503_v41, %v3937_v54  ;;  %3584 = vtanh.f32 %v194_v32 }
  0xe7   :  { %v505_v46 = vpop.f32.mrf.mxu1  ;;  %3586 = vtanh.f32 %v353_v38  ;;  %v368_v15 = vadd.f32 %v364_v3, %v205_v2 }
  0xe8   :  { %v3577_v47 = vpop.eup %3576  ;;  %v512_v48 = vmul.f32 0.5, %v504_v43  ;;  %v506_v49 = vadd.f32 %v505_v46, %v3937_v54  ;;  %3588 = vtanh.f32 %v354_v40 }
  0xe9   :  { %v507_v52 = vpop.f32.mrf.mxu1  ;;  %v518_v58 = vmul.f32 0.5, %v3577_v47 }
  0xea   :  { %v3579_v53 = vpop.eup %3578  ;;  %3590 = vtanh.f32 %v512_v48  ;;  %v513_v55 = vmul.f32 0.5, %v506_v49 }
  0xeb   :  { %3592 = vtanh.f32 %v195_v45  ;;  %v508_v59 = vpop.f32.mrf.mxu1  ;;  %v519_v62 = vmul.f32 0.5, %v3579_v53  ;;  %v522_v4 = vadd.f32 0.5, %v518_v58 }
  0xec   :  { %3594 = vtanh.f32 %v513_v55 }
  0xed   :  { %v662_v63 = vpop.f32.mrf.mxu1  ;;  %v523_v10 = vadd.f32 0.5, %v519_v62  ;;  %v526_v16 = vadd.f32 %v522_v4, %v367_v9 }
  0xee   :  { %v663_v0 = vadd.f32 %v662_v63, %v3937_v54 }
  0xef   :  { %v664_v5 = vpop.f32.mrf.mxu1  ;;  %v527_v22 = vadd.f32 %v523_v10, %v368_v15 }
  0xf0   :  { %v3581_v6 = vpop.eup %3580  ;;  %v671_v7 = vmul.f32 0.5, %v663_v0  ;;  %v665_v8 = vadd.f32 %v664_v5, %v3937_v54 }
  0xf1   :  { %v677_v11 = vmul.f32 0.5, %v3581_v6  ;;  %v666_v12 = vpop.f32.mrf.mxu1 }
  0xf2   :  { %v3583_v13 = vpop.eup %3582  ;;  %3596 = vtanh.f32 %v671_v7  ;;  %v672_v14 = vmul.f32 0.5, %v665_v8 }
  0xf3   :  { %v681_v17 = vadd.f32 0.5, %v677_v11  ;;  %v678_v18 = vmul.f32 0.5, %v3583_v13  ;;  %v667_v19 = vpop.f32.mrf.mxu1  ;;  %v3585_v20 = vpop.eup %3584  ;;  %v3512_v13 = vld [vmem:[%s5052_s3 + $0x4] ss:$8 sps:$4 sm:$0xff]  }
  0xf4   :  { %3598 = vtanh.f32 %v672_v14  ;;  %v3587_v21 = vpop.eup %3586  ;;  %v202_v32 = vmul.f32 0.5, %v3585_v20  ;;  %3213 = vmatprep.mubr.msk.bf16.mxu0 %vm1120_vm6, %v3512_v13  ;;  %3214 = vmatprep.mubr.msk.bf16.mxu1 %vm1120_vm6, %v3512_v13 }
  0xf5   :  { %v685_v23 = vadd.f32 %v681_v17, %v526_v16  ;;  %v682_v24 = vadd.f32 0.5, %v678_v18  ;;  %v3589_v25 = vpop.eup %3588  ;;  %v361_v29 = vmul.f32 0.5, %v3587_v21  ;;  %v1350_v17 = vld [vmem:[%s5053_s4] sm:$0xff] }
  0xf6   :  { %v362_v33 = vmul.f32 0.5, %v3589_v25  ;;  %v206_v38 = vadd.f32 0.5, %v202_v32 }
  0xf7   :  { %v3591_v54 = vpop.eup %3590  ;;  %v3955_v26 = vmul.f32 0.25, %v685_v23  ;;  %v686_v27 = vadd.f32 %v682_v24, %v527_v22  ;;  %v365_v36 = vadd.f32 0.5, %v361_v29 }
  0xf8   :  { %v3593_v28 = vpop.eup %3592  ;;  %v520_v34 = vmul.f32 0.5, %v3591_v54  ;;  %v366_v39 = vadd.f32 0.5, %v362_v33 }
  0xf9   :  { %v3595_v30 = vpop.eup %3594  ;;  %701 = vst [vmem:[#allocation3] sm:$0xff] %v3955_v26  ;;  %v3958_v31 = vmul.f32 0.25, %v686_v27  ;;  %1005 = vrot.lane.b32.xlu0 %v3955_v26, %s3666_s0  ;;  %984 = vrot.lane.b32.xlu1 %v3955_v26, %s3667_s25  ;;  %v203_v35 = vmul.f32 0.5, %v3593_v28  ;;  %v369_v43 = vadd.f32 %v365_v36, %v206_v38  ;;  %v1351_v27 = vld [vmem:[%s5053_s4 + $0x8] sm:$0xff]  ;;  %s3703_s4 = smov 66  }
  0xfa   :  { %v521_v37 = vmul.f32 0.5, %v3595_v30  ;;  %v524_v40 = vadd.f32 0.5, %v520_v34 }
  0xfb   :  { %694 = vst [vmem:[#allocation2 + $0x8] sm:$0xff] %v3958_v31  ;;  %v207_v42 = vadd.f32 0.5, %v203_v35 }
  0xfc   :  { %v525_v44 = vadd.f32 0.5, %v521_v37  ;;  %v528_v48 = vadd.f32 %v524_v40, %v369_v43 }
  0xfd   :  { %963 = vrot.lane.b32.xlu0 %v3955_v26, %s3668_s26  ;;  %942 = vrot.lane.b32.xlu1 %v3955_v26, %s3669_s27  ;;  %v370_v47 = vadd.f32 %v366_v39, %v207_v42 }
  0xff   :  { %v3597_v41 = vpop.eup %3596  ;;  %v529_v52 = vadd.f32 %v525_v44, %v370_v47 }
 0x100   :  { %v679_v45 = vmul.f32 0.5, %v3597_v41 }
 0x101   :  { %v3599_v46 = vpop.eup %3598  ;;  %921 = vrot.lane.b32.xlu0 %v3955_v26, %s3670_s28  ;;  %900 = vrot.lane.b32.xlu1 %v3955_v26, %s3671_s29 }
 0x102   :  { %v683_v49 = vadd.f32 0.5, %v679_v45  ;;  %v680_v50 = vmul.f32 0.5, %v3599_v46  ;;  %v3973_v51 = vld [vmem:[#allocation2 + $0x8] sm:$0xff] }
 0x104   :  { %v687_v53 = vadd.f32 %v683_v49, %v528_v48  ;;  %v684_v55 = vadd.f32 0.5, %v680_v50 }
 0x105   :  { %879 = vrot.lane.b32.xlu0 %v3955_v26, %s3672_s1  ;;  %858 = vrot.lane.b32.xlu1 %v3955_v26, %s3673_s30 }
 0x106   :  { %v3979_v56 = vmul.f32 0.25, %v687_v53  ;;  %v688_v57 = vadd.f32 %v684_v55, %v529_v52 }
 0x108   :  { %v692_v58 = vmul.f32 0.25, %v688_v57  ;;  %704 = vst.msk [vmem:[#allocation3 + $0x10] sm:$0xff] %vm703_vm3, %v3979_v56 }
 0x109   :  { %837 = vrot.lane.b32.xlu0 %v3955_v26, %s3674_s12  ;;  %816 = vrot.lane.b32.xlu1 %v3955_v26, %s3675_s13 }
 0x10a   :  { %697 = vst.msk [vmem:[#allocation2 + $0x18] sm:$0xff] %vm696_vm4, %v692_v58  ;;  %vm801_vm4 = vcmask 932864  }
 0x10d   :  { %795 = vrot.lane.b32.xlu0 %v3955_v26, %s3676_s14  ;;  %774 = vrot.lane.b32.xlu1 %v3955_v26, %s3677_s15 }
 0x111   :  { %753 = vrot.lane.b32.xlu0 %v3955_v26, %s3678_s16  ;;  %732 = vrot.lane.b32.xlu1 %v3955_v26, %s3679_s2  ;;  %v1211_v8 = vld [vmem:[#allocation2 + $0x18] sm:$0xff] }
 0x115   :  { %1216 = vrot.lane.b32.xlu0 %v3955_v26, %s3680_s17  ;;  %711 = vrot.lane.b32.xlu1 %v3955_v26, %s3681_s18 }
 0x119   :  { %1164 = vrot.lane.b32.xlu0 %v3955_v26, %s3682_s19  ;;  %1007 = vrot.lane.b32.xlu1 %v3958_v31, %s3666_s0 }
 0x11d   :  { %986 = vrot.lane.b32.xlu0 %v3958_v31, %s3667_s25  ;;  %944 = vrot.lane.b32.xlu1 %v3958_v31, %s3669_s27 }
 0x121   :  { %1114 = vrot.lane.b32.xlu0 %v3958_v31, %s3683_s20  ;;  %965 = vrot.lane.b32.xlu1 %v3958_v31, %s3668_s26 }
 0x125   :  { %1140 = vrot.lane.b32.xlu0 %v3958_v31, %s3684_s21  ;;  %902 = vrot.lane.b32.xlu1 %v3958_v31, %s3671_s29 }
 0x129   :  { %1112 = vrot.lane.b32.xlu0 %v3955_v26, %s3683_s20  ;;  %923 = vrot.lane.b32.xlu1 %v3958_v31, %s3670_s28 }
 0x12d   :  { %1070 = vrot.lane.b32.xlu0 %v3958_v31, %s3685_s22  ;;  %860 = vrot.lane.b32.xlu1 %v3958_v31, %s3673_s30 }
 0x131   :  { %1091 = vrot.lane.b32.xlu0 %v3958_v31, %s3686_s23  ;;  %881 = vrot.lane.b32.xlu1 %v3958_v31, %s3672_s1 }
 0x135   :  { %1068 = vrot.lane.b32.xlu0 %v3955_v26, %s3685_s22  ;;  %818 = vrot.lane.b32.xlu1 %v3958_v31, %s3675_s13 }
 0x139   :  { %1028 = vrot.lane.b32.xlu0 %v3958_v31, %s3687_s24  ;;  %839 = vrot.lane.b32.xlu1 %v3958_v31, %s3674_s12 }
 0x13d   :  { %1009 = vrot.lane.b32.xlu0 %v3979_v56, %s3666_s0  ;;  %776 = vrot.lane.b32.xlu1 %v3958_v31, %s3677_s15  ;;  %s3688_s0 = smov 69  }
 0x141   :  { %946 = vrot.lane.b32.xlu0 %v3979_v56, %s3669_s27  ;;  %797 = vrot.lane.b32.xlu1 %v3958_v31, %s3676_s14 }
 0x145   :  { %967 = vrot.lane.b32.xlu0 %v3979_v56, %s3668_s26  ;;  %734 = vrot.lane.b32.xlu1 %v3958_v31, %s3679_s2 }
 0x149   :  { %904 = vrot.lane.b32.xlu0 %v3979_v56, %s3671_s29  ;;  %755 = vrot.lane.b32.xlu1 %v3958_v31, %s3678_s16 }
 0x14d   :  { %925 = vrot.lane.b32.xlu0 %v3979_v56, %s3670_s28  ;;  %713 = vrot.lane.b32.xlu1 %v3958_v31, %s3681_s18 }
 0x151   :  { %862 = vrot.lane.b32.xlu0 %v3979_v56, %s3673_s30  ;;  %1218 = vrot.lane.b32.xlu1 %v3958_v31, %s3680_s17  ;;  %s3702_s30 = smov 12  }
 0x155   :  { %883 = vrot.lane.b32.xlu0 %v3979_v56, %s3672_s1  ;;  %1166 = vrot.lane.b32.xlu1 %v3958_v31, %s3682_s19  ;;  %s3689_s1 = smov 84  }
 0x159   :  { %820 = vrot.lane.b32.xlu0 %v3979_v56, %s3675_s13  ;;  %1192 = vrot.lane.b32.xlu1 %v3958_v31, %s3688_s0 }
 0x15d   :  { %841 = vrot.lane.b32.xlu0 %v3979_v56, %s3674_s12  ;;  %988 = vrot.lane.b32.xlu1 %v3979_v56, %s3667_s25  ;;  %s3693_s12 = smov 1  }
 0x161   :  { %778 = vrot.lane.b32.xlu0 %v3979_v56, %s3677_s15  ;;  %1190 = vrot.lane.b32.xlu1 %v3955_v26, %s3688_s0 }
 0x165   :  { %799 = vrot.lane.b32.xlu0 %v3979_v56, %s3676_s14  ;;  %1138 = vrot.lane.b32.xlu1 %v3955_v26, %s3684_s21 }
 0x169   :  { %736 = vrot.lane.b32.xlu0 %v3979_v56, %s3679_s2  ;;  %1089 = vrot.lane.b32.xlu1 %v3955_v26, %s3686_s23 }
 0x16b   :  { %v1006_v59 = vpop.permute.xlu0 %1005  ;;  %v985_v60 = vpop.permute.xlu1 %984 }
 0x16d   :  { %757 = vrot.lane.b32.xlu0 %v3979_v56, %s3678_s16  ;;  %1116 = vrot.lane.b32.xlu1 %v3979_v56, %s3683_s20 }
 0x16f   :  { %v964_v61 = vpop.permute.xlu0 %963  ;;  %v943_v62 = vpop.permute.xlu1 %942 }
 0x171   :  { %715 = vrot.lane.b32.xlu0 %v3979_v56, %s3681_s18  ;;  %1142 = vrot.lane.b32.xlu1 %v3979_v56, %s3684_s21 }
 0x173   :  { %v4091_v63 = vpop.permute.xlu0 %921  ;;  %v901_v0 = vpop.permute.xlu1 %900 }
 0x175   :  { %1220 = vrot.lane.b32.xlu0 %v3979_v56, %s3680_s17  ;;  %1072 = vrot.lane.b32.xlu1 %v3979_v56, %s3685_s22  ;;  %s3697_s22 = smov 44  }
 0x177   :  { %v4097_v2 = vpop.permute.xlu0 %879  ;;  %v4099_v3 = vpop.permute.xlu1 %858 }
 0x179   :  { %1168 = vrot.lane.b32.xlu0 %v3979_v56, %s3682_s19  ;;  %1093 = vrot.lane.b32.xlu1 %v3979_v56, %s3686_s23  ;;  %s3698_s23 = smov 29  }
 0x17b   :  { %v4105_v4 = vpop.permute.xlu0 %837  ;;  %v4107_v5 = vpop.permute.xlu1 %816 }
 0x17d   :  { %1194 = vrot.lane.b32.xlu0 %v3979_v56, %s3688_s0  ;;  %1030 = vrot.lane.b32.xlu1 %v3979_v56, %s3687_s24 }
 0x17f   :  { %v4113_v6 = vpop.permute.xlu0 %795  ;;  %v4115_v7 = vpop.permute.xlu1 %774 }
 0x181   :  { %1049 = vrot.lane.b32.xlu0 %v3958_v31, %s3689_s1  ;;  %1222 = vrot.lane.b32.xlu1 %v1211_v8, %s3680_s17 }
 0x183   :  { %v4120_v9 = vpop.permute.xlu0 %753  ;;  %v4122_v10 = vpop.permute.xlu1 %732 }
 0x185   :  { %1170 = vrot.lane.b32.xlu0 %v1211_v8, %s3682_s19  ;;  %1051 = vrot.lane.b32.xlu1 %v3979_v56, %s3689_s1 }
 0x187   :  { %v4127_v11 = vpop.permute.xlu0 %1216  ;;  %v4129_v12 = vpop.permute.xlu1 %711 }
 0x189   :  { %1118 = vrot.lane.b32.xlu0 %v1211_v8, %s3683_s20  ;;  %1196 = vrot.lane.b32.xlu1 %v1211_v8, %s3688_s0 }
 0x18b   :  { %v4138_v14 = vpop.permute.xlu0 %1164  ;;  %v1008_v15 = vpop.permute.xlu1 %1007 }
 0x18c   :  { %v4141_v16 = vsel %vm1011_vm5, %v1006_v59, %v1008_v15 }
 0x18d   :  { %1026 = vrot.lane.b32.xlu0 %v3955_v26, %s3687_s24  ;;  %1144 = vrot.lane.b32.xlu1 %v1211_v8, %s3684_s21  ;;  %s3700_s24 = smov 64  }
 0x18f   :  { %v4149_v18 = vpop.permute.xlu0 %986  ;;  %v945_v19 = vpop.permute.xlu1 %944 }
 0x190   :  { %v4153_v20 = vsel %vm990_vm7, %v985_v60, %v4149_v18  ;;  %v4156_v21 = vsel %vm948_vm8, %v943_v62, %v945_v19 }
 0x191   :  { %1354 = vperm.xlu0 %3462, %v1350_v17   ;;  %1047 = vrot.lane.b32.xlu1 %v3955_v26, %s3689_s1  ;;  %v1332_v22 = vpack.c.bf16 %v4141_v16, %v4153_v20  ;;  %s3705_s1 = smov 14  }
 0x193   :  { %v4162_v23 = vpop.permute.xlu0 %1114  ;;  %v966_v24 = vpop.permute.xlu1 %965 }
 0x194   :  { %v4165_v25 = vsel %vm969_vm9, %v964_v61, %v966_v24 }
 0x195   :  { %v1329_v54 = vpack.c.bf16 %v4165_v25, %v4156_v21  ;;  %1359 = vperm.xlu1 %3463, %v1351_v27  }
 0x197   :  { %v4172_v28 = vpop.permute.xlu0 %1140  ;;  %v903_v26 = vpop.permute.xlu1 %902 }
 0x198   :  { %v4175_v29 = vsel %vm906_vm10, %v901_v0, %v903_v26 }
 0x19b   :  { %v1113_v30 = vpop.permute.xlu0 %1112  ;;  %v924_v31 = vpop.permute.xlu1 %923 }
 0x19c   :  { %v4179_v32 = vsel %vm1120_vm6, %v1113_v30, %v4162_v23  ;;  %v4183_v33 = vsel %vm927_vm11, %v4091_v63, %v924_v31 }
 0x19d   :  { %v1326_v20 = vpack.c.bf16 %v4183_v33, %v4175_v29 }
 0x19f   :  { %v4185_v34 = vpop.permute.xlu0 %1070  ;;  %v861_v35 = vpop.permute.xlu1 %860 }
 0x1a0   :  { %v4189_v36 = vsel %vm864_vm12, %v4099_v3, %v861_v35 }
 0x1a3   :  { %v4191_v37 = vpop.permute.xlu0 %1091  ;;  %v882_v38 = vpop.permute.xlu1 %881 }
 0x1a4   :  { %v4195_v39 = vsel %vm885_vm13, %v4097_v2, %v882_v38 }
 0x1a5   :  { %v1323_v29 = vpack.c.bf16 %v4195_v39, %v4189_v36 }
 0x1a7   :  { %v1069_v40 = vpop.permute.xlu0 %1068  ;;  %v819_v41 = vpop.permute.xlu1 %818 }
 0x1a8   :  { %v4199_v42 = vsel %vm1074_vm14, %v1069_v40, %v4185_v34  ;;  %v4203_v43 = vsel %vm822_vm15, %v4107_v5, %v819_v41 }
 0x1ab   :  { %v4205_v44 = vpop.permute.xlu0 %1028  ;;  %v840_v45 = vpop.permute.xlu1 %839 }
 0x1ac   :  { %v4209_v46 = vsel %vm843_vm1, %v4105_v4, %v840_v45 }
 0x1ad   :  { %v1320_v39 = vpack.c.bf16 %v4209_v46, %v4203_v43 }
 0x1af   :  { %v1010_v47 = vpop.permute.xlu0 %1009  ;;  %v777_v48 = vpop.permute.xlu1 %776 }
 0x1b0   :  { %v1013_v49 = vsel %vm1011_vm5, %v1008_v15, %v1010_v47  ;;  %1019 = vst.msk [vmem:[#allocation3 + $0x178] sm:$0xff] %vm703_vm3, %v1010_v47  ;;  %v4215_v50 = vsel %vm780_vm2, %v4115_v7, %v777_v48  ;;  %vm759_vm5 = vcmask 1022976  }
 0x1b3   :  { %v947_v52 = vpop.permute.xlu0 %946  ;;  %v798_v53 = vpop.permute.xlu1 %797 }
 0x1b4   :  { %v950_v55 = vsel %vm948_vm8, %v945_v19, %v947_v52  ;;  %956 = vst.msk [vmem:[#allocation3 + $0x130] sm:$0xff] %vm703_vm3, %v947_v52  ;;  %v4221_v56 = vsel %vm801_vm4, %v4113_v6, %v798_v53  ;;  %vm717_vm8 = vcmask 1039360  }
 0x1b5   :  { %v1317_v46 = vpack.c.bf16 %v4221_v56, %v4215_v50 }
 0x1b7   :  { %v968_v57 = vpop.permute.xlu0 %967  ;;  %v4223_v58 = vpop.permute.xlu1 %734 }
 0x1b8   :  { %v971_v59 = vsel %vm969_vm9, %v966_v24, %v968_v57  ;;  %977 = vst.msk [vmem:[#allocation3 + $0x148] sm:$0xff] %vm703_vm3, %v968_v57  ;;  %v4230_v60 = vsel %vm738_vm0, %v4122_v10, %v4223_v58  ;;  %vm1224_vm9 = vcmask 556032  }
 0x1bb   :  { %v905_v61 = vpop.permute.xlu0 %904  ;;  %v4232_v62 = vpop.permute.xlu1 %755 }
 0x1bc   :  { %v908_v63 = vsel %vm906_vm10, %v903_v26, %v905_v61  ;;  %914 = vst.msk [vmem:[#allocation3 + $0x100] sm:$0xff] %vm703_vm3, %v905_v61  ;;  %v4239_v0 = vsel %vm759_vm5, %v4120_v9, %v4232_v62  ;;  %vm1172_vm10 = vcmask 572416  }
 0x1bd   :  { %v1314_v50 = vpack.c.bf16 %v4239_v0, %v4230_v60  ;;  %v1236_v60 = vld [vmem:[#allocation3] sm:$0xff] }
 0x1bf   :  { %v926_v2 = vpop.permute.xlu0 %925  ;;  %v4241_v3 = vpop.permute.xlu1 %713  ;;  %v1277_v16 = vld [vmem:[#allocation3 + $0x148] sm:$0xff] }
 0x1c0   :  { %v929_v4 = vsel %vm927_vm11, %v924_v31, %v926_v2  ;;  %935 = vst.msk [vmem:[#allocation3 + $0x118] sm:$0xff] %vm703_vm3, %v926_v2  ;;  %v4248_v5 = vsel %vm717_vm8, %v4129_v12, %v4241_v3  ;;  %vm1198_vm11 = vcmask 564224  }
 0x1c1   :  { %v1327_v52 = vpack.c.bf16 %v929_v4, %v908_v63  ;;  %v1311_v0 = vpack.c.bf16 %v4248_v5, %v1236_v60 }
 0x1c3   :  { %v863_v6 = vpop.permute.xlu0 %862  ;;  %v4250_v7 = vpop.permute.xlu1 %1218 }
 0x1c4   :  { %v866_v8 = vsel %vm864_vm12, %v861_v35, %v863_v6  ;;  %872 = vst.msk [vmem:[#allocation3 + $0xd0] sm:$0xff] %vm703_vm3, %v863_v6  ;;  %v4257_v9 = vsel %vm1224_vm9, %v4127_v11, %v4250_v7  ;;  %vm1095_vm12 = vcmask 670720  }
 0x1c7   :  { %v884_v10 = vpop.permute.xlu0 %883  ;;  %v4259_v13 = vpop.permute.xlu1 %1166 }
 0x1c8   :  { %v887_v12 = vsel %vm885_vm13, %v882_v38, %v884_v10  ;;  %893 = vst.msk [vmem:[#allocation3 + $0xe8] sm:$0xff] %vm703_vm3, %v884_v10  ;;  %v4266_v15 = vsel %vm1172_vm10, %v4138_v14, %v4259_v13  ;;  %v1330_v38 = vpack.c.bf16 %v971_v59, %v950_v55  ;;  %v1274_v59 = vld [vmem:[#allocation3 + $0x130] sm:$0xff]  ;;  %vm5062_vm13 = vcmask 1043456  }
 0x1c9   :  { %v1324_v61 = vpack.c.bf16 %v887_v12, %v866_v8  ;;  %v1331_v25 = vpack.c.bf16 %v1277_v16, %v1274_v59  ;;  %v1238_v59 = vld [vmem:[#allocation3 + $0x10] sm:$0xff] }
 0x1cb   :  { %v821_v17 = vpop.permute.xlu0 %820  ;;  %v4268_v19 = vpop.permute.xlu1 %1192 }
 0x1cc   :  { %v824_v24 = vsel %vm822_vm15, %v819_v41, %v821_v17  ;;  %830 = vst.msk [vmem:[#allocation3 + $0xa0] sm:$0xff] %vm703_vm3, %v821_v17 }
 0x1cf   :  { %v842_v11 = vpop.permute.xlu0 %841  ;;  %v989_v27 = vpop.permute.xlu1 %988  ;;  %v1265_v36 = vld [vmem:[#allocation3 + $0xe8] sm:$0xff] }
 0x1d0   :  { %v845_v26 = vsel %vm843_vm1, %v840_v45, %v842_v11  ;;  %851 = vst.msk [vmem:[#allocation3 + $0xb8] sm:$0xff] %vm703_vm3, %v842_v11  ;;  %v992_v30 = vsel %vm990_vm7, %v4149_v18, %v989_v27  ;;  %998 = vst.msk [vmem:[#allocation3 + $0x160] sm:$0xff] %vm703_vm3, %v989_v27  ;;  %vm1146_vm7 = vcmask 580608   ;;  %vm1053_vm1 = vcmask 687104  }
 0x1d1   :  { %v1333_v14 = vpack.c.bf16 %v1013_v49, %v992_v30  ;;  %v1283_v49 = vld [vmem:[#allocation3 + $0x178] sm:$0xff]  ;;  %v1321_v4 = vpack.c.bf16 %v845_v26, %v824_v24 }
 0x1d3   :  { %v779_v31 = vpop.permute.xlu0 %778  ;;  %v1191_v35 = vpop.permute.xlu1 %1190  ;;  %1383 = vmatprep.subr.bf16.mxu0 %v1333_v14 }
 0x1d4   :  { %v782_v40 = vsel %vm780_vm2, %v777_v48, %v779_v31  ;;  %788 = vst.msk [vmem:[#allocation3 + $0x70] sm:$0xff] %vm703_vm3, %v779_v31  ;;  %v4281_v41 = vsel %vm1198_vm11, %v1191_v35, %v4268_v19  ;;  %1384 = vmatpush1.bf16.msra.mxu0 %v1332_v22  ;;  %vm5064_vm2 = vmmov %vm5062_vm13 }
 0x1d5   :  { %1385 = vmatprep.subr.bf16.mxu0 %v1330_v38 }
 0x1d7   :  { %v800_v18 = vpop.permute.xlu0 %799  ;;  %v1139_v45 = vpop.permute.xlu1 %1138  ;;  %v1280_v47 = vld [vmem:[#allocation3 + $0x160] sm:$0xff]  ;;  %v1259_v43 = vld [vmem:[#allocation3 + $0xb8] sm:$0xff] }
 0x1d8   :  { %v803_v55 = vsel %vm801_vm4, %v798_v53, %v800_v18  ;;  %809 = vst.msk [vmem:[#allocation3 + $0x88] sm:$0xff] %vm703_vm3, %v800_v18  ;;  %v4290_v48 = vsel %vm1146_vm7, %v1139_v45, %v4172_v28  ;;  %v1334_v57 = vpack.c.bf16 %v1283_v49, %v1280_v47  ;;  %1386 = vmatpush1.bf16.msra.mxu0 %v1329_v54  ;;  %v1271_v54 = vld [vmem:[#allocation3 + $0x118] sm:$0xff] }
 0x1d9   :  { %1387 = vmatprep.subr.bf16.mxu0 %v1327_v52  ;;  %v1318_v24 = vpack.c.bf16 %v803_v55, %v782_v40 }
 0x1da   :  { %1427 = vmatpush1.bf16.msra.mxu1 %v1334_v57 }
 0x1db   :  { %v737_v22 = vpop.permute.xlu0 %736  ;;  %v1090_v53 = vpop.permute.xlu1 %1089  ;;  %1428 = vmatprep.subr.bf16.mxu1 %v3664_v1  ;;  %v1250_v18 = vld [vmem:[#allocation3 + $0x70] sm:$0xff] }
 0x1dc   :  { %v740_v63 = vsel %vm738_vm0, %v4223_v58, %v737_v22  ;;  %746 = vst.msk [vmem:[#allocation3 + $0x40] sm:$0xff] %vm703_vm3, %v737_v22  ;;  %v4303_v21 = vsel %vm1095_vm12, %v1090_v53, %v4191_v37  ;;  %1388 = vmatpush1.bf16.msra.mxu0 %v1326_v20  ;;  %v1268_v58 = vld [vmem:[#allocation3 + $0x100] sm:$0xff]  ;;  %vm1032_vm0 = vcmask 695296  }
 0x1dd   :  { %1389 = vmatprep.subr.bf16.mxu0 %v1324_v61  ;;  %v1328_v10 = vpack.c.bf16 %v1271_v54, %v1268_v58 }
 0x1de   :  { %1429 = vmatpush1.bf16.msra.mxu1 %v1331_v25  ;;  %v1344_v25 = vpack.c.bf16 %v4281_v41, %v4266_v15  ;;  %v1341_v15 = vpack.c.bf16 %v4290_v48, %v4179_v32  ;;  %v1338_v32 = vpack.c.bf16 %v4303_v21, %v4199_v42 }
 0x1df   :  { %v758_v33 = vpop.permute.xlu0 %757  ;;  %v4307_v2 = vpop.permute.xlu1 %1116  ;;  %1430 = vmatprep.subr.bf16.mxu1 %v3664_v1  ;;  %v1253_v38 = vld [vmem:[#allocation3 + $0x88] sm:$0xff] }
 0x1e0   :  { %v761_v6 = vsel %vm759_vm5, %v4232_v62, %v758_v33  ;;  %767 = vst.msk [vmem:[#allocation3 + $0x58] sm:$0xff] %vm703_vm3, %v758_v33  ;;  %v4316_v8 = vsel %vm1120_vm6, %v4162_v23, %v4307_v2  ;;  %1390 = vmatpush1.bf16.msra.mxu0 %v1323_v29  ;;  %v1262_v62 = vld [vmem:[#allocation3 + $0xd0] sm:$0xff]  ;;  %v1319_v47 = vpack.c.bf16 %v1253_v38, %v1250_v18  ;;  %vm2919_vm5 = vcmask 982016  }
 0x1e1   :  { %1391 = vmatprep.subr.bf16.mxu0 %v1321_v4  ;;  %v1325_v27 = vpack.c.bf16 %v1265_v36, %v1262_v62  ;;  %v1315_v14 = vpack.c.bf16 %v761_v6, %v740_v63 }
 0x1e2   :  { %1431 = vmatpush1.bf16.msra.mxu1 %v1328_v10 }
 0x1e3   :  { %v716_v12 = vpop.permute.xlu0 %715  ;;  %v4320_v17 = vpop.permute.xlu1 %1142  ;;  %1432 = vmatprep.subr.bf16.mxu1 %v3664_v1 }
 0x1e4   :  { %v719_v11 = vsel %vm717_vm8, %v4241_v3, %v716_v12  ;;  %725 = vst.msk [vmem:[#allocation3 + $0x28] sm:$0xff] %vm703_vm3, %v716_v12  ;;  %v4329_v23 = vsel %vm1146_vm7, %v4172_v28, %v4320_v17  ;;  %1392 = vmatpush1.bf16.msra.mxu0 %v1320_v39  ;;  %v1256_v3 = vld [vmem:[#allocation3 + $0xa0] sm:$0xff] }
 0x1e5   :  { %1393 = vmatprep.subr.bf16.mxu0 %v1318_v24  ;;  %v1322_v35 = vpack.c.bf16 %v1259_v43, %v1256_v3  ;;  %v1342_v33 = vpack.c.bf16 %v4329_v23, %v4316_v8 }
 0x1e6   :  { %1433 = vmatpush1.bf16.msra.mxu1 %v1325_v27 }
 0x1e7   :  { %v1221_v26 = vpop.permute.xlu0 %1220  ;;  %v1073_v30 = vpop.permute.xlu1 %1072  ;;  %1434 = vmatprep.subr.bf16.mxu1 %v3664_v1  ;;  %v1247_v49 = vld [vmem:[#allocation3 + $0x58] sm:$0xff] }
 0x1e8   :  { %v1226_v31 = vsel %vm1224_vm9, %v4250_v7, %v1221_v26  ;;  %v4338_v28 = vsel %vm1074_vm14, %v4185_v34, %v1073_v30  ;;  %1082 = vst.msk [vmem:[#allocation3 + $0x1c0] sm:$0xff] %vm703_vm3, %v1073_v30  ;;  %1394 = vmatpush1.bf16.msra.mxu0 %v1317_v46  ;;  %v1312_v7 = vpack.c.bf16 %v719_v11, %v3973_v51  ;;  %v1244_v51 = vld [vmem:[#allocation3 + $0x40] sm:$0xff]  ;;  %vm5063_vm14 = vmmov %vm5062_vm13 }
 0x1e9   :  { %1395 = vmatprep.subr.bf16.mxu0 %v1315_v14  ;;  %v1316_v20 = vpack.c.bf16 %v1247_v49, %v1244_v51 }
 0x1ea   :  { %1435 = vmatpush1.bf16.msra.mxu1 %v1322_v35 }
 0x1eb   :  { %v1169_v56 = vpop.permute.xlu0 %1168  ;;  %v1094_v40 = vpop.permute.xlu1 %1093  ;;  %1436 = vmatprep.subr.bf16.mxu1 %v3664_v1  ;;  %v1241_v5 = vld [vmem:[#allocation3 + $0x28] sm:$0xff] }
 0x1ec   :  { %v1174_v34 = vsel %vm1172_vm10, %v4259_v13, %v1169_v56  ;;  %v1097_v45 = vsel %vm1095_vm12, %v4191_v37, %v1094_v40  ;;  %1103 = vst.msk [vmem:[#allocation3 + $0x1d8] sm:$0xff] %vm703_vm3, %v1094_v40  ;;  %1396 = vmatpush1.bf16.msra.mxu0 %v1314_v50  ;;  %v1348_v13 = vpack.c.bf16 %v1226_v31, %v1226_v31  ;;  %vm3140_vm12 = vcmask 9216  }
 0x1ed   :  { %1397 = vmatprep.subr.bf16.mxu0 %v1312_v7  ;;  %v1347_v37 = vpack.c.bf16 %v4257_v9, %v4257_v9  ;;  %v1313_v63 = vpack.c.bf16 %v1241_v5, %v1238_v59  ;;  %v1339_v10 = vpack.c.bf16 %v1097_v45, %v4338_v28 }
 0x1ee   :  { %1437 = vmatpush1.bf16.msra.mxu1 %v1319_v47 }
 0x1ef   :  { %v1195_v52 = vpop.permute.xlu0 %1194  ;;  %v1031_v55 = vpop.permute.xlu1 %1030  ;;  %1438 = vmatprep.subr.bf16.mxu1 %v3664_v1  ;;  %v1375_v9 = vsel %vm5063_vm14, %v1347_v37, 0  ;;  %v1292_v31 = vld [vmem:[#allocation3 + $0x1c0] sm:$0xff] }
 0x1f0   :  { %v1200_v57 = vsel %vm1198_vm11, %v4268_v19, %v1195_v52  ;;  %v1034_v16 = vsel %vm1032_vm0, %v4205_v44, %v1031_v55  ;;  %1040 = vst.msk [vmem:[#allocation3 + $0x190] sm:$0xff] %vm703_vm3, %v1031_v55  ;;  %1398 = vmatpush1.bf16.msra.mxu0 %v1311_v0 }
 0x1f1   :  { %3212 = vmatprep.subr.msk.bf16.mxu0 %vm5062_vm13, %v1348_v13  ;;  %v1345_v61 = vpack.c.bf16 %v1200_v57, %v1174_v34 }
 0x1f2   :  { %1439 = vmatpush1.bf16.msra.mxu1 %v1316_v20 }
 0x1f3   :  { %v1050_v22 = vpop.permute.xlu0 %1049  ;;  %v1223_v53 = vpop.permute.xlu1 %1222  ;;  %1440 = vmatprep.subr.bf16.mxu1 %v3664_v1  ;;  %v1295_v14 = vld [vmem:[#allocation3 + $0x1d8] sm:$0xff] }
 0x1f4   :  { %v1227_v19 = vsel %vm1224_vm9, %v1221_v26, %v1223_v53  ;;  %1406 = vmatpush2.bf16.msra.mxu0 %v1375_v9  ;;  %v1340_v28 = vpack.c.bf16 %v1295_v14, %v1292_v31  ;;  %vm5066_vm9 = vmmov %vm5064_vm2 }
 0x1f5   :  { %1233 = vst.msk [vmem:[#allocation3 + $0x250] sm:$0xff] %vm703_vm3, %v1227_v19  ;;  %1407 = vmatprep.subr.bf16.mxu0 %v1345_v61 }
 0x1f6   :  { %1441 = vmatpush1.bf16.msra.mxu1 %v1313_v63 }
 0x1f7   :  { %v1171_v54 = vpop.permute.xlu0 %1170  ;;  %v1052_v29 = vpop.permute.xlu1 %1051  ;;  %1448 = vmatprep.subr.bf16.mxu1 %v3664_v1  ;;  %v1286_v38 = vld [vmem:[#allocation3 + $0x190] sm:$0xff] }
 0x1f8   :  { %v1175_v58 = vsel %vm1172_vm10, %v1169_v56, %v1171_v54  ;;  %v1055_v4 = vsel %vm1053_vm1, %v1050_v22, %v1052_v29  ;;  %1061 = vst.msk [vmem:[#allocation3 + $0x1a8] sm:$0xff] %vm703_vm3, %v1052_v29  ;;  %1408 = vmatpush2.bf16.msra.mxu0 %v1344_v25  ;;  %vm3726_vm10 = vmmov 0  }
 0x1f9   :  { %1181 = vst.msk [vmem:[#allocation3 + $0x220] sm:$0xff] %vm703_vm3, %v1175_v58  ;;  %1409 = vmatprep.subr.bf16.mxu0 %v1342_v33  ;;  %v1336_v11 = vpack.c.bf16 %v1055_v4, %v1034_v16 }
 0x1fb   :  { %v1119_v41 = vpop.permute.xlu0 %1118  ;;  %v1197_v6 = vpop.permute.xlu1 %1196 }
 0x1fc   :  { %v1123_v8 = vsel %vm1120_vm6, %v4307_v2, %v1119_v41  ;;  %v1201_v36 = vsel %vm1198_vm11, %v1195_v52, %v1197_v6  ;;  %v1310_v39 = vld [vmem:[#allocation3 + $0x250] sm:$0xff]  ;;  %1410 = vmatpush2.bf16.msra.mxu0 %v1341_v15  ;;  %vm1596_vm6 = vcmask 7168   ;;  %vm3093_vm11 = vcmask 1041408  }
 0x1fd   :  { %1129 = vst.msk [vmem:[#allocation3 + $0x1f0] sm:$0xff] %vm703_vm3, %v1123_v8  ;;  %1207 = vst.msk [vmem:[#allocation3 + $0x238] sm:$0xff] %vm703_vm3, %v1201_v36  ;;  %v1349_v12 = vpack.c.bf16 %v1310_v39, %v1310_v39  ;;  %1411 = vmatprep.subr.bf16.mxu0 %v1339_v10 }
 0x1ff   :  { %v1027_v48 = vpop.permute.xlu0 %1026  ;;  %v1145_v62 = vpop.permute.xlu1 %1144  ;;  %v1381_v24 = vsel %vm5064_vm2, %v1349_v12, 0  ;;  %v1289_v35 = vld [vmem:[#allocation3 + $0x1a8] sm:$0xff] }
 0x200   :  { %v1033_v2 = vsel %vm1032_vm0, %v1027_v48, %v4205_v44  ;;  %v1149_v23 = vsel %vm1146_vm7, %v4320_v17, %v1145_v62  ;;  %1449 = vmatpush2.bf16.msra.mxu1 %v1381_v24  ;;  %1412 = vmatpush2.bf16.msra.mxu0 %v1338_v32  ;;  %v1304_v21 = vld [vmem:[#allocation3 + $0x220] sm:$0xff]  ;;  %v1337_v50 = vpack.c.bf16 %v1289_v35, %v1286_v38  ;;  %vm3138_vm7 = vcmask 15360  }
 0x201   :  { %1155 = vst.msk [vmem:[#allocation3 + $0x208] sm:$0xff] %vm703_vm3, %v1149_v23  ;;  %1450 = vmatprep.subr.bf16.mxu1 %v3664_v1  ;;  %1413 = vmatprep.subr.bf16.mxu0 %v1336_v11  ;;  %v3514_v44 = vld [vmem:[%s5052_s3] ss:$8 sps:$4 sm:$0xff]   ;;  %vm1589_vm3 = vcmask 498688   ;;  %s3690_s3 = smov 105  }
 0x203   :  { %v1048_v27 = vpop.permute.xlu1 %1047 }
 0x204   :  { %v1054_v42 = vsel %vm1053_vm1, %v1048_v27, %v1050_v22  ;;  %v1307_v43 = vld [vmem:[#allocation3 + $0x238] sm:$0xff]  ;;  %v1298_v17 = vld [vmem:[#allocation3 + $0x1f0] sm:$0xff] }
 0x205   :  { %v1346_v46 = vpack.c.bf16 %v1307_v43, %v1304_v21  ;;  %v1335_v26 = vpack.c.bf16 %v1054_v42, %v1033_v2 }
 0x207   :  { %1451 = vmatpush2.bf16.msra.mxu1 %v1346_v46  ;;  %1414 = vmatpush2.bf16.msra.mxu0 %v1335_v26 }
 0x208   :  { %1452 = vmatprep.subr.bf16.mxu1 %v3664_v1  ;;  %v1301_v30 = vld [vmem:[#allocation3 + $0x208] sm:$0xff] }
 0x209   :  { %v1343_v3 = vpack.c.bf16 %v1301_v30, %v1298_v17 }
 0x20a   :  { %1416 = vmatmul.mubr.bf16.vlgmr.msra.gmra.mxu0 %v3514_v44 }
 0x20b   :  { %1453 = vmatpush2.bf16.msra.mxu1 %v1343_v3 }
 0x20c   :  { %1454 = vmatprep.subr.bf16.mxu1 %v3664_v1  ;;  %v1355_v40 = vpop.permute.xlu0 %1354 }
 0x20f   :  { %1455 = vmatpush2.bf16.msra.mxu1 %v1340_v28 }
 0x210   :  { %1456 = vmatprep.subr.bf16.mxu1 %v3664_v1  ;;  %v1360_v0 = vpop.permute.xlu1 %1359 }
 0x213   :  { %1457 = vmatpush2.bf16.msra.mxu1 %v1337_v50 }
 0x214   :  { %2650 = vmatprep.subr.bf16.mxu1 %v3664_v1 }
 0x216   :  { %1459 = vmatmul.mubr.bf16.vlgmr.msra.gmra.mxu1 %v3514_v44 }
 0x2ca   :  { %v1417_v56 = vpop.f32.mrf.mxu0 }
 0x2cb   :  { %v1418_v55 = vadd.f32 %v1417_v56, %v1355_v40 }
 0x2cc   :  { %v1419_v18 = vpop.f32.mrf.mxu0 }
 0x2cd   :  { %v1420_v7 = vadd.f32 %v1419_v18, %v1355_v40  ;;  %v1467_v16 = vmul.f32 0.5, %v1418_v55 }
 0x2ce   :  { %v1421_v5 = vpop.f32.mrf.mxu0 }
 0x2cf   :  { %v1468_v34 = vmul.f32 0.5, %v1420_v7  ;;  %v1422_v59 = vadd.f32 %v1421_v5, %v1360_v0 }
 0x2d0   :  { %v1423_v53 = vpop.f32.mrf.mxu0 }
 0x2d1   :  { %3600 = vtanh.f32 %v1468_v34  ;;  %v1424_v9 = vadd.f32 %v1423_v53, %v1360_v0  ;;  %v1470_v63 = vmul.f32 0.5, %v1422_v59 }
 0x2d3   :  { %v1471_v54 = vmul.f32 0.5, %v1424_v9 }
 0x2d6   :  { %v1460_v45 = vpop.f32.mrf.mxu1 }
 0x2d7   :  { %v1461_v47 = vadd.f32 %v1460_v45, %v1355_v40 }
 0x2d8   :  { %v1462_v49 = vpop.f32.mrf.mxu1 }
 0x2d9   :  { %v1469_v60 = vmul.f32 0.5, %v1461_v47 }
 0x2da   :  { %v1463_v52 = vpop.f32.mrf.mxu1 }
 0x2db   :  { %3602 = vtanh.f32 %v1469_v60  ;;  %v1464_v51 = vadd.f32 %v1463_v52, %v1360_v0 }
 0x2dc   :  { %v1465_v13 = vpop.f32.mrf.mxu1 }
 0x2dd   :  { %v1472_v37 = vmul.f32 0.5, %v1464_v51 }
 0x2de   :  { %v3601_v57 = vpop.eup %3600 }
 0x2df   :  { %v1480_v20 = vmul.f32 0.5, %v3601_v57  ;;  %3604 = vtanh.f32 %v1472_v37 }
 0x2e0   :  { %3606 = vtanh.f32 %v1467_v16 }
 0x2e1   :  { %v1486_v22 = vadd.f32 0.5, %v1480_v20  ;;  %3608 = vtanh.f32 %v1470_v63 }
 0x2e2   :  { %3610 = vtanh.f32 %v1471_v54 }
 0x2e3   :  { %1499 = vrot.lane.b32.xlu1 %v1486_v22, %s3681_s18 }
 0x2e8   :  { %v3603_v61 = vpop.eup %3602 }
 0x2e9   :  { %v1481_v19 = vmul.f32 0.5, %v3603_v61 }
 0x2eb   :  { %v1487_v25 = vadd.f32 0.5, %v1481_v19 }
 0x2ec   :  { %v3605_v29 = vpop.eup %3604 }
 0x2ed   :  { %v1484_v33 = vmul.f32 0.5, %v3605_v29  ;;  %1501 = vrot.lane.b32.xlu0 %v1487_v25, %s3681_s18  ;;  %v3607_v4 = vpop.eup %3606 }
 0x2ee   :  { %v1479_v15 = vmul.f32 0.5, %v3607_v4  ;;  %v3609_v6 = vpop.eup %3608 }
 0x2ef   :  { %v1490_v58 = vadd.f32 0.5, %v1484_v33  ;;  %v3611_v10 = vpop.eup %3610  ;;  %v1482_v8 = vmul.f32 0.5, %v3609_v6 }
 0x2f0   :  { %v1485_v41 = vadd.f32 0.5, %v1479_v15  ;;  %v1483_v36 = vmul.f32 0.5, %v3611_v10 }
 0x2f1   :  { %1529 = vrot.lane.b32.xlu0 %v1487_v25, %s3676_s14  ;;  %1507 = vrot.lane.b32.xlu1 %v1490_v58, %s3681_s18  ;;  %v1488_v39 = vadd.f32 0.5, %v1482_v8 }
 0x2f2   :  { %v1489_v12 = vadd.f32 0.5, %v1483_v36 }
 0x2f5   :  { %1557 = vrot.lane.b32.xlu0 %v1487_v25, %s3675_s13  ;;  %1527 = vrot.lane.b32.xlu1 %v1486_v22, %s3676_s14 }
 0x2f9   :  { %1535 = vrot.lane.b32.xlu1 %v1490_v58, %s3676_s14  ;;  %1497 = vrot.lane.b32.xlu0 %v1485_v41, %s3681_s18 }
 0x2fd   :  { %1555 = vrot.lane.b32.xlu1 %v1486_v22, %s3675_s13  ;;  %1525 = vrot.lane.b32.xlu0 %v1485_v41, %s3676_s14 }
 0x301   :  { %1563 = vrot.lane.b32.xlu1 %v1490_v58, %s3675_s13  ;;  %1553 = vrot.lane.b32.xlu0 %v1485_v41, %s3675_s13 }
 0x305   :  { %1505 = vrot.lane.b32.xlu1 %v1489_v12, %s3681_s18  ;;  %1503 = vrot.lane.b32.xlu0 %v1488_v39, %s3681_s18 }
 0x309   :  { %1533 = vrot.lane.b32.xlu1 %v1489_v12, %s3676_s14  ;;  %1531 = vrot.lane.b32.xlu0 %v1488_v39, %s3676_s14  ;;  %s3692_s14 = smov 75  }
 0x30d   :  { %1561 = vrot.lane.b32.xlu1 %v1489_v12, %s3675_s13  ;;  %1559 = vrot.lane.b32.xlu0 %v1488_v39, %s3675_s13  ;;  %s3691_s13 = smov 73  }
 0x355   :  { %v1500_v32 = vpop.permute.xlu1 %1499 }
 0x35f   :  { %v1502_v48 = vpop.permute.xlu0 %1501 }
 0x360   :  { %v1521_v11 = vadd.f32 %v1502_v48, %v1487_v25  ;;  %v1510_v21 = vsel %vm717_vm8, %v1500_v32, %v1502_v48 }
 0x361   :  { %v1520_v17 = vadd.f32 %v1510_v21, %v1486_v22 }
 0x363   :  { %v1530_v62 = vpop.permute.xlu0 %1529  ;;  %v1508_v24 = vpop.permute.xlu1 %1507 }
 0x364   :  { %v1549_v2 = vadd.f32 %v1530_v62, %v1521_v11  ;;  %v1524_v28 = vadd.f32 %v1508_v24, %v1490_v58 }
 0x367   :  { %v1558_v23 = vpop.permute.xlu0 %1557  ;;  %v1528_v27 = vpop.permute.xlu1 %1527 }
 0x368   :  { %v1577_v42 = vadd.f32 %v1558_v23, %v1549_v2  ;;  %v1538_v44 = vsel %vm801_vm4, %v1528_v27, %v1530_v62 }
 0x369   :  { %v1548_v3 = vadd.f32 %v1538_v44, %v1520_v17 }
 0x36a   :  { %v1583_v43 = vmul.f32 0.25, %v1577_v42 }
 0x36b   :  { %v1536_v46 = vpop.permute.xlu1 %1535  ;;  %v1498_v26 = vpop.permute.xlu0 %1497 }
 0x36c   :  { %1590 = vst.msk [vmem:[#allocation4 + $0x10] sm:$0xff] %vm1589_vm3, %v1583_v43  ;;  %v1509_v30 = vsel %vm717_vm8, %v1498_v26, %v1500_v32  ;;  %v1552_v40 = vadd.f32 %v1536_v46, %v1524_v28 }
 0x36d   :  { %v1519_v50 = vadd.f32 %v1509_v30, %v1485_v41 }
 0x36f   :  { %v1556_v14 = vpop.permute.xlu1 %1555  ;;  %v1526_v31 = vpop.permute.xlu0 %1525 }
 0x370   :  { %v1566_v35 = vsel %vm822_vm15, %v1556_v14, %v1558_v23  ;;  %v1537_v38 = vsel %vm801_vm4, %v1526_v31, %v1528_v27 }
 0x371   :  { %v1576_v56 = vadd.f32 %v1566_v35, %v1548_v3  ;;  %v1547_v7 = vadd.f32 %v1537_v38, %v1519_v50 }
 0x373   :  { %v4422_v18 = vmul.f32 0.25, %v1576_v56  ;;  %v1564_v34 = vpop.permute.xlu1 %1563  ;;  %v1554_v45 = vpop.permute.xlu0 %1553  ;;  %v4424_v47 = vld [vmem:[#allocation4 + $0x10] sm:$0xff] }
 0x374   :  { %v1580_v49 = vadd.f32 %v1564_v34, %v1552_v40  ;;  %v1565_v60 = vsel %vm822_vm15, %v1554_v45, %v1556_v14  ;;  %1964 = vrot.lane.b32.xlu0 %v4424_v47, %s3690_s3 }
 0x375   :  { %v1575_v0 = vadd.f32 %v1565_v60, %v1547_v7 }
 0x376   :  { %v1586_v52 = vmul.f32 0.25, %v1580_v49 }
 0x377   :  { %v4428_v55 = vmul.f32 0.25, %v1575_v0  ;;  %v1506_v51 = vpop.permute.xlu1 %1505  ;;  %v1504_v13 = vpop.permute.xlu0 %1503 }
 0x378   :  { %1593 = vst.msk [vmem:[#allocation4 + $0x28] sm:$0xff] %vm1589_vm3, %v1586_v52  ;;  %2156 = vrot.lane.b32.xlu0 %v4424_v47, %s3684_s21  ;;  %v1512_v37 = vsel %vm717_vm8, %v1506_v51, %v1508_v24  ;;  %v1511_v57 = vsel %vm717_vm8, %v1504_v13, %v1506_v51  ;;  %v3517_v51 = vld [vmem:[%s5055_s5 + $0x4] ss:$16 sps:$4 sm:$0xff]   ;;  %vm5065_vm8 = vmmov %vm5064_vm2 }
 0x379   :  { %1587 = vst [vmem:[#allocation4] sm:$0xff] %v4428_v55  ;;  %v1523_v53 = vadd.f32 %v1512_v37, %v1489_v12  ;;  %v1522_v59 = vadd.f32 %v1511_v57, %v1488_v39  ;;  %2586 = vmatprep.mubr.bf16.mxu0 %v3517_v51 }
 0x37b   :  { %v1534_v16 = vpop.permute.xlu1 %1533  ;;  %v1532_v20 = vpop.permute.xlu0 %1531 }
 0x37c   :  { %v1540_v5 = vsel %vm801_vm4, %v1534_v16, %v1536_v46  ;;  %v1539_v22 = vsel %vm801_vm4, %v1532_v20, %v1534_v16  ;;  %1940 = vrot.lane.b32.xlu0 %v4424_v47, %s3678_s16  ;;  %vm2529_vm4 = vcmask 130048  }
 0x37d   :  { %v1551_v9 = vadd.f32 %v1540_v5, %v1523_v53  ;;  %v1550_v61 = vadd.f32 %v1539_v22, %v1522_v59  ;;  %v2307_v5 = vld [vmem:[%s5054_s6 + $0x70] sm:$0xff] }
 0x37f   :  { %v1562_v19 = vpop.permute.xlu1 %1561  ;;  %v1560_v63 = vpop.permute.xlu0 %1559  ;;  %v4440_v25 = vld [vmem:[#allocation4 + $0x28] sm:$0xff] }
 0x380   :  { %v1568_v54 = vsel %vm822_vm15, %v1562_v19, %v1564_v34  ;;  %v1567_v29 = vsel %vm822_vm15, %v1560_v63, %v1562_v19  ;;  %1966 = vrot.lane.b32.xlu1 %v4440_v25, %s3690_s3  ;;  %2132 = vrot.lane.b32.xlu0 %v4424_v47, %s3691_s13  ;;  %v1594_v33 = vld [vmem:[#allocation4] sm:$0xff]  ;;  %s3707_s3 = smov 53   ;;  %vm1609_vm15 = vcmask 15368  }
 0x381   :  { %v1579_v58 = vadd.f32 %v1568_v54, %v1551_v9  ;;  %v1578_v4 = vadd.f32 %v1567_v29, %v1550_v61  ;;  %1597 = vst.msk [vmem:[#allocation5] sm:$0xff] %vm1596_vm6, %v1594_v33  ;;  %v2306_v9 = vld [vmem:[%s5054_s6 + $0x68] sm:$0xff]  ;;  %v2304_v29 = vld [vmem:[%s5054_s6 + $0x58] sm:$0xff] }
 0x383   :  { %v4447_v15 = vmul.f32 0.25, %v1579_v58  ;;  %v4449_v41 = vmul.f32 0.25, %v1578_v4  ;;  %v3521_v58 = vld [vmem:[%s5055_s5 + $0xc] ss:$16 sps:$4 sm:$0xff]  }
 0x384   :  { %2158 = vrot.lane.b32.xlu1 %v4440_v25, %s3684_s21  ;;  %1916 = vrot.lane.b32.xlu0 %v4424_v47, %s3681_s18  ;;  %s3694_s21 = smov 77  }
 0x385   :  { %1591 = vst [vmem:[#allocation4 + $0x18] sm:$0xff] %v4449_v41  ;;  %3247 = vmatprep.mubr.msk.bf16.mxu1 %vm2529_vm4, %v3521_v58  ;;  %v2827_v58 = vld [vmem:[%s5056_s8 + $0x10] sm:$0xff] }
 0x388   :  { %1942 = vrot.lane.b32.xlu1 %v4440_v25, %s3678_s16  ;;  %2108 = vrot.lane.b32.xlu0 %v4424_v47, %s3692_s14  ;;  %s3695_s16 = smov 101  }
 0x38c   :  { %2134 = vrot.lane.b32.xlu1 %v4440_v25, %s3691_s13  ;;  %1892 = vrot.lane.b32.xlu0 %v4424_v47, %s3693_s12  ;;  %v1595_v6 = vld [vmem:[#allocation4 + $0x18] sm:$0xff]  ;;  %s3708_s13 = smov 16  }
 0x38d   :  { %1598 = vst.msk [vmem:[#allocation5 + $0x8] sm:$0xff] %vm1596_vm6, %v1595_v6  ;;  %v2302_v6 = vld [vmem:[%s5054_s6 + $0x48] sm:$0xff] }
 0x390   :  { %1918 = vrot.lane.b32.xlu1 %v4440_v25, %s3681_s18  ;;  %2084 = vrot.lane.b32.xlu0 %v4424_v47, %s3694_s21  ;;  %s3696_s18 = smov 103  }
 0x394   :  { %2110 = vrot.lane.b32.xlu1 %v4440_v25, %s3692_s14  ;;  %2060 = vrot.lane.b32.xlu0 %v4424_v47, %s3668_s26  ;;  %s3710_s14 = smov 3  }
 0x398   :  { %1894 = vrot.lane.b32.xlu1 %v4440_v25, %s3693_s12  ;;  %2036 = vrot.lane.b32.xlu0 %v4424_v47, %s3670_s28  ;;  %s3712_s12 = smov 36  }
 0x39c   :  { %2086 = vrot.lane.b32.xlu1 %v4440_v25, %s3694_s21  ;;  %2012 = vrot.lane.b32.xlu0 %v4424_v47, %s3695_s16  ;;  %s3714_s21 = smov 57  }
 0x3a0   :  { %2062 = vrot.lane.b32.xlu1 %v4440_v25, %s3668_s26  ;;  %1988 = vrot.lane.b32.xlu0 %v4424_v47, %s3696_s18  ;;  %s3699_s26 = smov 10  }
 0x3a4   :  { %2038 = vrot.lane.b32.xlu1 %v4440_v25, %s3670_s28  ;;  %1952 = vrot.lane.b32.xlu0 %v4428_v55, %s3697_s22  ;;  %s3701_s28 = smov 31  }
 0x3a8   :  { %2014 = vrot.lane.b32.xlu1 %v4440_v25, %s3695_s16  ;;  %1760 = vrot.lane.b32.xlu0 %v4428_v55, %s3667_s25  ;;  %s3715_s16 = smov 38  }
 0x3ac   :  { %1990 = vrot.lane.b32.xlu1 %v4440_v25, %s3696_s18  ;;  %1772 = vrot.lane.b32.xlu0 %v4422_v18, %s3698_s23  ;;  %s3716_s18 = smov 92  }
 0x3b0   :  { %2144 = vrot.lane.b32.xlu0 %v4428_v55, %s3699_s26  ;;  %1954 = vrot.lane.b32.xlu1 %v4449_v41, %s3697_s22  ;;  %s3719_s22 = smov 40  }
 0x3b4   :  { %1928 = vrot.lane.b32.xlu0 %v4428_v55, %s3700_s24  ;;  %1762 = vrot.lane.b32.xlu1 %v4449_v41, %s3667_s25  ;;  %s3704_s25 = smov 33  }
 0x3b8   :  { %1736 = vrot.lane.b32.xlu0 %v4428_v55, %s3669_s27  ;;  %1774 = vrot.lane.b32.xlu1 %v4447_v15, %s3698_s23  ;;  %s3720_s23 = smov 94  }
 0x3bc   :  { %1748 = vrot.lane.b32.xlu0 %v4422_v18, %s3701_s28  ;;  %2146 = vrot.lane.b32.xlu1 %v4449_v41, %s3699_s26  ;;  %s3722_s26 = smov 61  }
 0x3c0   :  { %2120 = vrot.lane.b32.xlu0 %v4428_v55, %s3702_s30  ;;  %1930 = vrot.lane.b32.xlu1 %v4449_v41, %s3700_s24  ;;  %s3723_s24 = smov 42  }
 0x3c4   :  { %1904 = vrot.lane.b32.xlu0 %v4428_v55, %s3703_s4  ;;  %1738 = vrot.lane.b32.xlu1 %v4449_v41, %s3669_s27  ;;  %s3706_s27 = smov 120  }
 0x3c8   :  { %1712 = vrot.lane.b32.xlu0 %v4428_v55, %s3671_s29  ;;  %1750 = vrot.lane.b32.xlu1 %v4447_v15, %s3701_s28  ;;  %s3724_s28 = smov 8  }
 0x3cc   :  { %1724 = vrot.lane.b32.xlu0 %v4422_v18, %s3704_s25  ;;  %2122 = vrot.lane.b32.xlu1 %v4449_v41, %s3702_s30 }
 0x3d0   :  { %2096 = vrot.lane.b32.xlu0 %v4428_v55, %s3705_s1  ;;  %1906 = vrot.lane.b32.xlu1 %v4449_v41, %s3703_s4 }
 0x3d4   :  { %1880 = vrot.lane.b32.xlu0 %v4428_v55, %s3680_s17  ;;  %1714 = vrot.lane.b32.xlu1 %v4449_v41, %s3671_s29  ;;  %s3709_s29 = smov 122  }
 0x3d8   :  { %1688 = vrot.lane.b32.xlu0 %v4428_v55, %s3706_s27  ;;  %1726 = vrot.lane.b32.xlu1 %v4447_v15, %s3704_s25 }
 0x3dc   :  { %1700 = vrot.lane.b32.xlu0 %v4422_v18, %s3707_s3  ;;  %2098 = vrot.lane.b32.xlu1 %v4449_v41, %s3705_s1 }
 0x3e0   :  { %2072 = vrot.lane.b32.xlu0 %v4428_v55, %s3708_s13  ;;  %1882 = vrot.lane.b32.xlu1 %v4449_v41, %s3680_s17  ;;  %s3711_s17 = smov 55  }
 0x3e4   :  { %1856 = vrot.lane.b32.xlu0 %v4428_v55, %s3682_s19  ;;  %1690 = vrot.lane.b32.xlu1 %v4449_v41, %s3706_s27 }
 0x3e6   :  { %v1965_v10 = vpop.permute.xlu0 %1964 }
 0x3e8   :  { %1664 = vrot.lane.b32.xlu0 %v4428_v55, %s3709_s29  ;;  %1702 = vrot.lane.b32.xlu1 %v4447_v15, %s3707_s3 }
 0x3ea   :  { %v4522_v8 = vpop.permute.xlu0 %2156 }
 0x3ec   :  { %1868 = vrot.lane.b32.xlu0 %v4422_v18, %s3710_s14  ;;  %2074 = vrot.lane.b32.xlu1 %v4449_v41, %s3708_s13 }
 0x3ee   :  { %v4526_v36 = vpop.permute.xlu0 %1940 }
 0x3f0   :  { %1676 = vrot.lane.b32.xlu0 %v4422_v18, %s3711_s17  ;;  %1858 = vrot.lane.b32.xlu1 %v4449_v41, %s3682_s19  ;;  %s3713_s19 = smov 5  }
 0x3f2   :  { %v4531_v39 = vpop.permute.xlu1 %1966  ;;  %v4533_v12 = vpop.permute.xlu0 %2132 }
 0x3f4   :  { %2048 = vrot.lane.b32.xlu0 %v4428_v55, %s3712_s12  ;;  %1666 = vrot.lane.b32.xlu1 %v4449_v41, %s3709_s29 }
 0x3f6   :  { %v4537_v32 = vpop.permute.xlu1 %2158  ;;  %v4539_v48 = vpop.permute.xlu0 %1916 }
 0x3f8   :  { %1832 = vrot.lane.b32.xlu0 %v4428_v55, %s3683_s20  ;;  %1870 = vrot.lane.b32.xlu1 %v4447_v15, %s3710_s14 }
 0x3fa   :  { %v4544_v62 = vpop.permute.xlu1 %1942  ;;  %v4546_v24 = vpop.permute.xlu0 %2108 }
 0x3fc   :  { %1640 = vrot.lane.b32.xlu0 %v4428_v55, %s3677_s15  ;;  %1678 = vrot.lane.b32.xlu1 %v4447_v15, %s3711_s17 }
 0x3fe   :  { %v4551_v11 = vpop.permute.xlu1 %2134  ;;  %v4553_v2 = vpop.permute.xlu0 %1892 }
 0x400   :  { %1844 = vrot.lane.b32.xlu0 %v4422_v18, %s3713_s19  ;;  %2050 = vrot.lane.b32.xlu1 %v4449_v41, %s3712_s12 }
 0x402   :  { %v4557_v23 = vpop.permute.xlu1 %1918  ;;  %v4559_v27 = vpop.permute.xlu0 %2084 }
 0x404   :  { %1652 = vrot.lane.b32.xlu0 %v4422_v18, %s3714_s21  ;;  %1834 = vrot.lane.b32.xlu1 %v4449_v41, %s3683_s20  ;;  %s3718_s20 = smov 59  }
 0x406   :  { %v4564_v42 = vpop.permute.xlu1 %2110  ;;  %v4566_v21 = vpop.permute.xlu0 %2060 }
 0x408   :  { %2024 = vrot.lane.b32.xlu0 %v4428_v55, %s3715_s16  ;;  %1642 = vrot.lane.b32.xlu1 %v4449_v41, %s3677_s15  ;;  %s3717_s15 = smov 25  }
 0x40a   :  { %v4571_v43 = vpop.permute.xlu1 %1894  ;;  %v4573_v46 = vpop.permute.xlu0 %2036 }
 0x40c   :  { %1808 = vrot.lane.b32.xlu0 %v4428_v55, %s3716_s18  ;;  %1846 = vrot.lane.b32.xlu1 %v4447_v15, %s3713_s19 }
 0x40e   :  { %v4577_v26 = vpop.permute.xlu1 %2086  ;;  %v4579_v44 = vpop.permute.xlu0 %2012 }
 0x410   :  { %1616 = vrot.lane.b32.xlu0 %v4428_v55, %s3679_s2  ;;  %1654 = vrot.lane.b32.xlu1 %v4447_v15, %s3714_s21 }
 0x412   :  { %v4584_v17 = vpop.permute.xlu1 %2062  ;;  %v4586_v30 = vpop.permute.xlu0 %1988 }
 0x414   :  { %1820 = vrot.lane.b32.xlu0 %v4422_v18, %s3717_s15  ;;  %2026 = vrot.lane.b32.xlu1 %v4449_v41, %s3715_s16 }
 0x416   :  { %v4590_v3 = vpop.permute.xlu1 %2038  ;;  %v1953_v14 = vpop.permute.xlu0 %1952 }
 0x417   :  { %1958 = vst.msk [vmem:[#allocation5 + $0xf0] sm:$0xff] %vm1596_vm6, %v1953_v14  ;;  %v2301_v14 = vld [vmem:[%s5054_s6 + $0x40] sm:$0xff] }
 0x418   :  { %1970 = vst.msk [vmem:[#allocation5 + $0xf0] sm:$0xff] %vm1609_vm15, %v1965_v10  ;;  %1628 = vrot.lane.b32.xlu0 %v4422_v18, %s3718_s20  ;;  %1810 = vrot.lane.b32.xlu1 %v4449_v41, %s3716_s18 }
 0x41a   :  { %v4596_v31 = vpop.permute.xlu1 %2014  ;;  %v1761_v28 = vpop.permute.xlu0 %1760 }
 0x41b   :  { %1766 = vst.msk [vmem:[#allocation5 + $0x70] sm:$0xff] %vm1596_vm6, %v1761_v28  ;;  %v2298_v28 = vld [vmem:[%s5054_s6 + $0x28] sm:$0xff] }
 0x41c   :  { %2000 = vrot.lane.b32.xlu0 %v4428_v55, %s3719_s22  ;;  %1618 = vrot.lane.b32.xlu1 %v4449_v41, %s3679_s2  ;;  %s3721_s2 = smov 27  }
 0x41e   :  { %v4602_v35 = vpop.permute.xlu1 %1990  ;;  %v1773_v38 = vpop.permute.xlu0 %1772 }
 0x41f   :  { %1778 = vst.msk [vmem:[#allocation5 + $0x70] sm:$0xff] %vm1609_vm15, %v1773_v38  ;;  %v2248_v49 = vld [vmem:[#allocation5 + $0xf0] sm:$0xff] }
 0x420   :  { %1784 = vrot.lane.b32.xlu0 %v4428_v55, %s3720_s23  ;;  %1822 = vrot.lane.b32.xlu1 %v4447_v15, %s3717_s15 }
 0x422   :  { %v1955_v50 = vpop.permute.xlu1 %1954  ;;  %v2145_v56 = vpop.permute.xlu0 %2144 }
 0x423   :  { %1959 = vst.msk [vmem:[#allocation5 + $0xf8] sm:$0xff] %vm1596_vm6, %v1955_v50  ;;  %2150 = vst.msk [vmem:[#allocation5 + $0x170] sm:$0xff] %vm1596_vm6, %v2145_v56 }
 0x424   :  { %1971 = vst.msk [vmem:[#allocation5 + $0xf8] sm:$0xff] %vm1609_vm15, %v4531_v39  ;;  %2162 = vst.msk [vmem:[#allocation5 + $0x170] sm:$0xff] %vm1609_vm15, %v4522_v8  ;;  %1796 = vrot.lane.b32.xlu0 %v4422_v18, %s3721_s2  ;;  %1630 = vrot.lane.b32.xlu1 %v4447_v15, %s3718_s20 }
 0x426   :  { %v1763_v40 = vpop.permute.xlu1 %1762  ;;  %v1929_v7 = vpop.permute.xlu0 %1928  ;;  %v2232_v57 = vld [vmem:[#allocation5 + $0x70] sm:$0xff] }
 0x427   :  { %1767 = vst.msk [vmem:[#allocation5 + $0x78] sm:$0xff] %vm1596_vm6, %v1763_v40  ;;  %1934 = vst.msk [vmem:[#allocation5 + $0xe0] sm:$0xff] %vm1596_vm6, %v1929_v7  ;;  %v2299_v7 = vld [vmem:[%s5054_s6 + $0x30] sm:$0xff] }
 0x428   :  { %1946 = vst.msk [vmem:[#allocation5 + $0xe0] sm:$0xff] %vm1609_vm15, %v4526_v36  ;;  %1603 = vrot.lane.b32.xlu0 %v4422_v18, %s3722_s26  ;;  %2002 = vrot.lane.b32.xlu1 %v4449_v41, %s3719_s22 }
 0x42a   :  { %v1775_v34 = vpop.permute.xlu1 %1774  ;;  %v1737_v45 = vpop.permute.xlu0 %1736 }
 0x42b   :  { %1779 = vst.msk [vmem:[#allocation5 + $0x78] sm:$0xff] %vm1609_vm15, %v1775_v34  ;;  %v2249_v60 = vld [vmem:[#allocation5 + $0xf8] sm:$0xff]  ;;  %v2264_v53 = vld [vmem:[#allocation5 + $0x170] sm:$0xff] }
 0x42c   :  { %1742 = vst.msk [vmem:[#allocation5 + $0x60] sm:$0xff] %vm1596_vm6, %v1737_v45  ;;  %1976 = vrot.lane.b32.xlu0 %v4428_v55, %s3723_s24  ;;  %1786 = vrot.lane.b32.xlu1 %v4449_v41, %s3720_s23  ;;  %v2283_v0 = vpack.c.bf16 %v2249_v60, %v2248_v49  ;;  %v2296_v34 = vld [vmem:[%s5054_s6 + $0x18] sm:$0xff]  ;;  %v2297_v60 = vld [vmem:[%s5054_s6 + $0x20] sm:$0xff] }
 0x42e   :  { %v2147_v52 = vpop.permute.xlu1 %2146  ;;  %3269 = vmatprep.subr.bf16.mxu0 %v2283_v0  ;;  %v1749_v18 = vpop.permute.xlu0 %1748  ;;  %v2294_v0 = vld [vmem:[%s5054_s6 + $0x8] sm:$0xff] }
 0x42f   :  { %2151 = vst.msk [vmem:[#allocation5 + $0x178] sm:$0xff] %vm1596_vm6, %v2147_v52  ;;  %v2246_v63 = vld [vmem:[#allocation5 + $0xe0] sm:$0xff] }
 0x430   :  { %1754 = vst.msk [vmem:[#allocation5 + $0x60] sm:$0xff] %vm1609_vm15, %v1749_v18  ;;  %2163 = vst.msk [vmem:[#allocation5 + $0x178] sm:$0xff] %vm1609_vm15, %v4537_v32  ;;  %2168 = vrot.lane.b32.xlu0 %v4428_v55, %s3724_s28  ;;  %1798 = vrot.lane.b32.xlu1 %v4447_v15, %s3721_s2  ;;  %v2300_v32 = vld [vmem:[%s5054_s6 + $0x38] sm:$0xff] }
 0x432   :  { %v1931_v13 = vpop.permute.xlu1 %1930  ;;  %v2121_v37 = vpop.permute.xlu0 %2120  ;;  %v2233_v16 = vld [vmem:[#allocation5 + $0x78] sm:$0xff] }
 0x433   :  { %1935 = vst.msk [vmem:[#allocation5 + $0xe8] sm:$0xff] %vm1596_vm6, %v1931_v13  ;;  %2126 = vst.msk [vmem:[#allocation5 + $0x160] sm:$0xff] %vm1596_vm6, %v2121_v37  ;;  %v2275_v20 = vpack.c.bf16 %v2233_v16, %v2232_v57  ;;  %v2833_v57 = vld [vmem:[%s5056_s8 + $0x40] sm:$0xff] }
 0x434   :  { %1947 = vst.msk [vmem:[#allocation5 + $0xe8] sm:$0xff] %vm1609_vm15, %v4544_v62  ;;  %2138 = vst.msk [vmem:[#allocation5 + $0x160] sm:$0xff] %vm1609_vm15, %v4533_v12  ;;  %1605 = vrot.lane.b32.xlu1 %v4447_v15, %s3722_s26  ;;  %2180 = vrot.lane.b32.xlu0 %v4424_v47, %s3688_s0 }
 0x435   :  { %3270 = vmatpush3.bf16.msra.mxu0 %v2275_v20 }
 0x436   :  { %v1739_v55 = vpop.permute.xlu1 %1738  ;;  %v1905_v22 = vpop.permute.xlu0 %1904 }
 0x437   :  { %1743 = vst.msk [vmem:[#allocation5 + $0x68] sm:$0xff] %vm1596_vm6, %v1739_v55  ;;  %1910 = vst.msk [vmem:[#allocation5 + $0xd0] sm:$0xff] %vm1596_vm6, %v1905_v22  ;;  %v2265_v59 = vld [vmem:[#allocation5 + $0x178] sm:$0xff]  ;;  %v2230_v36 = vld [vmem:[#allocation5 + $0x60] sm:$0xff] }
 0x438   :  { %1922 = vst.msk [vmem:[#allocation5 + $0xd0] sm:$0xff] %vm1609_vm15, %v4539_v48  ;;  %1978 = vrot.lane.b32.xlu1 %v4449_v41, %s3723_s24  ;;  %2380 = vperm.xlu0 %3462, %v2307_v5   ;;  %v2291_v47 = vpack.c.bf16 %v2265_v59, %v2264_v53  ;;  %v2293_v55 = vld [vmem:[%s5054_s6] sm:$0xff]  ;;  %v2831_v22 = vld [vmem:[%s5056_s8 + $0x30] sm:$0xff] }
 0x43a   :  { %v1751_v61 = vpop.permute.xlu1 %1750  ;;  %2651 = vmatpush1.bf16.msra.mxu1 %v2291_v47  ;;  %v1713_v19 = vpop.permute.xlu0 %1712 }
 0x43b   :  { %1755 = vst.msk [vmem:[#allocation5 + $0x68] sm:$0xff] %vm1609_vm15, %v1751_v61  ;;  %v2247_v54 = vld [vmem:[#allocation5 + $0xe8] sm:$0xff]  ;;  %2652 = vmatprep.subr.bf16.mxu1 %v3664_v1 }
 0x43c   :  { %1718 = vst.msk [vmem:[#allocation5 + $0x50] sm:$0xff] %vm1596_vm6, %v1713_v19  ;;  %2170 = vrot.lane.b32.xlu1 %v4449_v41, %s3724_s28  ;;  %2375 = vperm.xlu0 %3462, %v2306_v9   ;;  %v2282_v33 = vpack.c.bf16 %v2247_v54, %v2246_v63  ;;  %v2305_v41 = vld [vmem:[%s5054_s6 + $0x60] sm:$0xff]  ;;  %v2835_v19 = vld [vmem:[%s5056_s8 + $0x50] sm:$0xf] }
 0x43d   :  { %v2829_v63 = vld [vmem:[%s5056_s8 + $0x20] sm:$0xff] }
 0x43e   :  { %v2123_v4 = vpop.permute.xlu1 %2122  ;;  %3271 = vmatprep.subr.bf16.mxu0 %v2282_v33  ;;  %v1725_v15 = vpop.permute.xlu0 %1724  ;;  %v2834_v33 = vld [vmem:[%s5056_s8 + $0x48] sm:$0xff] }
 0x43f   :  { %2127 = vst.msk [vmem:[#allocation5 + $0x168] sm:$0xff] %vm1596_vm6, %v2123_v4  ;;  %v2244_v56 = vld [vmem:[#allocation5 + $0xd0] sm:$0xff] }
 0x440   :  { %1730 = vst.msk [vmem:[#allocation5 + $0x50] sm:$0xff] %vm1609_vm15, %v1725_v15  ;;  %2139 = vst.msk [vmem:[#allocation5 + $0x168] sm:$0xff] %vm1609_vm15, %v4551_v11  ;;  %2182 = vrot.lane.b32.xlu1 %v4440_v25, %s3688_s0  ;;  %2365 = vperm.xlu0 %3462, %v2304_v29   ;;  %v2303_v25 = vld [vmem:[%s5054_s6 + $0x50] sm:$0xff]  ;;  %v2262_v11 = vld [vmem:[#allocation5 + $0x160] sm:$0xff] }
 0x442   :  { %v1907_v10 = vpop.permute.xlu1 %1906  ;;  %v2097_v8 = vpop.permute.xlu0 %2096  ;;  %v2231_v39 = vld [vmem:[#allocation5 + $0x68] sm:$0xff] }
 0x443   :  { %1911 = vst.msk [vmem:[#allocation5 + $0xd8] sm:$0xff] %vm1596_vm6, %v1907_v10  ;;  %2102 = vst.msk [vmem:[#allocation5 + $0x150] sm:$0xff] %vm1596_vm6, %v2097_v8  ;;  %v2274_v12 = vpack.c.bf16 %v2231_v39, %v2230_v36  ;;  %v2825_v8 = vld [vmem:[%s5056_s8] sm:$0xff] }
 0x444   :  { %1923 = vst.msk [vmem:[#allocation5 + $0xd8] sm:$0xff] %vm1609_vm15, %v4557_v23  ;;  %2114 = vst.msk [vmem:[#allocation5 + $0x150] sm:$0xff] %vm1609_vm15, %v4546_v24  ;;  %2370 = vperm.xlu1 %3463, %v2305_v41   ;;  %2355 = vperm.xlu0 %3462, %v2302_v6  }
 0x445   :  { %3272 = vmatpush3.bf16.msra.mxu0 %v2274_v12 }
 0x446   :  { %v1715_v48 = vpop.permute.xlu1 %1714  ;;  %v1881_v62 = vpop.permute.xlu0 %1880 }
 0x447   :  { %1719 = vst.msk [vmem:[#allocation5 + $0x58] sm:$0xff] %vm1596_vm6, %v1715_v48  ;;  %1886 = vst.msk [vmem:[#allocation5 + $0xc0] sm:$0xff] %vm1596_vm6, %v1881_v62  ;;  %v2263_v23 = vld [vmem:[#allocation5 + $0x168] sm:$0xff]  ;;  %v2228_v51 = vld [vmem:[#allocation5 + $0x50] sm:$0xff] }
 0x448   :  { %1898 = vst.msk [vmem:[#allocation5 + $0xc0] sm:$0xff] %vm1609_vm15, %v4553_v2  ;;  %2360 = vperm.xlu1 %3463, %v2303_v25   ;;  %2345 = vperm.xlu0 %3462, %v2300_v32   ;;  %v2290_v24 = vpack.c.bf16 %v2263_v23, %v2262_v11  ;;  %v2830_v48 = vld [vmem:[%s5056_s8 + $0x28] sm:$0xff]  ;;  %v3073_v62 = vld [vmem:[%s5057_s10] sm:$0xff] }
 0x44a   :  { %v1727_v38 = vpop.permute.xlu1 %1726  ;;  %2653 = vmatpush1.bf16.msra.mxu1 %v2290_v24  ;;  %v1689_v50 = vpop.permute.xlu0 %1688 }
 0x44b   :  { %1731 = vst.msk [vmem:[#allocation5 + $0x58] sm:$0xff] %vm1609_vm15, %v1727_v38  ;;  %v2245_v2 = vld [vmem:[#allocation5 + $0xd8] sm:$0xff]  ;;  %2654 = vmatprep.subr.bf16.mxu1 %v3664_v1 }
 0x44c   :  { %1694 = vst.msk [vmem:[#allocation5 + $0x40] sm:$0xff] %vm1596_vm6, %v1689_v50  ;;  %2350 = vperm.xlu1 %3463, %v2301_v14   ;;  %2335 = vperm.xlu0 %3462, %v2298_v28   ;;  %v2281_v40 = vpack.c.bf16 %v2245_v2, %v2244_v56  ;;  %v2826_v28 = vld [vmem:[%s5056_s8 + $0x8] sm:$0xff] }
 0x44e   :  { %v2099_v45 = vpop.permute.xlu1 %2098  ;;  %3273 = vmatprep.subr.bf16.mxu0 %v2281_v40  ;;  %v1701_v49 = vpop.permute.xlu0 %1700 }
 0x44f   :  { %2103 = vst.msk [vmem:[#allocation5 + $0x158] sm:$0xff] %vm1596_vm6, %v2099_v45  ;;  %v2242_v9 = vld [vmem:[#allocation5 + $0xc0] sm:$0xff] }
 0x450   :  { %1706 = vst.msk [vmem:[#allocation5 + $0x40] sm:$0xff] %vm1609_vm15, %v1701_v49  ;;  %2115 = vst.msk [vmem:[#allocation5 + $0x158] sm:$0xff] %vm1609_vm15, %v4564_v42  ;;  %2340 = vperm.xlu1 %3463, %v2299_v7   ;;  %2325 = vperm.xlu0 %3462, %v2296_v34   ;;  %v2295_v42 = vld [vmem:[%s5054_s6 + $0x10] sm:$0xff]  ;;  %v3074_v7 = vld [vmem:[%s5057_s10 + $0x8] sm:$0x3] }
 0x452   :  { %v1883_v52 = vpop.permute.xlu1 %1882  ;;  %v2073_v18 = vpop.permute.xlu0 %2072  ;;  %v2229_v13 = vld [vmem:[#allocation5 + $0x58] sm:$0xff] }
 0x453   :  { %1887 = vst.msk [vmem:[#allocation5 + $0xc8] sm:$0xff] %vm1596_vm6, %v1883_v52  ;;  %2078 = vst.msk [vmem:[#allocation5 + $0x140] sm:$0xff] %vm1596_vm6, %v2073_v18  ;;  %v2273_v37 = vpack.c.bf16 %v2229_v13, %v2228_v51 }
 0x454   :  { %1899 = vst.msk [vmem:[#allocation5 + $0xc8] sm:$0xff] %vm1609_vm15, %v4571_v43  ;;  %2090 = vst.msk [vmem:[#allocation5 + $0x140] sm:$0xff] %vm1609_vm15, %v4559_v27  ;;  %2330 = vperm.xlu1 %3463, %v2297_v60   ;;  %2315 = vperm.xlu0 %3462, %v2294_v0   ;;  %v2260_v43 = vld [vmem:[#allocation5 + $0x150] sm:$0xff] }
 0x455   :  { %3274 = vmatpush3.bf16.msra.mxu0 %v2273_v37 }
 0x456   :  { %v1691_v16 = vpop.permute.xlu1 %1690  ;;  %v1857_v20 = vpop.permute.xlu0 %1856 }
 0x457   :  { %1695 = vst.msk [vmem:[#allocation5 + $0x48] sm:$0xff] %vm1596_vm6, %v1691_v16  ;;  %1862 = vst.msk [vmem:[#allocation5 + $0xb0] sm:$0xff] %vm1596_vm6, %v1857_v20  ;;  %v2261_v5 = vld [vmem:[#allocation5 + $0x158] sm:$0xff]  ;;  %v2226_v41 = vld [vmem:[#allocation5 + $0x40] sm:$0xff] }
 0x458   :  { %2320 = vperm.xlu1 %3463, %v2295_v42   ;;  %2878 = vperm.xlu0 %3462, %v2833_v57   ;;  %v2289_v27 = vpack.c.bf16 %v2261_v5, %v2260_v43 }
 0x45a   :  { %v1703_v53 = vpop.permute.xlu1 %1702  ;;  %2655 = vmatpush1.bf16.msra.mxu1 %v2289_v27  ;;  %v1665_v59 = vpop.permute.xlu0 %1664 }
 0x45b   :  { %1707 = vst.msk [vmem:[#allocation5 + $0x48] sm:$0xff] %vm1609_vm15, %v1703_v53  ;;  %v2243_v47 = vld [vmem:[#allocation5 + $0xc8] sm:$0xff]  ;;  %2656 = vmatprep.subr.bf16.mxu1 %v3664_v1  ;;  %v2258_v12 = vld [vmem:[#allocation5 + $0x140] sm:$0xff] }
 0x45c   :  { %1670 = vst.msk [vmem:[#allocation5 + $0x30] sm:$0xff] %vm1596_vm6, %v1665_v59  ;;  %2310 = vperm.xlu1 %3463, %v2293_v55   ;;  %2868 = vperm.xlu0 %3462, %v2831_v22   ;;  %v2280_v61 = vpack.c.bf16 %v2243_v47, %v2242_v9 }
 0x45e   :  { %v2075_v54 = vpop.permute.xlu1 %2074  ;;  %3275 = vmatprep.subr.bf16.mxu0 %v2280_v61  ;;  %v1869_v29 = vpop.permute.xlu0 %1868 }
 0x45f   :  { %2079 = vst.msk [vmem:[#allocation5 + $0x148] sm:$0xff] %vm1596_vm6, %v2075_v54 }
 0x460   :  { %1874 = vst.msk [vmem:[#allocation5 + $0xb0] sm:$0xff] %vm1609_vm15, %v1869_v29  ;;  %2091 = vst.msk [vmem:[#allocation5 + $0x148] sm:$0xff] %vm1609_vm15, %v4577_v26  ;;  %2888 = vperm.xlu1 %3463, %v2835_v19   ;;  %2858 = vperm.xlu0 %3462, %v2829_v63   ;;  %v2832_v26 = vld [vmem:[%s5056_s8 + $0x38] sm:$0xff] }
 0x462   :  { %v1859_v4 = vpop.permute.xlu1 %1858  ;;  %v1677_v15 = vpop.permute.xlu0 %1676  ;;  %v2227_v6 = vld [vmem:[#allocation5 + $0x48] sm:$0xff] }
 0x463   :  { %1863 = vst.msk [vmem:[#allocation5 + $0xb8] sm:$0xff] %vm1596_vm6, %v1859_v4  ;;  %v2272_v10 = vpack.c.bf16 %v2227_v6, %v2226_v41 }
 0x464   :  { %1682 = vst.msk [vmem:[#allocation5 + $0x30] sm:$0xff] %vm1609_vm15, %v1677_v15  ;;  %2883 = vperm.xlu1 %3463, %v2834_v33   ;;  %2848 = vperm.xlu0 %3462, %v2827_v58  }
 0x465   :  { %3276 = vmatpush3.bf16.msra.mxu0 %v2272_v10 }
 0x466   :  { %v1667_v36 = vpop.permute.xlu1 %1666  ;;  %v2049_v39 = vpop.permute.xlu0 %2048 }
 0x467   :  { %1671 = vst.msk [vmem:[#allocation5 + $0x38] sm:$0xff] %vm1596_vm6, %v1667_v36  ;;  %2054 = vst.msk [vmem:[#allocation5 + $0x130] sm:$0xff] %vm1596_vm6, %v2049_v39  ;;  %v2259_v25 = vld [vmem:[#allocation5 + $0x148] sm:$0xff]  ;;  %v2240_v56 = vld [vmem:[#allocation5 + $0xb0] sm:$0xff] }
 0x468   :  { %2066 = vst.msk [vmem:[#allocation5 + $0x130] sm:$0xff] %vm1609_vm15, %v4566_v21  ;;  %2873 = vperm.xlu1 %3463, %v2832_v26   ;;  %2838 = vperm.xlu0 %3462, %v2825_v8   ;;  %v2288_v32 = vpack.c.bf16 %v2259_v25, %v2258_v12  ;;  %v2828_v21 = vld [vmem:[%s5056_s8 + $0x18] sm:$0xff] }
 0x46a   :  { %v1871_v11 = vpop.permute.xlu1 %1870  ;;  %2657 = vmatpush1.bf16.msra.mxu1 %v2288_v32  ;;  %v1833_v23 = vpop.permute.xlu0 %1832 }
 0x46b   :  { %1875 = vst.msk [vmem:[#allocation5 + $0xb8] sm:$0xff] %vm1609_vm15, %v1871_v11  ;;  %2658 = vmatprep.subr.bf16.mxu1 %v3664_v1  ;;  %v2224_v49 = vld [vmem:[#allocation5 + $0x30] sm:$0xff] }
 0x46c   :  { %1838 = vst.msk [vmem:[#allocation5 + $0xa0] sm:$0xff] %vm1596_vm6, %v1833_v23  ;;  %2863 = vperm.xlu1 %3463, %v2830_v48   ;;  %3077 = vperm.xlu0 %3462, %v3073_v62  }
 0x46e   :  { %v1679_v24 = vpop.permute.xlu1 %1678  ;;  %v1641_v14 = vpop.permute.xlu0 %1640 }
 0x46f   :  { %1683 = vst.msk [vmem:[#allocation5 + $0x38] sm:$0xff] %vm1609_vm15, %v1679_v24 }
 0x470   :  { %1646 = vst.msk [vmem:[#allocation5 + $0x20] sm:$0xff] %vm1596_vm6, %v1641_v14  ;;  %2853 = vperm.xlu1 %3463, %v2828_v21  }
 0x472   :  { %v2051_v38 = vpop.permute.xlu1 %2050  ;;  %v1845_v50 = vpop.permute.xlu0 %1844  ;;  %v2241_v2 = vld [vmem:[#allocation5 + $0xb8] sm:$0xff] }
 0x473   :  { %2055 = vst.msk [vmem:[#allocation5 + $0x138] sm:$0xff] %vm1596_vm6, %v2051_v38  ;;  %v2279_v40 = vpack.c.bf16 %v2241_v2, %v2240_v56  ;;  %v3515_v56 = vld [vmem:[%s5055_s5] ss:$16 sps:$4 sm:$0xff]   ;;  %v3518_v2 = vld [vmem:[%s5055_s5 + $0x24] ss:$16 sps:$4 sm:$0xff]  }
 0x474   :  { %1850 = vst.msk [vmem:[#allocation5 + $0xa0] sm:$0xff] %vm1609_vm15, %v1845_v50  ;;  %2067 = vst.msk [vmem:[#allocation5 + $0x138] sm:$0xff] %vm1609_vm15, %v4584_v17  ;;  %2843 = vperm.xlu1 %3463, %v2826_v28   ;;  %v2256_v17 = vld [vmem:[#allocation5 + $0x130] sm:$0xff] }
 0x475   :  { %3277 = vmatprep.subr.bf16.mxu0 %v2279_v40 }
 0x476   :  { %v1835_v34 = vpop.permute.xlu1 %1834  ;;  %v1653_v45 = vpop.permute.xlu0 %1652  ;;  %v2225_v60 = vld [vmem:[#allocation5 + $0x38] sm:$0xff] }
 0x477   :  { %1839 = vst.msk [vmem:[#allocation5 + $0xa8] sm:$0xff] %vm1596_vm6, %v1835_v34  ;;  %v2271_v0 = vpack.c.bf16 %v2225_v60, %v2224_v49  ;;  %v3524_v49 = vld [vmem:[%s5055_s5 + $0x44] ss:$16 sps:$4 sm:$0xff]  }
 0x478   :  { %1658 = vst.msk [vmem:[#allocation5 + $0x20] sm:$0xff] %vm1609_vm15, %v1653_v45  ;;  %3082 = vperm.xlu1 %3463, %v3074_v7   ;;  %v3520_v45 = vld [vmem:[%s5055_s5 + $0x20] ss:$16 sps:$4 sm:$0xff]  }
 0x479   :  { %3278 = vmatpush3.bf16.msra.mxu0 %v2271_v0 }
 0x47a   :  { %v1643_v52 = vpop.permute.xlu1 %1642  ;;  %v2025_v18 = vpop.permute.xlu0 %2024 }
 0x47b   :  { %1647 = vst.msk [vmem:[#allocation5 + $0x28] sm:$0xff] %vm1596_vm6, %v1643_v52  ;;  %2030 = vst.msk [vmem:[#allocation5 + $0x120] sm:$0xff] %vm1596_vm6, %v2025_v18  ;;  %v2257_v51 = vld [vmem:[#allocation5 + $0x138] sm:$0xff]  ;;  %v2238_v5 = vld [vmem:[#allocation5 + $0xa0] sm:$0xff] }
 0x47c   :  { %2042 = vst.msk [vmem:[#allocation5 + $0x120] sm:$0xff] %vm1609_vm15, %v4573_v46  ;;  %v2287_v13 = vpack.c.bf16 %v2257_v51, %v2256_v17  ;;  %v3523_v18 = vld [vmem:[%s5055_s5 + $0x8] ss:$16 sps:$4 sm:$0xff]   ;;  %v3526_v17 = vld [vmem:[%s5055_s5 + $0x40] ss:$16 sps:$4 sm:$0xff]  }
 0x47d   :  { %v3530_v51 = vld [vmem:[%s5055_s5 + $0x64] ss:$16 sps:$4 sm:$0xff]  }
 0x47e   :  { %v1847_v37 = vpop.permute.xlu1 %1846  ;;  %2659 = vmatpush1.bf16.msra.mxu1 %v2287_v13  ;;  %v1809_v42 = vpop.permute.xlu0 %1808  ;;  %v3529_v13 = vld [vmem:[%s5055_s5 + $0x28] ss:$16 sps:$4 sm:$0xff]  }
 0x47f   :  { %1851 = vst.msk [vmem:[#allocation5 + $0xa8] sm:$0xff] %vm1609_vm15, %v1847_v37  ;;  %2660 = vmatprep.subr.bf16.mxu1 %v3664_v1  ;;  %v2222_v53 = vld [vmem:[#allocation5 + $0x20] sm:$0xff] }
 0x480   :  { %1814 = vst.msk [vmem:[#allocation5 + $0x90] sm:$0xff] %vm1596_vm6, %v1809_v42  ;;  %v3533_v37 = vld [vmem:[%s5055_s5 + $0x4c] ss:$16 sps:$4 sm:$0xff]   ;;  %v3532_v42 = vld [vmem:[%s5055_s5 + $0x60] ss:$16 sps:$4 sm:$0xff]  }
 0x482   :  { %v1655_v57 = vpop.permute.xlu1 %1654  ;;  %v1617_v16 = vpop.permute.xlu0 %1616 }
 0x483   :  { %1659 = vst.msk [vmem:[#allocation5 + $0x28] sm:$0xff] %vm1609_vm15, %v1655_v57  ;;  %v2254_v19 = vld [vmem:[#allocation5 + $0x120] sm:$0xff]  ;;  %v3536_v57 = vld [vmem:[%s5055_s5 + $0x84] ss:$16 sps:$4 sm:$0xff]  }
 0x484   :  { %1622 = vst.msk [vmem:[#allocation5 + $0x10] sm:$0xff] %vm1596_vm6, %v1617_v16  ;;  %v3535_v16 = vld [vmem:[%s5055_s5 + $0x48] ss:$16 sps:$4 sm:$0xff]  }
 0x486   :  { %v2027_v20 = vpop.permute.xlu1 %2026  ;;  %v1821_v43 = vpop.permute.xlu0 %1820  ;;  %v2239_v46 = vld [vmem:[#allocation5 + $0xa8] sm:$0xff] }
 0x487   :  { %2031 = vst.msk [vmem:[#allocation5 + $0x128] sm:$0xff] %vm1596_vm6, %v2027_v20  ;;  %v2278_v27 = vpack.c.bf16 %v2239_v46, %v2238_v5  ;;  %v3539_v20 = vld [vmem:[%s5055_s5 + $0x6c] ss:$16 sps:$4 sm:$0xff]   ;;  %v3542_v5 = vld [vmem:[%s5055_s5 + $0xa4] ss:$16 sps:$4 sm:$0xff]  }
 0x488   :  { %1826 = vst.msk [vmem:[#allocation5 + $0x90] sm:$0xff] %vm1609_vm15, %v1821_v43  ;;  %2043 = vst.msk [vmem:[#allocation5 + $0x128] sm:$0xff] %vm1609_vm15, %v4590_v3  ;;  %v3538_v43 = vld [vmem:[%s5055_s5 + $0x80] ss:$16 sps:$4 sm:$0xff]   ;;  %v3541_v46 = vld [vmem:[%s5055_s5 + $0x68] ss:$16 sps:$4 sm:$0xff]  }
 0x489   :  { %3279 = vmatprep.subr.bf16.mxu0 %v2278_v27  ;;  %v3545_v27 = vld [vmem:[%s5055_s5 + $0x8c] ss:$16 sps:$4 sm:$0xff]  }
 0x48a   :  { %v1811_v55 = vpop.permute.xlu1 %1810  ;;  %v1629_v22 = vpop.permute.xlu0 %1628  ;;  %v2223_v59 = vld [vmem:[#allocation5 + $0x28] sm:$0xff] }
 0x48b   :  { %1815 = vst.msk [vmem:[#allocation5 + $0x98] sm:$0xff] %vm1596_vm6, %v1811_v55  ;;  %v2270_v9 = vpack.c.bf16 %v2223_v59, %v2222_v53  ;;  %v3544_v55 = vld [vmem:[%s5055_s5 + $0xa0] ss:$16 sps:$4 sm:$0xff]   ;;  %v3547_v53 = vld [vmem:[%s5055_s5 + $0x88] ss:$16 sps:$4 sm:$0xff]  }
 0x48c   :  { %1634 = vst.msk [vmem:[#allocation5 + $0x10] sm:$0xff] %vm1609_vm15, %v1629_v22  ;;  %v3548_v22 = vld [vmem:[%s5055_s5 + $0xc4] ss:$16 sps:$4 sm:$0xff]   ;;  %v3551_v59 = vld [vmem:[%s5055_s5 + $0xac] ss:$16 sps:$4 sm:$0xff]  }
 0x48d   :  { %3280 = vmatpush3.bf16.msra.mxu0 %v2270_v9  ;;  %v2216_v9 = vld [vmem:[%s5055_s5 + $0xe0] sm:$0xff] }
 0x48e   :  { %v1619_v47 = vpop.permute.xlu1 %1618  ;;  %v2001_v61 = vpop.permute.xlu0 %2000 }
 0x48f   :  { %1623 = vst.msk [vmem:[#allocation5 + $0x18] sm:$0xff] %vm1596_vm6, %v1619_v47  ;;  %2006 = vst.msk [vmem:[#allocation5 + $0x110] sm:$0xff] %vm1596_vm6, %v2001_v61  ;;  %v2255_v63 = vld [vmem:[#allocation5 + $0x128] sm:$0xff]  ;;  %v2236_v41 = vld [vmem:[#allocation5 + $0x90] sm:$0xff]  ;;  %v3244_v61 = vcombine.high %v2216_v9, %v2216_v9 }
 0x490   :  { %2018 = vst.msk [vmem:[#allocation5 + $0x110] sm:$0xff] %vm1609_vm15, %v4579_v44  ;;  %v2286_v3 = vpack.c.bf16 %v2255_v63, %v2254_v19  ;;  %v3550_v47 = vld [vmem:[%s5055_s5 + $0xc0] ss:$16 sps:$4 sm:$0xff]   ;;  %v3553_v19 = vld [vmem:[%s5055_s5 + $0xa8] ss:$16 sps:$4 sm:$0xff]  }
 0x491   :  { %v3556_v63 = vld [vmem:[%s5055_s5 + $0xcc] ss:$16 sps:$4 sm:$0xff]  }
 0x492   :  { %v1823_v54 = vpop.permute.xlu1 %1822  ;;  %2661 = vmatpush1.bf16.msra.mxu1 %v2286_v3  ;;  %v1785_v29 = vpop.permute.xlu0 %1784  ;;  %v3243_v3 = vcombine.low %v2216_v9, %v2216_v9 }
 0x493   :  { %1827 = vst.msk [vmem:[#allocation5 + $0x98] sm:$0xff] %vm1609_vm15, %v1823_v54  ;;  %2662 = vmatprep.subr.bf16.mxu1 %v3664_v1  ;;  %v2220_v8 = vld [vmem:[#allocation5 + $0x10] sm:$0xff]  ;;  %v2217_v54 = vld [vmem:[%s5055_s5 + $0xe8] sm:$0xff] }
 0x494   :  { %1790 = vst.msk [vmem:[#allocation5 + $0x80] sm:$0xff] %vm1596_vm6, %v1785_v29  ;;  %v3558_v29 = vld [vmem:[%s5055_s5 + $0xc8] ss:$16 sps:$4 sm:$0xff]  }
 0x496   :  { %v1631_v33 = vpop.permute.xlu1 %1630  ;;  %v1797_v58 = vpop.permute.xlu0 %1796 }
 0x497   :  { %1635 = vst.msk [vmem:[#allocation5 + $0x18] sm:$0xff] %vm1609_vm15, %v1631_v33  ;;  %1802 = vst.msk [vmem:[#allocation5 + $0x80] sm:$0xff] %vm1609_vm15, %v1797_v58  ;;  %v3246_v33 = vcombine.high %v2217_v54, %v2217_v54  ;;  %v3245_v58 = vcombine.low %v2217_v54, %v2217_v54 }
 0x49a   :  { %v2003_v4 = vpop.permute.xlu1 %2002  ;;  %v1604_v15 = vpop.permute.xlu0 %1603  ;;  %v2237_v44 = vld [vmem:[#allocation5 + $0x98] sm:$0xff] }
 0x49b   :  { %2007 = vst.msk [vmem:[#allocation5 + $0x118] sm:$0xff] %vm1596_vm6, %v2003_v4  ;;  %v2277_v6 = vpack.c.bf16 %v2237_v44, %v2236_v41 }
 0x49c   :  { %1610 = vst.msk [vmem:[#allocation5] sm:$0xff] %vm1609_vm15, %v1604_v15  ;;  %2019 = vst.msk [vmem:[#allocation5 + $0x118] sm:$0xff] %vm1609_vm15, %v4596_v31  ;;  %v2252_v31 = vld [vmem:[#allocation5 + $0x110] sm:$0xff] }
 0x49d   :  { %3281 = vmatprep.subr.bf16.mxu0 %v2277_v6 }
 0x49e   :  { %v1787_v10 = vpop.permute.xlu1 %1786  ;;  %v1977_v26 = vpop.permute.xlu0 %1976  ;;  %v2221_v36 = vld [vmem:[#allocation5 + $0x18] sm:$0xff]  ;;  %v2234_v23 = vld [vmem:[#allocation5 + $0x80] sm:$0xff] }
 0x49f   :  { %1791 = vst.msk [vmem:[#allocation5 + $0x88] sm:$0xff] %vm1596_vm6, %v1787_v10  ;;  %1982 = vst.msk [vmem:[#allocation5 + $0x100] sm:$0xff] %vm1596_vm6, %v1977_v26  ;;  %v2269_v39 = vpack.c.bf16 %v2221_v36, %v2220_v8  ;;  %v3561_v36 = vld [vmem:[%s5058_s7] sm:$0xff]  }
 0x4a0   :  { %1994 = vst.msk [vmem:[#allocation5 + $0x100] sm:$0xff] %vm1609_vm15, %v4586_v30 }
 0x4a1   :  { %3282 = vmatpush3.bf16.msra.mxu0 %v2269_v39 }
 0x4a2   :  { %v1799_v12 = vpop.permute.xlu1 %1798  ;;  %v2169_v25 = vpop.permute.xlu0 %2168 }
 0x4a3   :  { %1803 = vst.msk [vmem:[#allocation5 + $0x88] sm:$0xff] %vm1609_vm15, %v1799_v12  ;;  %v2253_v32 = vld [vmem:[#allocation5 + $0x118] sm:$0xff]  ;;  %v2218_v28 = vld [vmem:[#allocation5] sm:$0xff] }
 0x4a4   :  { %2174 = vst.msk [vmem:[#allocation5 + $0x180] sm:$0xff] %vm1596_vm6, %v2169_v25  ;;  %v2285_v48 = vpack.c.bf16 %v2253_v32, %v2252_v31 }
 0x4a6   :  { %v1606_v62 = vpop.permute.xlu1 %1605  ;;  %2663 = vmatpush1.bf16.msra.mxu1 %v2285_v48  ;;  %v2181_v11 = vpop.permute.xlu0 %2180 }
 0x4a7   :  { %1611 = vst.msk [vmem:[#allocation5 + $0x8] sm:$0xff] %vm1609_vm15, %v1606_v62  ;;  %2186 = vst.msk [vmem:[#allocation5 + $0x180] sm:$0xff] %vm1609_vm15, %v2181_v11  ;;  %2664 = vmatprep.subr.bf16.mxu1 %v3664_v1 }
 0x4aa   :  { %v1979_v30 = vpop.permute.xlu1 %1978  ;;  %v2235_v21 = vld [vmem:[#allocation5 + $0x88] sm:$0xff] }
 0x4ab   :  { %1983 = vst.msk [vmem:[#allocation5 + $0x108] sm:$0xff] %vm1596_vm6, %v1979_v30  ;;  %v2276_v24 = vpack.c.bf16 %v2235_v21, %v2234_v23 }
 0x4ac   :  { %1995 = vst.msk [vmem:[#allocation5 + $0x108] sm:$0xff] %vm1609_vm15, %v4602_v35  ;;  %v2250_v35 = vld [vmem:[#allocation5 + $0x100] sm:$0xff] }
 0x4ad   :  { %3283 = vmatprep.subr.bf16.mxu0 %v2276_v24 }
 0x4ae   :  { %v2171_v14 = vpop.permute.xlu1 %2170  ;;  %v2219_v38 = vld [vmem:[#allocation5 + $0x8] sm:$0xff]  ;;  %v2266_v60 = vld [vmem:[#allocation5 + $0x180] sm:$0xff] }
 0x4af   :  { %2175 = vst.msk [vmem:[#allocation5 + $0x188] sm:$0xff] %vm1596_vm6, %v2171_v14  ;;  %v2268_v50 = vpack.c.bf16 %v2219_v38, %v2218_v28 }
 0x4b1   :  { %3284 = vmatpush3.bf16.msra.mxu0 %v2268_v50 }
 0x4b2   :  { %v2183_v40 = vpop.permute.xlu1 %2182 }
 0x4b3   :  { %2187 = vst.msk [vmem:[#allocation5 + $0x188] sm:$0xff] %vm1609_vm15, %v2183_v40  ;;  %v2251_v7 = vld [vmem:[#allocation5 + $0x108] sm:$0xff]  ;;  %v4935_v4 = vpop.permute.xlu0 %2380 }
 0x4b4   :  { %2587 = vmatmul.mubr.bf16.vlgmr.msra.gmra.mxu0 %v3515_v56  ;;  %v2284_v34 = vpack.c.bf16 %v2251_v7, %v2250_v35 }
 0x4b5   :  { %2594 = vmatprep.mubr.bf16.mxu0 %v3518_v2 }
 0x4b6   :  { %2665 = vmatpush1.bf16.msra.mxu1 %v2284_v34 }
 0x4b7   :  { %2680 = vmatprep.subr.bf16.mxu1 %v3664_v1  ;;  %v3527_v1 = vld [vmem:[%s5055_s5 + $0x2c] ss:$16 sps:$4 sm:$0xff]   ;;  %v4939_v41 = vpop.permute.xlu0 %2375 }
 0x4ba   :  { %v2267_v0 = vld [vmem:[#allocation5 + $0x188] sm:$0xff] }
 0x4bb   :  { %v2292_v52 = vpack.c.bf16 %v2267_v0, %v2266_v60  ;;  %v4943_v6 = vpop.permute.xlu0 %2365 }
 0x4bc   :  { %2595 = vmatmul.mubr.bf16.gmra.mxu0 %v3520_v45 }
 0x4bd   :  { %2681 = vmatpush2.bf16.msra.mxu1 %v2292_v52  ;;  %2602 = vmatprep.mubr.bf16.mxu0 %v3524_v49 }
 0x4bf   :  { %v4937_v15 = vpop.permute.xlu1 %2370  ;;  %v4947_v26 = vpop.permute.xlu0 %2355 }
 0x4c0   :  { %2683 = vmatmul.mubr.bf16.vlgmr.msra.gmra.mxu1 %v3523_v18 }
 0x4c1   :  { %3248 = vmatprep.mubr.msk.bf16.mxu1 %vm2529_vm4, %v3527_v1 }
 0x4c3   :  { %v4941_v44 = vpop.permute.xlu1 %2360  ;;  %v4954_v39 = vpop.permute.xlu0 %2345 }
 0x4c4   :  { %2603 = vmatmul.mubr.bf16.gmra.mxu0 %v3526_v17 }
 0x4c5   :  { %2610 = vmatprep.mubr.bf16.mxu0 %v3530_v51 }
 0x4c7   :  { %v4945_v10 = vpop.permute.xlu1 %2350  ;;  %v4959_v31 = vpop.permute.xlu0 %2335 }
 0x4c8   :  { %2691 = vmatmul.mubr.bf16.gmra.mxu1 %v3529_v13 }
 0x4c9   :  { %3249 = vmatprep.mubr.msk.bf16.mxu1 %vm2529_vm4, %v3533_v37 }
 0x4cb   :  { %v4949_v8 = vpop.permute.xlu1 %2340  ;;  %v2326_v23 = vpop.permute.xlu0 %2325 }
 0x4cc   :  { %2611 = vmatmul.mubr.bf16.gmra.mxu0 %v3532_v42 }
 0x4cd   :  { %2618 = vmatprep.mubr.bf16.mxu0 %v3536_v57 }
 0x4cf   :  { %v4957_v12 = vpop.permute.xlu1 %2330  ;;  %v2316_v40 = vpop.permute.xlu0 %2315 }
 0x4d0   :  { %2699 = vmatmul.mubr.bf16.gmra.mxu1 %v3535_v16 }
 0x4d1   :  { %3250 = vmatprep.mubr.msk.bf16.mxu1 %vm2529_vm4, %v3539_v20 }
 0x4d3   :  { %v2321_v62 = vpop.permute.xlu1 %2320 }
 0x4d4   :  { %2619 = vmatmul.mubr.bf16.gmra.mxu0 %v3538_v43 }
 0x4d5   :  { %2626 = vmatprep.mubr.bf16.mxu0 %v3542_v5 }
 0x4d7   :  { %v2311_v14 = vpop.permute.xlu1 %2310 }
 0x4d8   :  { %2707 = vmatmul.mubr.bf16.gmra.mxu1 %v3541_v46 }
 0x4d9   :  { %3251 = vmatprep.mubr.msk.bf16.mxu1 %vm2529_vm4, %v3545_v27 }
 0x4dc   :  { %2627 = vmatmul.mubr.bf16.gmra.mxu0 %v3544_v55 }
 0x4dd   :  { %2634 = vmatprep.mubr.bf16.mxu0 %v3548_v22 }
 0x4e0   :  { %2715 = vmatmul.mubr.bf16.gmra.mxu1 %v3547_v53 }
 0x4e1   :  { %3252 = vmatprep.mubr.msk.bf16.mxu1 %vm2529_vm4, %v3551_v59 }
 0x4e4   :  { %2635 = vmatmul.mubr.bf16.gmra.mxu0 %v3550_v47 }
 0x4e5   :  { %2642 = vmatprep.mubr.bf16.mxu0 %v3244_v61 }
 0x4e8   :  { %2723 = vmatmul.mubr.bf16.gmra.mxu1 %v3553_v19 }
 0x4e9   :  { %3253 = vmatprep.mubr.msk.bf16.mxu1 %vm2529_vm4, %v3556_v63 }
 0x4ec   :  { %2643 = vmatmul.mubr.bf16.gmra.mxu0 %v3243_v3 }
 0x4ed   :  { %3370 = vmatprep.mubr.msk.bf16.mxu0 %vm2919_vm5, %v3561_v36 }
 0x4f0   :  { %2731 = vmatmul.mubr.bf16.gmra.mxu1 %v3558_v29 }
 0x4f1   :  { %3254 = vmatprep.mubr.msk.bf16.mxu1 %vm2529_vm4, %v3246_v33 }
 0x4f8   :  { %2739 = vmatmul.mubr.bf16.gmra.mxu1 %v3245_v58 }
 0x574   :  { %v3285_v25 = vpop.f32.mrf.mxu0 }
 0x576   :  { %v3286_v32 = vpop.f32.mrf.mxu0 }
 0x577   :  { %v3287_v48 = vadd.f32 %v3286_v32, %v3285_v25 }
 0x578   :  { %v3288_v11 = vpop.f32.mrf.mxu0 }
 0x579   :  { %v2589_v50 = vadd.f32 %v3287_v48, %v2311_v14 }
 0x57a   :  { %v3289_v30 = vpop.f32.mrf.mxu0 }
 0x57b   :  { %v3290_v21 = vadd.f32 %v3289_v30, %v3288_v11 }
 0x57c   :  { %v3291_v24 = vpop.f32.mrf.mxu0 }
 0x57d   :  { %v2592_v60 = vadd.f32 %v3290_v21, %v2316_v40 }
 0x57e   :  { %v3292_v28 = vpop.f32.mrf.mxu0 }
 0x57f   :  { %v3293_v38 = vadd.f32 %v3292_v28, %v3291_v24 }
 0x580   :  { %v3294_v56 = vpop.f32.mrf.mxu0  ;;  %v2684_v2 = vpop.f32.mrf.mxu1 }
 0x581   :  { %v2685_v35 = vadd.f32 %v2684_v2, %v2589_v50  ;;  %v2597_v37 = vadd.f32 %v3293_v38, %v2321_v62 }
 0x582   :  { %v3295_v7 = vpop.f32.mrf.mxu0  ;;  %v2686_v34 = vpop.f32.mrf.mxu1 }
 0x583   :  { %v2746_v45 = vmul.f32 0.5, %v2685_v35  ;;  %v3296_v49 = vadd.f32 %v3295_v7, %v3294_v56 }
 0x584   :  { %v3297_v0 = vpop.f32.mrf.mxu0  ;;  %v2687_v52 = vpop.f32.mrf.mxu1 }
 0x585   :  { %3612 = vtanh.f32 %v2746_v45  ;;  %v2688_v18 = vadd.f32 %v2687_v52, %v2592_v60  ;;  %v2600_v46 = vadd.f32 %v3296_v49, %v2326_v23 }
 0x586   :  { %v3298_v1 = vpop.f32.mrf.mxu0  ;;  %v2689_v17 = vpop.f32.mrf.mxu1 }
 0x587   :  { %v2747_v51 = vmul.f32 0.5, %v2688_v18  ;;  %v4961_v13 = vadd.f32 %v3298_v1, %v3297_v0 }
 0x588   :  { %v4963_v42 = vpop.f32.mrf.mxu0  ;;  %v2692_v57 = vpop.f32.mrf.mxu1 }
 0x589   :  { %3614 = vtanh.f32 %v2747_v51  ;;  %v2693_v16 = vadd.f32 %v2692_v57, %v2597_v37 }
 0x58a   :  { %v4965_v20 = vpop.f32.mrf.mxu0  ;;  %v2694_v43 = vpop.f32.mrf.mxu1 }
 0x58b   :  { %v2748_v5 = vmul.f32 0.5, %v2693_v16 }
 0x58c   :  { %v4967_v27 = vpop.f32.mrf.mxu0  ;;  %v2695_v55 = vpop.f32.mrf.mxu1 }
 0x58d   :  { %3616 = vtanh.f32 %v2748_v5  ;;  %v2696_v22 = vadd.f32 %v2695_v55, %v2600_v46 }
 0x58e   :  { %v4969_v53 = vpop.f32.mrf.mxu0  ;;  %v2697_v59 = vpop.f32.mrf.mxu1 }
 0x58f   :  { %v2749_v9 = vmul.f32 0.5, %v2696_v22 }
 0x590   :  { %v4971_v47 = vpop.f32.mrf.mxu0  ;;  %v4973_v61 = vpop.f32.mrf.mxu1 }
 0x591   :  { %3618 = vtanh.f32 %v2749_v9 }
 0x592   :  { %v3613_v19 = vpop.eup %3612  ;;  %v3307_v63 = vpop.f32.mrf.mxu0 }
 0x593   :  { %v2702_v3 = vpop.f32.mrf.mxu1  ;;  %v2776_v33 = vmul.f32 0.5, %v3613_v19 }
 0x594   :  { %v3309_v54 = vpop.f32.mrf.mxu0 }
 0x595   :  { %v4975_v29 = vpop.f32.mrf.mxu1  ;;  %v2791_v11 = vadd.f32 0.5, %v2776_v33 }
 0x596   :  { %v3615_v58 = vpop.eup %3614  ;;  %v3310_v36 = vpop.f32.mrf.mxu0 }
 0x597   :  { %v2705_v25 = vpop.f32.mrf.mxu1  ;;  %v2777_v32 = vmul.f32 0.5, %v3615_v58 }
 0x598   :  { %v3312_v48 = vpop.f32.mrf.mxu0 }
 0x599   :  { %v4977_v62 = vpop.f32.mrf.mxu1  ;;  %v2792_v30 = vadd.f32 0.5, %v2777_v32 }
 0x59a   :  { %v3617_v23 = vpop.eup %3616  ;;  %v3313_v21 = vpop.f32.mrf.mxu0 }
 0x59b   :  { %v2710_v24 = vpop.f32.mrf.mxu1  ;;  %v4979_v14 = vpack.c.bf16 %v2792_v30, %v2791_v11  ;;  %v2778_v50 = vmul.f32 0.5, %v3617_v23  ;;  %v3314_v32 = vadd.f32 %v3313_v21, %v3312_v48 }
 0x59c   :  { %v3315_v28 = vpop.f32.mrf.mxu0 }
 0x59d   :  { %v4981_v38 = vpop.f32.mrf.mxu1  ;;  %v2793_v45 = vadd.f32 0.5, %v2778_v50 }
 0x59e   :  { %v3619_v56 = vpop.eup %3618  ;;  %v3316_v2 = vpop.f32.mrf.mxu0 }
 0x59f   :  { %v2713_v40 = vpop.f32.mrf.mxu1  ;;  %v2779_v35 = vmul.f32 0.5, %v3619_v56  ;;  %v3317_v58 = vadd.f32 %v3316_v2, %v3315_v28  ;;  %v2624_v28 = vadd.f32 %v3314_v32, %v4947_v26 }
 0x5a0   :  { %v3318_v7 = vpop.f32.mrf.mxu0 }
 0x5a1   :  { %v2716_v34 = vpop.f32.mrf.mxu1  ;;  %v2794_v49 = vadd.f32 0.5, %v2779_v35 }
 0x5a2   :  { %v3319_v60 = vpop.f32.mrf.mxu0 }
 0x5a3   :  { %v2718_v0 = vpop.f32.mrf.mxu1  ;;  %v4983_v52 = vpack.c.bf16 %v2794_v49, %v2793_v45  ;;  %v3320_v22 = vadd.f32 %v3319_v60, %v3318_v7  ;;  %v3311_v7 = vadd.f32 %v3310_v36, %v3309_v54  ;;  %v2629_v45 = vadd.f32 %v3317_v58, %v4941_v44 }
 0x5a4   :  { %v3321_v18 = vpop.f32.mrf.mxu0  ;;  %v3308_v60 = vadd.f32 %v3307_v63, %v4971_v47  ;;  %v3305_v0 = vadd.f32 %v4969_v53, %v4967_v27  ;;  %v3302_v47 = vadd.f32 %v4965_v20, %v4963_v42 }
 0x5a5   :  { %v2719_v1 = vpop.f32.mrf.mxu1  ;;  %v2632_v11 = vadd.f32 %v3320_v22, %v4943_v6  ;;  %v2621_v54 = vadd.f32 %v3311_v7, %v4945_v10 }
 0x5a6   :  { %v3322_v17 = vpop.f32.mrf.mxu0  ;;  %v2720_v36 = vadd.f32 %v2719_v1, %v2624_v28  ;;  %v2616_v26 = vadd.f32 %v3308_v60, %v4954_v39  ;;  %v2613_v27 = vadd.f32 %v3305_v0, %v4949_v8  ;;  %v2605_v39 = vadd.f32 %v4961_v13, %v4957_v12 }
 0x5a7   :  { %v2721_v51 = vpop.f32.mrf.mxu1  ;;  %v3323_v55 = vadd.f32 %v3322_v17, %v3321_v18  ;;  %v2717_v17 = vadd.f32 %v2716_v34, %v2621_v54 }
 0x5a8   :  { %v3324_v37 = vpop.f32.mrf.mxu0  ;;  %v2712_v53 = vadd.f32 %v4981_v38, %v2616_v26  ;;  %v2755_v10 = vmul.f32 0.5, %v2720_v36  ;;  %v2709_v42 = vadd.f32 %v4977_v62, %v2613_v27  ;;  %v2701_v8 = vadd.f32 %v4973_v61, %v2605_v39  ;;  %v3565_v26 = vld [vmem:[%s5058_s7 + $0x20] sm:$0xff]  }
 0x5a9   :  { %v2724_v57 = vpop.f32.mrf.mxu1  ;;  %v2637_v25 = vadd.f32 %v3323_v55, %v4937_v15  ;;  %v2754_v20 = vmul.f32 0.5, %v2717_v17  ;;  %v2889_v17 = vpop.permute.xlu1 %2888 }
 0x5aa   :  { %v3325_v16 = vpop.f32.mrf.mxu0  ;;  %v2725_v48 = vadd.f32 %v2724_v57, %v2629_v45  ;;  %v2608_v57 = vadd.f32 %v3302_v47, %v4959_v31  ;;  %v3563_v47 = vld [vmem:[%s5058_s7 + $0x10] sm:$0xff]  }
 0x5ab   :  { %v2726_v43 = vpop.f32.mrf.mxu1  ;;  %v3326_v19 = vadd.f32 %v3325_v16, %v3324_v37  ;;  %v2753_v16 = vmul.f32 0.5, %v2712_v53  ;;  %v2879_v53 = vpop.permute.xlu0 %2878 }
 0x5ac   :  { %v3327_v5 = vpop.f32.mrf.mxu0  ;;  %v2756_v51 = vmul.f32 0.5, %v2725_v48  ;;  %v2704_v34 = vadd.f32 %v4975_v29, %v2608_v57  ;;  %v2752_v43 = vmul.f32 0.5, %v2709_v42 }
 0x5ad   :  { %v2727_v46 = vpop.f32.mrf.mxu1  ;;  %v2640_v56 = vadd.f32 %v3326_v19, %v4939_v41 }
 0x5ae   :  { %v3328_v59 = vpop.f32.mrf.mxu0  ;;  %v2728_v40 = vadd.f32 %v2727_v46, %v2632_v11  ;;  %v2751_v38 = vmul.f32 0.5, %v2704_v34  ;;  %v2750_v46 = vmul.f32 0.5, %v2701_v8 }
 0x5af   :  { %v2729_v9 = vpop.f32.mrf.mxu1  ;;  %v3329_v24 = vadd.f32 %v3328_v59, %v3327_v5 }
 0x5b0   :  { %v3330_v3 = vpop.f32.mrf.mxu0  ;;  %v2757_v41 = vmul.f32 0.5, %v2728_v40 }
 0x5b1   :  { %v2732_v33 = vpop.f32.mrf.mxu1  ;;  %v2645_v2 = vadd.f32 %v3329_v24, %v4935_v4 }
 0x5b2   :  { %v3331_v30 = vpop.f32.mrf.mxu0  ;;  %v2733_v50 = vadd.f32 %v2732_v33, %v2637_v25 }
 0x5b3   :  { %v2734_v23 = vpop.f32.mrf.mxu1 }
 0x5b4   :  { %v2758_v21 = vmul.f32 0.5, %v2733_v50 }
 0x5b5   :  { %v2735_v35 = vpop.f32.mrf.mxu1 }
 0x5b6   :  { %v2736_v49 = vadd.f32 %v2735_v35, %v2640_v56 }
 0x5b7   :  { %v2737_v15 = vpop.f32.mrf.mxu1 }
 0x5b8   :  { %v2759_v6 = vmul.f32 0.5, %v2736_v49 }
 0x5b9   :  { %v2740_v18 = vpop.f32.mrf.mxu1 }
 0x5ba   :  { %3620 = vtanh.f32 %v2759_v6  ;;  %v2741_v44 = vadd.f32 %v2740_v18, %v2645_v2 }
 0x5bb   :  { %v2742_v63 = vpop.f32.mrf.mxu1  ;;  %3622 = vtanh.f32 %v2758_v21 }
 0x5bc   :  { %v2760_v4 = vmul.f32 0.5, %v2741_v44  ;;  %3624 = vtanh.f32 %v2757_v41  ;;  %v3562_v44 = vld [vmem:[%s5058_s7 + $0x8] sm:$0xff]   ;;  %v3725_v63 = vmov 0.0  }
 0x5bd   :  { %v2743_v37 = vpop.f32.mrf.mxu1  ;;  %3382 = vmatprep.subr.bf16.mxu1 %v3725_v63  ;;  %3394 = vmatprep.mubr.msk.bf16.mxu1 %vm3726_vm10, %v3725_v63 }
 0x5be   :  { %3626 = vtanh.f32 %v2760_v4  ;;  %v2884_v37 = vpop.permute.xlu1 %2883 }
 0x5bf   :  { %v2744_v1 = vpop.f32.mrf.mxu1  ;;  %3628 = vtanh.f32 %v2756_v51 }
 0x5c0   :  { %3630 = vtanh.f32 %v2755_v10 }
 0x5c1   :  { %3632 = vtanh.f32 %v2754_v20  ;;  %v2869_v20 = vpop.permute.xlu0 %2868 }
 0x5c2   :  { %3634 = vtanh.f32 %v2753_v16  ;;  %v2874_v57 = vpop.permute.xlu1 %2873 }
 0x5c3   :  { %3636 = vtanh.f32 %v2752_v43 }
 0x5c4   :  { %3638 = vtanh.f32 %v2751_v38 }
 0x5c5   :  { %3640 = vtanh.f32 %v2750_v46 }
 0x5c6   :  { %v2864_v16 = vpop.permute.xlu1 %2863 }
 0x5c7   :  { %v3621_v5 = vpop.eup %3620 }
 0x5c8   :  { %v3623_v31 = vpop.eup %3622  ;;  %v2789_v55 = vmul.f32 0.5, %v3621_v5  ;;  %v2859_v5 = vpop.permute.xlu0 %2858 }
 0x5c9   :  { %v3625_v62 = vpop.eup %3624  ;;  %v2788_v12 = vmul.f32 0.5, %v3623_v31 }
 0x5ca   :  { %v2787_v59 = vmul.f32 0.5, %v3625_v62  ;;  %v2804_v9 = vadd.f32 0.5, %v2789_v55 }
 0x5cb   :  { %v3627_v22 = vpop.eup %3626  ;;  %v2803_v33 = vadd.f32 0.5, %v2788_v12 }
 0x5cc   :  { %v2790_v13 = vmul.f32 0.5, %v3627_v22  ;;  %v3629_v29 = vpop.eup %3628  ;;  %v2802_v11 = vadd.f32 0.5, %v2787_v59  ;;  %v2854_v59 = vpop.permute.xlu1 %2853 }
 0x5cd   :  { %v3631_v61 = vpop.eup %3630  ;;  %v2786_v3 = vmul.f32 0.5, %v3629_v29  ;;  %v2823_v23 = vpack.c.bf16 %v2804_v9, %v2803_v33  ;;  %v2849_v33 = vpop.permute.xlu0 %2848 }
 0x5ce   :  { %v2805_v19 = vadd.f32 0.5, %v2790_v13  ;;  %v3633_v25 = vpop.eup %3632  ;;  %v2785_v32 = vmul.f32 0.5, %v3631_v61 }
 0x5cf   :  { %v3635_v24 = vpop.eup %3634  ;;  %v2784_v50 = vmul.f32 0.5, %v3633_v25  ;;  %v2801_v56 = vadd.f32 0.5, %v2786_v3 }
 0x5d0   :  { %v2824_v58 = vpack.c.bf16 %v2805_v19, %v2805_v19  ;;  %v3637_v40 = vpop.eup %3636  ;;  %v2783_v35 = vmul.f32 0.5, %v3635_v24  ;;  %v2800_v7 = vadd.f32 0.5, %v2785_v32 }
 0x5d1   :  { %v2822_v45 = vpack.c.bf16 %v2802_v11, %v2801_v56  ;;  %v3639_v49 = vpop.eup %3638  ;;  %v2782_v60 = vmul.f32 0.5, %v3637_v40  ;;  %v2799_v28 = vadd.f32 0.5, %v2784_v50  ;;  %v2839_v56 = vpop.permute.xlu0 %2838 }
 0x5d2   :  { %3398 = vmatprep.subr.msk.bf16.mxu0 %vm5065_vm8, %v2824_v58  ;;  %v2939_v30 = vsel %vm5066_vm9, %v2824_v58, 0  ;;  %v3641_v15 = vpop.eup %3640  ;;  %v2781_v48 = vmul.f32 0.5, %v3639_v49  ;;  %v2798_v21 = vadd.f32 0.5, %v2783_v35 }
 0x5d3   :  { %3355 = vmatpush3.bf16.msra.mxu0 %v2939_v30  ;;  %v2821_v6 = vpack.c.bf16 %v2800_v7, %v2799_v28  ;;  %v2780_v2 = vmul.f32 0.5, %v3641_v15  ;;  %v2797_v0 = vadd.f32 0.5, %v2782_v60 }
 0x5d4   :  { %3356 = vmatprep.subr.bf16.mxu0 %v2823_v23  ;;  %v2796_v41 = vadd.f32 0.5, %v2781_v48 }
 0x5d5   :  { %v2820_v18 = vpack.c.bf16 %v2798_v21, %v2797_v0  ;;  %v2795_v54 = vadd.f32 0.5, %v2780_v2 }
 0x5d7   :  { %3357 = vmatpush3.bf16.msra.mxu0 %v2823_v23  ;;  %v2819_v36 = vpack.c.bf16 %v2796_v41, %v2795_v54  ;;  %v2844_v23 = vpop.permute.xlu1 %2843 }
 0x5d8   :  { %3358 = vmatprep.subr.bf16.mxu0 %v2822_v45 }
 0x5db   :  { %3359 = vmatpush3.bf16.msra.mxu0 %v2822_v45 }
 0x5dc   :  { %3360 = vmatprep.subr.bf16.mxu0 %v2821_v6 }
 0x5df   :  { %3361 = vmatpush3.bf16.msra.mxu0 %v2821_v6 }
 0x5e0   :  { %3362 = vmatprep.subr.bf16.mxu0 %v2820_v18 }
 0x5e3   :  { %3363 = vmatpush3.bf16.msra.mxu0 %v2820_v18 }
 0x5e4   :  { %3364 = vmatprep.subr.bf16.mxu0 %v2819_v36 }
 0x5e7   :  { %3365 = vmatpush3.bf16.msra.mxu0 %v2819_v36 }
 0x5e8   :  { %3366 = vmatprep.subr.bf16.mxu0 %v4983_v52 }
 0x5eb   :  { %3367 = vmatpush3.bf16.msra.mxu0 %v4983_v52  ;;  %v3564_v52 = vld [vmem:[%s5058_s7 + $0x18] sm:$0xff]  }
 0x5ec   :  { %3368 = vmatprep.subr.bf16.mxu0 %v4979_v14 }
 0x5ef   :  { %3369 = vmatpush3.bf16.msra.mxu0 %v4979_v14  ;;  %v3566_v14 = vld [vmem:[%s5058_s7 + $0x28] ss:$0 sps:$4 sm:$0x33]  }
 0x5f2   :  { %3371 = vmatmul.mubr.msk.bf16.vlgmr.msra.gmra.mxu0 %vm2919_vm5, %v3562_v44 }
 0x5f3   :  { %3374 = vmatprep.mubr.msk.bf16.mxu0 %vm2919_vm5, %v3563_v47 }
 0x5fa   :  { %3375 = vmatmul.mubr.msk.bf16.gmra.mxu0 %vm2919_vm5, %v3564_v52 }
 0x5fb   :  { %3378 = vmatprep.mubr.msk.bf16.mxu0 %vm2919_vm5, %v3565_v26 }
 0x602   :  { %3379 = vmatmul.mubr.msk.bf16.gmra.mxu0 %vm2919_vm5, %v3566_v14 }
 0x6b2   :  { %v3372_v51 = vpop.f32.mrf.mxu0 }
 0x6b3   :  { %v2984_v11 = vadd.f32 %v3372_v51, %v2849_v33 }
 0x6b4   :  { %v2975_v4 = vpop.f32.mrf.mxu0 }
 0x6b5   :  { %v3023_v40 = vmul.f32 0.5, %v2984_v11  ;;  %v2976_v35 = vadd.f32 %v2975_v4, %v2839_v56 }
 0x6b6   :  { %v3373_v27 = vpop.f32.mrf.mxu0 }
 0x6b7   :  { %v2987_v58 = vadd.f32 %v3373_v27, %v2854_v59  ;;  %v3021_v49 = vmul.f32 0.5, %v2976_v35 }
 0x6b8   :  { %v2978_v10 = vpop.f32.mrf.mxu0 }
 0x6b9   :  { %v3024_v24 = vmul.f32 0.5, %v2987_v58  ;;  %v2979_v50 = vadd.f32 %v2978_v10, %v2844_v23 }
 0x6ba   :  { %v3376_v1 = vpop.f32.mrf.mxu0 }
 0x6bb   :  { %v3000_v46 = vadd.f32 %v3376_v1, %v2869_v20  ;;  %v3022_v7 = vmul.f32 0.5, %v2979_v50 }
 0x6bc   :  { %v2991_v42 = vpop.f32.mrf.mxu0 }
 0x6bd   :  { %v3027_v9 = vmul.f32 0.5, %v3000_v46  ;;  %v2992_v61 = vadd.f32 %v2991_v42, %v2859_v5 }
 0x6be   :  { %v3377_v39 = vpop.f32.mrf.mxu0 }
 0x6bf   :  { %v3003_v43 = vadd.f32 %v3377_v39, %v2874_v57  ;;  %v3025_v30 = vmul.f32 0.5, %v2992_v61 }
 0x6c0   :  { %v2994_v34 = vpop.f32.mrf.mxu0 }
 0x6c1   :  { %v3028_v12 = vmul.f32 0.5, %v3003_v43  ;;  %v2995_v13 = vadd.f32 %v2994_v34, %v2864_v16 }
 0x6c2   :  { %v3380_v8 = vpop.f32.mrf.mxu0 }
 0x6c3   :  { %v3016_v38 = vadd.f32 %v3380_v8, %v2889_v17  ;;  %v3026_v25 = vmul.f32 0.5, %v2995_v13 }
 0x6c4   :  { %v3007_v31 = vpop.f32.mrf.mxu0 }
 0x6c5   :  { %v3031_v62 = vmul.f32 0.5, %v3016_v38  ;;  %v3008_v55 = vadd.f32 %v3007_v31, %v2879_v53 }
 0x6c6   :  { %v3381_v22 = vpop.f32.mrf.mxu0 }
 0x6c7   :  { %3642 = vtanh.f32 %v3031_v62  ;;  %v3029_v29 = vmul.f32 0.5, %v3008_v55  ;;  %v3567_v22 = vld [vmem:[%s5059_s9] sm:$0x1f]  }
 0x6c8   :  { %v3010_v19 = vpop.f32.mrf.mxu0 }
 0x6c9   :  { %3644 = vtanh.f32 %v3029_v29  ;;  %v3011_v3 = vadd.f32 %v3010_v19, %v2884_v37 }
 0x6ca   :  { %3646 = vtanh.f32 %v3028_v12  ;;  %v3078_v12 = vpop.permute.xlu0 %3077 }
 0x6cb   :  { %v3030_v32 = vmul.f32 0.5, %v3011_v3  ;;  %3648 = vtanh.f32 %v3027_v9  ;;  %v3083_v9 = vpop.permute.xlu1 %3082 }
 0x6cd   :  { %3650 = vtanh.f32 %v3030_v32 }
 0x6ce   :  { %3652 = vtanh.f32 %v3026_v25 }
 0x6cf   :  { %3654 = vtanh.f32 %v3025_v30 }
 0x6d0   :  { %3656 = vtanh.f32 %v3024_v24 }
 0x6d1   :  { %3658 = vtanh.f32 %v3023_v40 }
 0x6d2   :  { %3660 = vtanh.f32 %v3022_v7 }
 0x6d3   :  { %3662 = vtanh.f32 %v3021_v49 }
 0x6d4   :  { %v3643_v45 = vpop.eup %3642 }
 0x6d5   :  { %v3053_v60 = vmul.f32 0.5, %v3643_v45 }
 0x6d6   :  { %v3645_v28 = vpop.eup %3644 }
 0x6d7   :  { %v3064_v15 = vadd.f32 0.5, %v3053_v60  ;;  %v3647_v48 = vpop.eup %3646  ;;  %v3051_v6 = vmul.f32 0.5, %v3645_v28 }
 0x6d8   :  { %v3649_v21 = vpop.eup %3648  ;;  %v3050_v41 = vmul.f32 0.5, %v3647_v48 }
 0x6d9   :  { %v3072_v2 = vpack.c.bf16 %v3064_v15, %v3064_v15  ;;  %v3049_v44 = vmul.f32 0.5, %v3649_v21  ;;  %v3062_v47 = vadd.f32 0.5, %v3051_v6 }
 0x6da   :  { %v3651_v0 = vpop.eup %3650  ;;  %v3061_v14 = vadd.f32 0.5, %v3050_v41 }
 0x6db   :  { %v3052_v18 = vmul.f32 0.5, %v3651_v0  ;;  %v3095_v54 = vsel %vm3093_vm11, %v3072_v2, 0  ;;  %v3653_v36 = vpop.eup %3652  ;;  %v3060_v37 = vadd.f32 0.5, %v3049_v44 }
 0x6dc   :  { %3383 = vmatpush3.bf16.msra.mxu1 %v3095_v54  ;;  %v3655_v26 = vpop.eup %3654  ;;  %v3048_v17 = vmul.f32 0.5, %v3653_v36 }
 0x6dd   :  { %v3063_v52 = vadd.f32 0.5, %v3052_v18  ;;  %3384 = vmatprep.subr.bf16.mxu1 %v3725_v63  ;;  %v3657_v4 = vpop.eup %3656  ;;  %v3047_v27 = vmul.f32 0.5, %v3655_v26  ;;  %v3070_v57 = vpack.c.bf16 %v3061_v14, %v3060_v37 }
 0x6de   :  { %v3659_v53 = vpop.eup %3658  ;;  %v3046_v10 = vmul.f32 0.5, %v3657_v4  ;;  %v3059_v1 = vadd.f32 0.5, %v3048_v17 }
 0x6df   :  { %v3071_v51 = vpack.c.bf16 %v3063_v52, %v3062_v47  ;;  %v3661_v42 = vpop.eup %3660  ;;  %v3045_v20 = vmul.f32 0.5, %v3659_v53  ;;  %v3058_v39 = vadd.f32 0.5, %v3047_v27 }
 0x6e0   :  { %v3663_v34 = vpop.eup %3662  ;;  %v3057_v16 = vadd.f32 0.5, %v3046_v10  ;;  %v3044_v8 = vmul.f32 0.5, %v3661_v42 }
 0x6e1   :  { %3385 = vmatpush3.bf16.msra.mxu1 %v3071_v51  ;;  %v3069_v43 = vpack.c.bf16 %v3059_v1, %v3058_v39  ;;  %v3056_v38 = vadd.f32 0.5, %v3045_v20  ;;  %v3043_v5 = vmul.f32 0.5, %v3663_v34 }
 0x6e2   :  { %3386 = vmatprep.subr.bf16.mxu1 %v3725_v63  ;;  %v3055_v46 = vadd.f32 0.5, %v3044_v8 }
 0x6e3   :  { %v3068_v31 = vpack.c.bf16 %v3057_v16, %v3056_v38  ;;  %v3054_v62 = vadd.f32 0.5, %v3043_v5 }
 0x6e5   :  { %3387 = vmatpush3.bf16.msra.mxu1 %v3070_v57  ;;  %v3067_v55 = vpack.c.bf16 %v3055_v46, %v3054_v62 }
 0x6e6   :  { %3388 = vmatprep.subr.bf16.mxu1 %v3725_v63 }
 0x6e9   :  { %3389 = vmatpush3.bf16.msra.mxu1 %v3069_v43 }
 0x6ea   :  { %3390 = vmatprep.subr.bf16.mxu1 %v3725_v63 }
 0x6ed   :  { %3391 = vmatpush3.bf16.msra.mxu1 %v3068_v31 }
 0x6ee   :  { %3392 = vmatprep.subr.bf16.mxu1 %v3725_v63 }
 0x6f1   :  { %3393 = vmatpush3.bf16.msra.mxu1 %v3067_v55 }
 0x6f4   :  { %3395 = vmatmul.mubr.msk.bf16.vlgmr.msra.gmra.mxu1 %vm1053_vm1, %v3567_v22 }
 0x7b4   :  { %v3131_v13 = vpop.f32.mrf.mxu1 }
 0x7b5   :  { %v3132_v29 = vadd.f32 %v3131_v13, %v3078_v12 }
 0x7b6   :  { %v3396_v59 = vpop.f32.mrf.mxu1 }
 0x7b7   :  { %3139 = vst.msk [vmem:[%s5060_s11] sm:$0xff] %vm3138_vm7, %v3132_v29 }
 0x7b8   :  { %v3134_v19 = vpop.f32.mrf.mxu1 }
 0x7b9   :  { %v3135_v63 = vadd.f32 %v3134_v19, %v3083_v9 }
 0x7ba   :  { %v3397_v61 = vpop.f32.mrf.mxu1 }
 0x7bb   :  { %3141 = vst.msk [vmem:[%s5060_s11 + $0x8] sm:$0x3] %vm3140_vm12, %v3135_v63 }

</bundles_post_ra>
